<compile_context>
chip_gen: v6e
topology: v6e:2x2x1
jax: 0.10.0
libtpu: 0.0.40
codegen_flags: <defaults>
</compile_context>

<pallas_src>
import functools

import jax
import jax.numpy as jnp
import numpy as np
from jax.experimental import pallas as pl
from jax.experimental.pallas import tpu as pltpu


def cenn_kernel(x_ref,      # (D_in, tile_n)  transposed input tile (points on lanes)
                w1_ref,     # (H, D_in)   scale-folded, f32
                b1_ref,     # (H, 1)      scale-folded, f32
                wmid_ref,   # (3, H, H)   scale-folded, mxu_dtype (layers 2..4)
                bmid_ref,   # (3, H, 1)   scale-folded, f32
                w5_ref,     # (H, D_out)  f32
                b5_ref,     # (D_out, 1)  f32
                o_ref,      # (D_out, tile_n) f32
                *, act_dtype, mxu_dtype):
    xT = x_ref[...]
    D_in = x_ref.shape[0]
    D_out = o_ref.shape[0]

    # ---- layer 1: K = D_in (tiny) -> VPU broadcast-FMA in f32, no MXU -----------
    pre = b1_ref[...]                                     # (H, 1), broadcasts
    for d in range(D_in):                                 # static unroll (D_in = 2)
        pre = pre + w1_ref[:, d:d + 1] * xT[d:d + 1, :]
    y = jnp.tanh(pre.astype(act_dtype))                   # (H, tile_n)

    # ---- layers 2..4: H x H on the MXU (bf16 operands, f32 accumulate) ----------
    for k in range(wmid_ref.shape[0]):                    # static unroll (3)
        acc = jnp.dot(wmid_ref[k], y.astype(mxu_dtype),
                      preferred_element_type=jnp.float32)  # (H, tile_n) f32
        y = jnp.tanh((acc + bmid_ref[k]).astype(act_dtype))

    # ---- layer 5: D_out tiny -> VPU multiply + XLU sublane reduce in f32 --------
    y32 = y.astype(jnp.float32)
    if D_out == 1:
        out = jnp.sum(w5_ref[...] * y32, axis=0, keepdims=True) + b5_ref[...]
    else:
        out = (jnp.einsum("hd,hn->dn", w5_ref[...], y32,
                          preferred_element_type=jnp.float32) + b5_ref[...])

    o_ref[...] = out.astype(o_ref.dtype)                  # lane-dense store


def pad_points(xT, tile_n):
    """ONE-TIME layout plumbing: lane-pad (D_in, N) points to a tile_n multiple.

    PINN collocation points are static across a training loop, so do this once at
    setup -- it must not sit on the per-step forward path.
    """
    D_in, N = xT.shape
    n_tiles = max(pl.cdiv(N, tile_n), 1)
    N_pad = n_tiles * tile_n
    if N_pad == N:
        return xT.astype(jnp.float32), N
    xpad = jnp.zeros((D_in, N_pad), jnp.float32).at[:, :N].set(xT)
    return xpad, N


def general_l_forward_T(xT, packed, *, tile_n,
                        act_dtype=jnp.bfloat16, mxu_dtype=jnp.bfloat16):
    """xT: (D_in, N_pad) f32, N_pad % tile_n == 0.  Returns (D_out, N_pad) f32."""
    D_in, N_pad = xT.shape
    H, D_out = packed["w5"].shape
    assert N_pad % tile_n == 0, "pad points once with pad_points()"
    n_tiles = N_pad // tile_n

    kernel = functools.partial(cenn_kernel, act_dtype=act_dtype, mxu_dtype=mxu_dtype)

    in_specs = [
        pl.BlockSpec((D_in, tile_n), lambda i: (0, i)),     # x tile over lanes
        pl.BlockSpec((H, D_in), lambda i: (0, 0)),          # w1 (resident)
        pl.BlockSpec((H, 1), lambda i: (0, 0)),             # b1
        pl.BlockSpec((3, H, H), lambda i: (0, 0, 0)),       # w2..w4 packed
        pl.BlockSpec((3, H, 1), lambda i: (0, 0, 0)),       # b2..b4 packed
        pl.BlockSpec((H, D_out), lambda i: (0, 0)),         # w5 (transposed)
        pl.BlockSpec((D_out, 1), lambda i: (0, 0)),         # b5
    ]
    out_spec = pl.BlockSpec((D_out, tile_n), lambda i: (0, i))

    return pl.pallas_call(
        kernel,
        out_shape=jax.ShapeDtypeStruct((D_out, N_pad), jnp.float32),
        grid=(n_tiles,),
        in_specs=in_specs,
        out_specs=out_spec,
        compiler_params=pltpu.CompilerParams(
            dimension_semantics=("parallel",)),
    )(xT, packed["w1"], packed["b1"], packed["wmid"], packed["bmid"],
      packed["w5"], packed["b5"])


def init_params(key, D_in, H, D_out):
    """PyTorch-orientation params: W_i is (out, in), b_i is (out,)."""
    ks = jax.random.split(key, 10)

    def nrm(k, shape, std):
        return std * jax.random.normal(k, shape, dtype=jnp.float32)

    return {
        "w1": nrm(ks[0], (H, D_in),  np.sqrt(2.0 / (D_in + H))),
        "w2": nrm(ks[1], (H, H),     np.sqrt(2.0 / (H + H))),
        "w3": nrm(ks[2], (H, H),     np.sqrt(2.0 / (H + H))),
        "w4": nrm(ks[3], (H, H),     np.sqrt(2.0 / (H + H))),
        "w5": nrm(ks[4], (D_out, H), np.sqrt(2.0 / (H + D_out))),
        "b1": nrm(ks[5], (H,), 1.0),
        "b2": nrm(ks[6], (H,), 1.0),
        "b3": nrm(ks[7], (H,), 1.0),
        "b4": nrm(ks[8], (H,), 1.0),
        "b5": nrm(ks[9], (D_out,), 1.0),
    }


def fold_scales(params, scales):
    """tanh(s*(x@W.T + b)) == tanh(x@(s*W).T + s*b): fold scales host-side."""
    folded = {}
    for i in range(1, 5):
        folded[f"w{i}"] = scales[i - 1] * params[f"w{i}"]
        folded[f"b{i}"] = scales[i - 1] * params[f"b{i}"]
    folded["w5"] = params["w5"]
    folded["b5"] = params["b5"]
    return folded


def pack_params(folded, mxu_dtype=jnp.bfloat16):
    """Arrange folded params in the layout/dtypes the kernel consumes."""
    H = folded["w1"].shape[0]
    D_out = folded["w5"].shape[0]
    return dict(
        w1=folded["w1"].astype(jnp.float32),                          # (H, D_in)
        b1=folded["b1"].reshape(H, 1).astype(jnp.float32),
        wmid=jnp.stack([folded["w2"], folded["w3"],
                        folded["w4"]]).astype(mxu_dtype),              # (3, H, H)
        bmid=jnp.stack([folded["b2"], folded["b3"],
                        folded["b4"]]).reshape(3, H, 1).astype(jnp.float32),
        w5=folded["w5"].T.astype(jnp.float32),                         # (H, D_out)
        b5=folded["b5"].reshape(D_out, 1).astype(jnp.float32),
    )


def reference_forward(x, params, scales):
    y = x
    for i in range(1, 5):
        y = jnp.tanh(scales[i - 1] * (y @ params[f"w{i}"].T + params[f"b{i}"]))
    return y @ params["w5"].T + params["b5"]


def _is_v5e():
    """Best-effort: v5e has no bf16 VPU/EUP path, so keep tanh in f32 there."""
    try:
        kind = jax.devices()[0].device_kind.lower()
        return ("v5 lite" in kind) or ("v5lite" in kind) or ("v5e" in kind)
    except Exception:
        return False


if __name__ == "__main__":
    # Shapes consistent with the module's usage: 2-D collocation points from a
    # 100x100 linspace(-1, 1) grid -> scalar field.
    D_in, H, D_out = 2, 32, 1
    N_test = 100
    gx = jnp.linspace(-1.0, 1.0, N_test)
    gy = jnp.linspace(-1.0, 1.0, N_test)
    X, Y = jnp.meshgrid(gx, gy, indexing="ij")
    # Collocation points built directly in the kernel's (D_in, N) lane-major layout
    # (no per-call transpose needed).
    xT_points = jnp.stack([X.ravel(), Y.ravel()], axis=0).astype(jnp.float32)  # (2, 10000)

    key = jax.random.PRNGKey(0)
    params = init_params(key, D_in, H, D_out)

    # a_i are trainable (non-trivial values so a misplaced scale would be caught);
    # n_i is the fixed buffer 1 / a_i(init) = 1 / 0.1.
    a = jnp.array([0.12, 0.08, 0.20, 0.05], dtype=jnp.float32)
    n = jnp.full((4,), 1.0 / 0.1, dtype=jnp.float32)
    scales = n * a
    folded = fold_scales(params, scales)

    tile_n = 2560                       # N=10000 -> 4 tiles: even split on v7x's 2 TCs
    xT, N = pad_points(xT_points, tile_n)   # one-time pad, outside the hot path

    ref = reference_forward(xT_points.T, params, scales)   # validation-only transpose

    # --- strict f32 config: exact structural check (same math as the reference) ---
    packed_f32 = pack_params(folded, mxu_dtype=jnp.float32)
    out_f32 = general_l_forward_T(xT, packed_f32, tile_n=tile_n,
                                  act_dtype=jnp.float32, mxu_dtype=jnp.float32)
    out_f32 = jax.block_until_ready(out_f32)[:, :N].T      # validation-only plumbing
    np.testing.assert_allclose(np.asarray(out_f32), np.asarray(ref),
                               rtol=1e-4, atol=1e-4)

    # --- perf config: bf16 MXU operands; bf16 tanh on v6e/v7x, f32 tanh on v5e ---
    act_dtype = jnp.float32 if _is_v5e() else jnp.bfloat16
    packed_bf16 = pack_params(folded, mxu_dtype=jnp.bfloat16)
    out_bf = general_l_forward_T(xT, packed_bf16, tile_n=tile_n,
                                 act_dtype=act_dtype, mxu_dtype=jnp.bfloat16)
    out_bf = jax.block_until_ready(out_bf)[:, :N].T
    assert out_bf.shape == (N, D_out)

    err = np.abs(np.asarray(out_bf) - np.asarray(ref))
    err_max = float(err.max())
    err_rms = float(np.sqrt((err ** 2).mean()))
    assert err_max < 0.2 and err_rms < 0.05, (err_max, err_rms)

    print("KERNEL_OK")
</pallas_src>

<mosaic_0001>
module attributes {stable_mosaic.version = 11 : i64} {
  func.func @cenn_kernel(%arg0: i32, %arg1: memref<2x2560xf32, #tpu.memory_space<vmem>>, %arg2: memref<32x2xf32, #tpu.memory_space<vmem>>, %arg3: memref<32x1xf32, #tpu.memory_space<vmem>>, %arg4: memref<3x32x32xf32, #tpu.memory_space<vmem>>, %arg5: memref<3x32x1xf32, #tpu.memory_space<vmem>>, %arg6: memref<32x1xf32, #tpu.memory_space<vmem>>, %arg7: memref<1x1xf32, #tpu.memory_space<vmem>>, %arg8: memref<1x2560xf32, #tpu.memory_space<vmem>>) attributes {dimension_semantics = [#tpu.dimension_semantics<parallel>], iteration_bounds = array<i64: 4>, scalar_prefetch = 0 : i64, scratch_operands = 0 : i64, tpu.core_type = #tpu.core_type<tc>, window_params = [{transform_indices = @transform_0, window_bounds = array<i64: 2, 2560>}, {pipeline_mode = #tpu.pipeline_mode<synchronous>, transform_indices = @transform_1, window_bounds = array<i64: 32, 2>}, {pipeline_mode = #tpu.pipeline_mode<synchronous>, transform_indices = @transform_2, window_bounds = array<i64: 32, 1>}, {pipeline_mode = #tpu.pipeline_mode<synchronous>, transform_indices = @transform_3, window_bounds = array<i64: 3, 32, 32>}, {pipeline_mode = #tpu.pipeline_mode<synchronous>, transform_indices = @transform_4, window_bounds = array<i64: 3, 32, 1>}, {pipeline_mode = #tpu.pipeline_mode<synchronous>, transform_indices = @transform_5, window_bounds = array<i64: 32, 1>}, {pipeline_mode = #tpu.pipeline_mode<synchronous>, transform_indices = @transform_6, window_bounds = array<i64: 1, 1>}, {transform_indices = @transform_7, window_bounds = array<i64: 1, 2560>}]} {
    %c0 = arith.constant 0 : index
    %c0_0 = arith.constant 0 : index
    %0 = vector.load %arg1[%c0, %c0_0] : memref<2x2560xf32, #tpu.memory_space<vmem>>, vector<2x2560xf32>
    %c0_1 = arith.constant 0 : index
    %c0_2 = arith.constant 0 : index
    %1 = vector.load %arg3[%c0_1, %c0_2] : memref<32x1xf32, #tpu.memory_space<vmem>>, vector<32x1xf32>
    %c0_3 = arith.constant 0 : index
    %c0_4 = arith.constant 0 : index
    %2 = vector.load %arg2[%c0_3, %c0_4] : memref<32x2xf32, #tpu.memory_space<vmem>>, vector<32x1xf32>
    %3 = vector.extract_strided_slice %0 {offsets = [0, 0], sizes = [1, 2560], strides = [1, 1]} : vector<2x2560xf32> to vector<1x2560xf32>
    %4 = vector.broadcast %2 : vector<32x1xf32> to vector<32x2560xf32>
    %5 = vector.broadcast %3 : vector<1x2560xf32> to vector<32x2560xf32>
    %6 = arith.mulf %4, %5 : vector<32x2560xf32>
    %7 = vector.broadcast %1 : vector<32x1xf32> to vector<32x2560xf32>
    %8 = arith.addf %7, %6 : vector<32x2560xf32>
    %c0_5 = arith.constant 0 : index
    %c1 = arith.constant 1 : index
    %9 = vector.load %arg2[%c0_5, %c1] : memref<32x2xf32, #tpu.memory_space<vmem>>, vector<32x1xf32>
    %10 = vector.extract_strided_slice %0 {offsets = [1, 0], sizes = [1, 2560], strides = [1, 1]} : vector<2x2560xf32> to vector<1x2560xf32>
    %11 = vector.broadcast %9 : vector<32x1xf32> to vector<32x2560xf32>
    %12 = vector.broadcast %10 : vector<1x2560xf32> to vector<32x2560xf32>
    %13 = arith.mulf %11, %12 : vector<32x2560xf32>
    %14 = arith.addf %8, %13 : vector<32x2560xf32>
    %15 = math.tanh %14 : vector<32x2560xf32>
    %c0_6 = arith.constant 0 : index
    %c0_7 = arith.constant 0 : index
    %c0_8 = arith.constant 0 : index
    %16 = vector.load %arg4[%c0_6, %c0_7, %c0_8] : memref<3x32x32xf32, #tpu.memory_space<vmem>>, vector<1x32x32xf32>
    %17 = vector.shape_cast %16 : vector<1x32x32xf32> to vector<32x32xf32>
    %cst = arith.constant dense<0.000000e+00> : vector<32x2560xf32>
    %18 = tpu.matmul %17, %15, %cst {dimension_numbers = #tpu.dot_dimension_numbers<[1], [0], [0], [1], [0, 0, 1, 1], [], []>} : vector<32x32xf32>, vector<32x2560xf32>, vector<32x2560xf32> -> vector<32x2560xf32>
    %c0_9 = arith.constant 0 : index
    %c0_10 = arith.constant 0 : index
    %c0_11 = arith.constant 0 : index
    %19 = vector.load %arg5[%c0_9, %c0_10, %c0_11] : memref<3x32x1xf32, #tpu.memory_space<vmem>>, vector<1x32x1xf32>
    %20 = vector.shape_cast %19 : vector<1x32x1xf32> to vector<32x1xf32>
    %21 = vector.broadcast %20 : vector<32x1xf32> to vector<32x2560xf32>
    %22 = arith.addf %18, %21 : vector<32x2560xf32>
    %23 = math.tanh %22 : vector<32x2560xf32>
    %c1_12 = arith.constant 1 : index
    %c0_13 = arith.constant 0 : index
    %c0_14 = arith.constant 0 : index
    %24 = vector.load %arg4[%c1_12, %c0_13, %c0_14] : memref<3x32x32xf32, #tpu.memory_space<vmem>>, vector<1x32x32xf32>
    %25 = vector.shape_cast %24 : vector<1x32x32xf32> to vector<32x32xf32>
    %cst_15 = arith.constant dense<0.000000e+00> : vector<32x2560xf32>
    %26 = tpu.matmul %25, %23, %cst_15 {dimension_numbers = #tpu.dot_dimension_numbers<[1], [0], [0], [1], [0, 0, 1, 1], [], []>} : vector<32x32xf32>, vector<32x2560xf32>, vector<32x2560xf32> -> vector<32x2560xf32>
    %c1_16 = arith.constant 1 : index
    %c0_17 = arith.constant 0 : index
    %c0_18 = arith.constant 0 : index
    %27 = vector.load %arg5[%c1_16, %c0_17, %c0_18] : memref<3x32x1xf32, #tpu.memory_space<vmem>>, vector<1x32x1xf32>
    %28 = vector.shape_cast %27 : vector<1x32x1xf32> to vector<32x1xf32>
    %29 = vector.broadcast %28 : vector<32x1xf32> to vector<32x2560xf32>
    %30 = arith.addf %26, %29 : vector<32x2560xf32>
    %31 = math.tanh %30 : vector<32x2560xf32>
    %c2 = arith.constant 2 : index
    %c0_19 = arith.constant 0 : index
    %c0_20 = arith.constant 0 : index
    %32 = vector.load %arg4[%c2, %c0_19, %c0_20] : memref<3x32x32xf32, #tpu.memory_space<vmem>>, vector<1x32x32xf32>
    %33 = vector.shape_cast %32 : vector<1x32x32xf32> to vector<32x32xf32>
    %cst_21 = arith.constant dense<0.000000e+00> : vector<32x2560xf32>
    %34 = tpu.matmul %33, %31, %cst_21 {dimension_numbers = #tpu.dot_dimension_numbers<[1], [0], [0], [1], [0, 0, 1, 1], [], []>} : vector<32x32xf32>, vector<32x2560xf32>, vector<32x2560xf32> -> vector<32x2560xf32>
    %c2_22 = arith.constant 2 : index
    %c0_23 = arith.constant 0 : index
    %c0_24 = arith.constant 0 : index
    %35 = vector.load %arg5[%c2_22, %c0_23, %c0_24] : memref<3x32x1xf32, #tpu.memory_space<vmem>>, vector<1x32x1xf32>
    %36 = vector.shape_cast %35 : vector<1x32x1xf32> to vector<32x1xf32>
    %37 = vector.broadcast %36 : vector<32x1xf32> to vector<32x2560xf32>
    %38 = arith.addf %34, %37 : vector<32x2560xf32>
    %39 = math.tanh %38 : vector<32x2560xf32>
    %c0_25 = arith.constant 0 : index
    %c0_26 = arith.constant 0 : index
    %40 = vector.load %arg6[%c0_25, %c0_26] : memref<32x1xf32, #tpu.memory_space<vmem>>, vector<32x1xf32>
    %41 = vector.broadcast %40 : vector<32x1xf32> to vector<32x2560xf32>
    %42 = arith.mulf %41, %39 : vector<32x2560xf32>
    %cst_27 = arith.constant dense<0.000000e+00> : vector<2560xf32>
    %43 = vector.multi_reduction <add>, %42, %cst_27 [0] : vector<32x2560xf32> to vector<2560xf32>
    %44 = vector.shape_cast %43 : vector<2560xf32> to vector<1x2560xf32>
    %c0_28 = arith.constant 0 : index
    %c0_29 = arith.constant 0 : index
    %45 = vector.load %arg7[%c0_28, %c0_29] : memref<1x1xf32, #tpu.memory_space<vmem>>, vector<1x1xf32>
    %46 = vector.broadcast %45 : vector<1x1xf32> to vector<1x2560xf32>
    %47 = arith.addf %44, %46 : vector<1x2560xf32>
    %c0_30 = arith.constant 0 : index
    %c0_31 = arith.constant 0 : index
    %48 = vector.load %arg8[%c0_30, %c0_31] : memref<1x2560xf32, #tpu.memory_space<vmem>>, vector<1x2560xf32>
    tpu.vector_store %arg8[%c0_30, %c0_31], %47 {strides = array<i32>} : memref<1x2560xf32, #tpu.memory_space<vmem>>, vector<1x2560xf32>,
    return
  }
  func.func @transform_0(%arg0: i32) -> (i32, i32) {
    %c0_i32 = arith.constant 0 : i32
    %c0_i32_0 = arith.constant 0 : i32
    return %c0_i32, %arg0 : i32, i32
  }
  func.func @transform_1(%arg0: i32) -> (i32, i32) {
    %c0_i32 = arith.constant 0 : i32
    %c0_i32_0 = arith.constant 0 : i32
    %c0_i32_1 = arith.constant 0 : i32
    return %c0_i32, %c0_i32_0 : i32, i32
  }
  func.func @transform_2(%arg0: i32) -> (i32, i32) {
    %c0_i32 = arith.constant 0 : i32
    %c0_i32_0 = arith.constant 0 : i32
    %c0_i32_1 = arith.constant 0 : i32
    return %c0_i32, %c0_i32_0 : i32, i32
  }
  func.func @transform_3(%arg0: i32) -> (i32, i32, i32) {
    %c0_i32 = arith.constant 0 : i32
    %c0_i32_0 = arith.constant 0 : i32
    %c0_i32_1 = arith.constant 0 : i32
    %c0_i32_2 = arith.constant 0 : i32
    return %c0_i32, %c0_i32_0, %c0_i32_1 : i32, i32, i32
  }
  func.func @transform_4(%arg0: i32) -> (i32, i32, i32) {
    %c0_i32 = arith.constant 0 : i32
    %c0_i32_0 = arith.constant 0 : i32
    %c0_i32_1 = arith.constant 0 : i32
    %c0_i32_2 = arith.constant 0 : i32
    return %c0_i32, %c0_i32_0, %c0_i32_1 : i32, i32, i32
  }
  func.func @transform_5(%arg0: i32) -> (i32, i32) {
    %c0_i32 = arith.constant 0 : i32
    %c0_i32_0 = arith.constant 0 : i32
    %c0_i32_1 = arith.constant 0 : i32
    return %c0_i32, %c0_i32_0 : i32, i32
  }
  func.func @transform_6(%arg0: i32) -> (i32, i32) {
    %c0_i32 = arith.constant 0 : i32
    %c0_i32_0 = arith.constant 0 : i32
    %c0_i32_1 = arith.constant 0 : i32
    return %c0_i32, %c0_i32_0 : i32, i32
  }
  func.func @transform_7(%arg0: i32) -> (i32, i32) {
    %c0_i32 = arith.constant 0 : i32
    %c0_i32_0 = arith.constant 0 : i32
    return %c0_i32, %arg0 : i32, i32
  }
}

</mosaic_0001>

<bundles_post_ra>
// kernel: tpu_custom_call.1
= control target key start
LH: loop header
LB: loop body
LE: loop exit
PB: predicated region body
PF: predicated region fallthrough
CT: control target
= control target key end

     0   :  { %s7580_s0 = inlined_call_operand.vmem [shape: f32[2,10240], index: 0, kind: input, shape index: {}]   ;;  %s7581_s1 = inlined_call_operand.vmem [shape: f32[32,2], index: 1, kind: input, shape index: {}]   ;;  %s7582_s2 = inlined_call_operand.vmem [shape: f32[32,1], index: 2, kind: input, shape index: {}]   ;;  %s7583_s3 = inlined_call_operand.hbm [shape: f32[3,32,32], index: 3, kind: input, shape index: {}]   ;;  %s7584_s4 = inlined_call_operand.vmem [shape: f32[3,32,1], index: 4, kind: input, shape index: {}]   ;;  %s7585_s5 = inlined_call_operand.vmem [shape: f32[32,1], index: 5, kind: input, shape index: {}]   ;;  %s7586_s6 = inlined_call_operand.<no memory space> [shape: f32[1,1], index: 6, kind: input, shape index: {}]   ;;  %s7587_s7 = inlined_call_operand.hbm [shape: f32[1,10240], index: 7, kind: output, shape index: {}]  }
   0x1   :  { %v12_v0 = vstv %s7586_s6 }
   0x2   :  { %13 = vst [vmem:[#allocation2] sm:$0x1] %v12_v0 }
   0x3   :  { %14 = vsyncpa [#allocation4], 0 }
   0x4   :  { %15 = vsyncpa [#allocation5], 0 }
   0x5   :  { %17 = vsyncpa [#allocation5 + $0x1], 0  ;;  %s5703_s26 = smov 0   ;;  %s5705_s27 = smov 0  }
   0x6   :  { %s5707_s28 = smov 0   ;;  %s5709_s29 = smov 0  }
   0x7 LB: > { %s5724_s6 = sadd.s32 4294967295, %s5650_s29   ;;  %s4718_s30 = sadd.s32 4294967294, %s5650_s29   ;;  %s5650_s29 = sphi %s5709_s29, %s7654_s29   ;;  %s5646_s28 = sphi %s5707_s28, %s7653_s28   ;;  %s5642_s27 = sphi %s5705_s27, %s7652_s27   ;;  %s5638_s26 = sphi %s5703_s26, %s7651_s26  }
   0x8   : > { %s5728_s8 = sadd.s32 1, %s5650_s29   ;;  %s182_s9 = sadd.s32 1, %s5646_s28 }
   0x9   : > { %s179_s10 = ssub.s32 %s5650_s29, %s5728_s8  ;;  %p192_p0 = scmp.ne.s32.totalorder %s5646_s28, %s5642_s27 }
   0xa   : > { %p180_p1 = scmp.eq.s32.totalorder %s179_s10, 0  ;;  %p193_p2 = scmp.eq.s32.totalorder %s5724_s6, 3 }
   0xb   : > { %p198_p3 = scmp.ne.s32.totalorder %s5642_s27, %s5638_s26  ;;  %p199_p4 = scmp.eq.s32.totalorder %s4718_s30, 3 }
   0xc   : > { %s5739_s11 = scalar_select %p180_p1, %s5646_s28, %s182_s9  }
   0xd   : > { %p5741_p5 = por %p193_p2, %p192_p0  ;;  %p5745_p6 = por %p199_p4, %p198_p3 }
   0xe   : > { %p4719_p7 = scmp.ge.s32.totalorder %s5650_s29, 1  ;;  %p206_p8 = scmp.lt.s32.totalorder %s5650_s29, 5 }
   0xf   : > { %s7610_s13 = scalar_select %p5745_p6, 1, 0 }
  0x10   : > { %p4872_p9 = scmp.eq.s32.totalorder %s5724_s6, 0  ;;  %p5752_p10 = pnand %p4719_p7, %p206_p8 }
  0x11   : > { %s5652_s15 = smov [#allocation3]  }
  0x12   : > { %s224_s16 = sshll.u32 %s5652_s15, 4  ;;  %p4864_p11 = pneg %p5752_p10  ;;  %s225_s16 = int_to_ptr.vmem [resolvable:$true] %s224_s16 }
  0x13   : > { %s5571_s17 = scalar_lea.vmem %s225_s16, 1536  ;;  %p5579_p3 = scmp.lt.s32.totalorder %s225_s16, %s225_s16 }
  0x14   : > { %p4865_p12 = pnand %p4872_p9, %p4864_p11  ;;  %p5572_p0 = scmp.ne.s32.totalorder %s225_s16, %s5571_s17 }
  0x15   : > { %p5580_p4 = scmp.lt.s32.totalorder %s5571_s17, %s5571_s17 }
  0x16   : > { %p5562_p13 = pneg %p4865_p12 }
  0x17   : > { %p5581_p6 = por %p5580_p4, %p5579_p3 }
  0x18   : > { %p5574_p1 = pnand %p5572_p0, %p5562_p13 }
  0x1a   : > { %p5575_p2 = pneg %p5574_p1 }
  0x1c   : > { %p5582_p7 = pnand %p5581_p6, %p5575_p2 }
  0x1e   : > { %5585 = shalt.err (!%p5582_p7)
}
  0x1f   : > { %s5653_s18 = smov 128   ;;  %s5654_s19 = smov 8  }
  0x20   : > { %4867 = dma.hbm_to_vmem [thread:$0]  (!%p4865_p12), %s7583_s3, 1536, %s225_s16, [#allocation4], %s5653_s18, %s5653_s18, %s5654_s19  }
  0x21   : > { %258 = sbr.rel (%p5752_p10) target bundleno = 1029 (0x405), region = 48 }
  0x26   : > { %5629 = dma.done.wait (%p4872_p9), [#allocation4], 1536  }
  0x27   : > { %5631 = vsyncadd (%p4872_p9), [#allocation4], 4294965760  ;;  %s290_s22 = smul.u32 20, %s5724_s6  ;;  %v5655_v1 = vmov 0   ;;  %v7588_v2 = vlaneseq  ;;  %v309_v3 = vld [vmem:[%s7581_s1 + $0x18] sm:$0xff]  ;;  %v308_v6 = vld [vmem:[%s7581_s1 + $0x10] sm:$0xff] }
  0x28   : > { %4915 = vset.pattern.permute.xlu1 %v5655_v1  ;;  %4914 = vset.pattern.permute.xlu0 %v5655_v1  ;;  %v305_v4 = vld [vmem:[%s7582_s2 + $0x18] sm:$0xff]  ;;  %v5656_v8 = vmov 1   ;;  %v307_v9 = vld [vmem:[%s7581_s1 + $0x8] sm:$0xff]  ;;  %v304_v11 = vld [vmem:[%s7582_s2 + $0x10] sm:$0xff]  ;;  %v7589_v30 = vmov 0.0   ;;  %vm1159_vm0 = vcmask 261120  }
  0x29   : > { %p291_p6 = scmp.lt.s32.totalorder %s290_s22, 79  ;;  %v5777_v5 = vshrl.u32 %v7588_v2, 7  ;;  %327 = vperm.xlu0 %4914, %v309_v3   ;;  %612 = vperm.xlu1 %4915, %v305_v4   ;;  %v306_v16 = vld [vmem:[%s7581_s1] sm:$0xff]  ;;  %v303_v21 = vld [vmem:[%s7582_s2 + $0x8] sm:$0xff]  ;;  %v1138_v26 = vld [vmem:[%s7584_s4 + $0x18] sm:$0xff]  ;;  %s287_s16 = sand.u32 1, %s5642_s27  }
  0x2a   : > { %v302_v24 = vld [vmem:[%s7582_s2] sm:$0xff]  ;;  %v1136_v27 = vld [vmem:[%s7584_s4 + $0x8] sm:$0xff]  ;;  %v4767_v29 = vld [vmem:[%s7584_s4 + $0x30] sm:$0xff]  ;;  %1236 = vmatprep.mubr.f32.mxu0 %v7589_v30  ;;  %1325 = vmatprep.mubr.f32.mxu1 %v7589_v30  ;;  %s4856_s19 = smul.u32 320, %s5724_s6  ;;  %s4633_s24 = scalar_lea.sflag [#allocation5], %s287_s16 }
  0x2b   : > { %s7656_s22 = smov (!%p291_p6, %s290_s22), 79  ;;  %7612 = vst [vmem:[#allocation9_spill] sm:$0xff] %v5777_v5  ;;  %v5788_v7 = vsub.s32 2, %v5777_v5  ;;  %v5802_v13 = vsub.s32 3, %v5777_v5  ;;  %v5805_v14 = vsub.s32 6, %v5777_v5  ;;  %v5808_v15 = vsub.s32 7, %v5777_v5 }
  0x2c   : > { %s4724_s9 = sshll.u32 %s7656_s22, 1  ;;  %v5816_v18 = vsub.s32 4, %v5777_v5  ;;  %v5826_v22 = vsub.s32 5, %v5777_v5  ;;  %v1135_v28 = vld [vmem:[%s7584_s4] sm:$0xff]  ;;  %v4810_v32 = vld [vmem:[%s7584_s4 + $0x48] sm:$0xff]  ;;  %v4812_v33 = vld [vmem:[%s7584_s4 + $0x58] sm:$0xff]  ;;  %s4645_s23 = scalar_lea.hbm %s7587_s7, %s4856_s19 }
  0x2d   : > { %s5785_s17 = scalar_lea.vmem %s7580_s0, %s4724_s9  ;;  %322 = vperm.xlu0 %4914, %v308_v6   ;;  %4916 = vset.pattern.permute.xlu1 %v5656_v8  ;;  %v4765_v31 = vld [vmem:[%s7584_s4 + $0x20] sm:$0xff]  ;;  %v4167_v34 = vld [vmem:[%s7585_s5 + $0x8] sm:$0xff]  ;;  %v4169_v35 = vld [vmem:[%s7585_s5 + $0x18] sm:$0xff]  ;;  %v5865_v36 = vsub.s32 0, %v5777_v5  ;;  %v5878_v41 = vsub.s32 1, %v5777_v5  ;;  %s5659_s6 = smov [#allocation6]  }
  0x2e   : > { %708 = vperm.xlu1 %4916, %v309_v3   ;;  %v5794_v10 = vld [vmem:[%s5785_s17 + $0x20] sm:$0xff]  ;;  %v5869_v38 = vld [vmem:[%s5785_s17 + $0x8] sm:$0xff]  ;;  %v5872_v39 = vld [vmem:[%s5785_s17 + $0x10] sm:$0xff]  ;;  %s5590_s30 = sshll.u32 %s5659_s6, 4  ;;  %s5591_s30 = int_to_ptr.vmem [resolvable:$false] %s5590_s30 }
  0x2f   : > { %v406_v12 = vrot.slane %v5794_v10, %v5788_v7  ;;  %v782_v17 = vrot.slane %v5794_v10, %v5802_v13  ;;  %v414_v19 = vrot.slane %v5794_v10, %v5805_v14  ;;  %v790_v20 = vrot.slane %v5794_v10, %v5808_v15  ;;  %7613 = vst [vmem:[#allocation10_spill] sm:$0xff] %v5865_v36  ;;  %v297_v37 = vld [vmem:[%s5785_s17] sm:$0xff]  ;;  %v5875_v40 = vld [vmem:[%s5785_s17 + $0x18] sm:$0xff]  ;;  %s7504_s17 = smul.u32 20, %s287_s16  ;;  %s5592_s9 = scalar_lea.vmem %s5591_s30, 640 }
  0x30   : > { %v410_v23 = vrot.slane %v5794_v10, %v5816_v18  ;;  %v786_v25 = vrot.slane %v5794_v10, %v5826_v22  ;;  %v342_v42 = vrot.slane %v297_v37, %v5788_v7  ;;  %v354_v43 = vrot.slane %v5869_v38, %v5865_v36 }
  0x31   : > { %317 = vperm.xlu0 %4914, %v307_v9   ;;  %v370_v44 = vrot.slane %v5872_v39, %v5865_v36  ;;  %v386_v45 = vrot.slane %v5875_v40, %v5865_v36  ;;  %v402_v46 = vrot.slane %v5794_v10, %v5865_v36  ;;  %v718_v47 = vrot.slane %v297_v37, %v5802_v13  ;;  %s7526_s18 = scalar_lea.vmem [#allocation6], %s7504_s17 }
  0x32   : > { %4917 = vset.pattern.permute.xlu1 %v5655_v1  ;;  %v730_v48 = vrot.slane %v5869_v38, %v5878_v41  ;;  %v746_v49 = vrot.slane %v5872_v39, %v5878_v41  ;;  %v350_v50 = vrot.slane %v297_v37, %v5805_v14  ;;  %v726_v51 = vrot.slane %v297_v37, %v5808_v15  ;;  %s4647_s20 = sshll.u32 %s7526_s18, 4  ;;  %s4648_s20 = int_to_ptr.vmem [resolvable:$true] %s4647_s20 }
  0x33   : > { %607 = vperm.xlu1 %4917, %v304_v11   ;;  %v358_v52 = vrot.slane %v5869_v38, %v5788_v7  ;;  %v374_v53 = vrot.slane %v5872_v39, %v5788_v7  ;;  %v762_v54 = vrot.slane %v5875_v40, %v5878_v41  ;;  %v778_v55 = vrot.slane %v5794_v10, %v5878_v41  ;;  %s5586_s25 = scalar_lea.vmem %s4648_s20, 320  ;;  %p5593_p11 = scmp.lt.s32.totalorder %s4648_s20, %s5591_s30 }
  0x34   : > { %v390_v56 = vrot.slane %v5875_v40, %v5788_v7  ;;  %v5907_v57 = vrot.slane %v342_v42, %v5865_v36  ;;  %v5910_v58 = vrot.slane %v354_v43, %v5865_v36  ;;  %v5913_v59 = vrot.slane %v370_v44, %v5865_v36  ;;  %p5587_p8 = scmp.ne.s32.totalorder %s4648_s20, %s5586_s25  ;;  %p5594_p12 = scmp.lt.s32.totalorder %s5592_s9, %s5586_s25 }
  0x35   : > { %4918 = vset.pattern.permute.xlu0 %v5656_v8  ;;  %v5916_v60 = vrot.slane %v386_v45, %v5865_v36  ;;  %v5919_v61 = vrot.slane %v402_v46, %v5865_v36  ;;  %v734_v62 = vrot.slane %v5869_v38, %v5802_v13  ;;  %v750_v63 = vrot.slane %v5872_v39, %v5802_v13  ;;  %v4768_v46 = vld [vmem:[%s7584_s4 + $0x38] sm:$0xff] }
  0x36   : > { %704 = vperm.xlu0 %4918, %v308_v6   ;;  %v766_v0 = vrot.slane %v5875_v40, %v5802_v13  ;;  %v5931_v3 = vrot.slane %v730_v48, %v5878_v41  ;;  %v5934_v4 = vrot.slane %v746_v49, %v5878_v41  ;;  %v5937_v6 = vrot.slane %v762_v54, %v5878_v41  ;;  %p5588_p9 = pnand %p5587_p8, %p5741_p5  ;;  %p5595_p13 = por %p5594_p12, %p5593_p11 }
  0x37   : > { %312 = vperm.xlu1 %4917, %v306_v16   ;;  %7614 = vst [vmem:[#allocation11_spill] sm:$0xff] %v5916_v60  ;;  %7615 = vst [vmem:[#allocation12_spill] sm:$0xff] %v5919_v61  ;;  %v5940_v8 = vrot.slane %v778_v55, %v5878_v41  ;;  %v382_v11 = vrot.slane %v5872_v39, %v5805_v14  ;;  %v738_v42 = vrot.slane %v5869_v38, %v5826_v22 }
  0x38   : > { %7616 = vst [vmem:[#allocation13_spill] sm:$0xff] %v5937_v6  ;;  %v5973_v43 = vrot.slane %v726_v51, %v5878_v41  ;;  %v754_v44 = vrot.slane %v5872_v39, %v5826_v22  ;;  %v770_v45 = vrot.slane %v5875_v40, %v5826_v22  ;;  %v6013_v55 = vrot.slane %v358_v52, %v5865_v36  ;;  %p5589_p10 = pneg %p5588_p9 }
  0x39   : > { %7617 = vst [vmem:[#allocation14_spill] sm:$0xff] %v5940_v8  ;;  %v6010_v54 = vrot.slane %v738_v42, %v5878_v41 }
  0x3a   : > { %700 = vperm.xlu0 %4918, %v307_v9   ;;  %v366_v9 = vrot.slane %v5869_v38, %v5805_v14  ;;  %p5596_p0 = pnand %p5595_p13, %p5589_p10 }
  0x3b   : > { %602 = vperm.xlu1 %4917, %v303_v21   ;;  %v714_v21 = vrot.slane %v297_v37, %v5878_v41 }
  0x3e   : > { %696 = vperm.xlu0 %4918, %v306_v16   ;;  %v338_v16 = vrot.slane %v297_v37, %v5865_v36 }
  0x3f   : > { %597 = vperm.xlu1 %4917, %v302_v24   ;;  %v346_v24 = vrot.slane %v297_v37, %v5816_v18 }
  0x41   : > { %v5989_v48 = vrot.slane %v346_v24, %v5865_v36  ;;  %v6031_v24 = vrot.slane %v786_v25, %v5878_v41  ;;  %v6052_v25 = vrot.slane %v390_v56, %v5865_v36  ;;  %v6077_v56 = vrot.slane %v782_v17, %v5878_v41  ;;  %v4809_v17 = vld [vmem:[%s7584_s4 + $0x40] sm:$0xff] }
  0x42   : > { %4919 = vset.pattern.permute.xlu0 %v5655_v1  ;;  %v5928_v1 = vrot.slane %v718_v47, %v5878_v41  ;;  %v5983_v47 = vrot.slane %v338_v16, %v5865_v36  ;;  %v6016_v16 = vrot.slane %v734_v62, %v5878_v41  ;;  %v4766_v62 = vld [vmem:[%s7584_s4 + $0x28] sm:$0xff] }
  0x43   : > { %1156 = vperm.xlu1 %4917, %v1138_v26   ;;  %v362_v26 = vrot.slane %v5869_v38, %v5816_v18  ;;  %7621 = vst [vmem:[#allocation18_spill] sm:$0xff] %v6031_v24  ;;  %7622 = vst [vmem:[#allocation19_spill] sm:$0xff] %v6052_v25  ;;  %v4450_v25 = vld [vmem:[#allocation2] sm:$0x1] }
  0x44   : > { %7627 = vst [vmem:[#allocation24_spill] sm:$0xff] %v6077_v56 }
  0x45   : > { %v5992_v49 = vrot.slane %v362_v26, %v5865_v36  ;;  %v6043_v26 = vrot.slane %v750_v63, %v5878_v41 }
  0x47   : > { %1146 = vperm.xlu1 %4917, %v1136_v27   ;;  %v398_v27 = vrot.slane %v5875_v40, %v5805_v14 }
  0x4b   : > { %1141 = vperm.xlu1 %4917, %v1135_v28   ;;  %v378_v28 = vrot.slane %v5872_v39, %v5816_v18 }
  0x4f   : > { %2164 = vperm.xlu1 %4917, %v4767_v29   ;;  %v394_v29 = vrot.slane %v5875_v40, %v5816_v18  ;;  %v6022_v18 = vrot.slane %v754_v44, %v5878_v41 }
  0x53   : > { %2154 = vperm.xlu1 %4917, %v4765_v31   ;;  %v722_v31 = vrot.slane %v297_v37, %v5826_v22  ;;  %v774_v37 = vrot.slane %v5875_v40, %v5808_v15  ;;  %v5998_v40 = vrot.slane %v394_v29, %v5865_v36  ;;  %v6055_v29 = vrot.slane %v766_v0, %v5878_v41 }
  0x54   : > { %v6083_v0 = vrot.slane %v414_v19, %v5865_v36 }
  0x55   : > { %7618 = vst [vmem:[#allocation15_spill] sm:$0xff] %v5998_v40  ;;  %v6007_v51 = vrot.slane %v722_v31, %v5878_v41  ;;  %7623 = vst [vmem:[#allocation20_spill] sm:$0xff] %v6055_v29  ;;  %v6058_v31 = vrot.slane %v398_v27, %v5865_v36  ;;  %v6089_v27 = vrot.slane %v790_v20, %v5878_v41 }
  0x56   : > { %7628 = vst [vmem:[#allocation25_spill] sm:$0xff] %v6083_v0 }
  0x57   : > { %3171 = vperm.xlu1 %4917, %v4810_v32   ;;  %v1137_v32 = vld [vmem:[%s7584_s4 + $0x10] sm:$0xff]  ;;  %7624 = vst [vmem:[#allocation21_spill] sm:$0xff] %v6058_v31  ;;  %7629 = vst [vmem:[#allocation26_spill] sm:$0xff] %v6089_v27 }
  0x58   : > { %1151 = vperm.xlu0 %4919, %v1137_v32  }
  0x5b   : > { %3181 = vperm.xlu1 %4917, %v4812_v33   ;;  %v5962_v33 = vrot.slane %v350_v50, %v5865_v36  ;;  %v6004_v50 = vrot.slane %v410_v23, %v5865_v36  ;;  %v6025_v23 = vrot.slane %v770_v45, %v5878_v41 }
  0x5c   : > { %2169 = vperm.xlu0 %4919, %v4768_v46  }
  0x5d   : > { %7619 = vst [vmem:[#allocation16_spill] sm:$0xff] %v6004_v50  ;;  %7620 = vst [vmem:[#allocation17_spill] sm:$0xff] %v6025_v23 }
  0x5f   : > { %4177 = vperm.xlu1 %4917, %v4167_v34   ;;  %v742_v34 = vrot.slane %v5869_v38, %v5808_v15  ;;  %v5986_v38 = vrot.slane %v714_v21, %v5878_v41  ;;  %v6019_v21 = vrot.slane %v366_v9, %v5865_v36  ;;  %v6040_v9 = vrot.slane %v374_v53, %v5865_v36 }
  0x60   : > { %v6061_v53 = vrot.slane %v774_v37, %v5878_v41  ;;  %2159 = vperm.xlu0 %4919, %v4766_v62  }
  0x61   : > { %v6034_v52 = vrot.slane %v742_v34, %v5878_v41 }
  0x62   : > { %7625 = vst [vmem:[#allocation22_spill] sm:$0xff] %v6061_v53 }
  0x63   : > { %4187 = vperm.xlu1 %4917, %v4169_v35   ;;  %v758_v35 = vrot.slane %v5872_v39, %v5808_v15  ;;  %v5995_v39 = vrot.slane %v378_v28, %v5865_v36  ;;  %v6046_v28 = vrot.slane %v382_v11, %v5865_v36  ;;  %v6071_v11 = vrot.slane %v406_v12, %v5865_v36 }
  0x64   : > { %3166 = vperm.xlu0 %4919, %v4809_v17  }
  0x65   : > { %v6049_v22 = vrot.slane %v758_v35, %v5878_v41  ;;  %7626 = vst [vmem:[#allocation23_spill] sm:$0xff] %v6071_v11 }
  0xa4   : > { %v6063_v63 = vpop.permute.xlu0 %327  ;;  %v6065_v32 = vpop.permute.xlu1 %612 }
  0xa5   : > { %v576_v7 = vmul.f32 %v5907_v57, %v6063_v63  ;;  %v578_v12 = vmul.f32 %v5962_v33, %v6063_v63  ;;  %v575_v13 = vmul.f32 %v5983_v47, %v6063_v63  ;;  %v577_v14 = vmul.f32 %v5989_v48, %v6063_v63 }
  0xa6   : > { %v580_v10 = vmul.f32 %v6013_v55, %v6063_v63  ;;  %v582_v15 = vmul.f32 %v6019_v21, %v6063_v63  ;;  %v579_v19 = vmul.f32 %v5910_v58, %v6063_v63  ;;  %v581_v20 = vmul.f32 %v5992_v49, %v6063_v63 }
  0xa7   : > { %v676_v41 = vadd.f32 %v6065_v32, %v576_v7  ;;  %v678_v34 = vadd.f32 %v6065_v32, %v578_v12  ;;  %v675_v35 = vadd.f32 %v6065_v32, %v575_v13  ;;  %v677_v42 = vadd.f32 %v6065_v32, %v577_v14 }
  0xa8   : > { %v6114_v37 = vpop.permute.xlu0 %322  ;;  %v680_v44 = vadd.f32 %v6065_v32, %v580_v10  ;;  %v682_v45 = vadd.f32 %v6065_v32, %v582_v15  ;;  %v679_v46 = vadd.f32 %v6065_v32, %v579_v19  ;;  %v681_v62 = vadd.f32 %v6065_v32, %v581_v20  ;;  %v4811_v10 = vld [vmem:[%s7584_s4 + $0x50] sm:$0xff] }
  0xa9   : > { %v6120_v2 = vpop.permute.xlu1 %708  ;;  %v556_v7 = vmul.f32 %v5907_v57, %v6114_v37  ;;  %v558_v12 = vmul.f32 %v5962_v33, %v6114_v37  ;;  %v555_v13 = vmul.f32 %v5983_v47, %v6114_v37  ;;  %v557_v14 = vmul.f32 %v5989_v48, %v6114_v37  ;;  %3176 = vperm.xlu0 %4919, %v4811_v10  }
  0xaa   : > { %v952_v17 = vmul.f32 %v5928_v1, %v6120_v2  ;;  %v954_v15 = vmul.f32 %v5973_v43, %v6120_v2  ;;  %v951_v19 = vmul.f32 %v5986_v38, %v6120_v2  ;;  %v953_v20 = vmul.f32 %v6007_v51, %v6120_v2 }
  0xab   : > { %v956_v30 = vmul.f32 %v6016_v16, %v6120_v2  ;;  %v958_v5 = vmul.f32 %v6034_v52, %v6120_v2  ;;  %v955_v36 = vmul.f32 %v5931_v3, %v6120_v2  ;;  %v957_v24 = vmul.f32 %v6010_v54, %v6120_v2 }
  0xac   : > { %v6149_v50 = vpop.permute.xlu0 %317  ;;  %v1032_v8 = vadd.f32 %v952_v17, %v676_v41  ;;  %v1034_v61 = vadd.f32 %v954_v15, %v678_v34  ;;  %v1031_v27 = vadd.f32 %v951_v19, %v675_v35  ;;  %v1033_v0 = vadd.f32 %v953_v20, %v677_v42  ;;  %v4166_v41 = vld [vmem:[%s7585_s5] sm:$0xff] }
  0xad   : > { %v536_v56 = vmul.f32 %v5907_v57, %v6149_v50  ;;  %v538_v11 = vmul.f32 %v5962_v33, %v6149_v50  ;;  %v535_v23 = vmul.f32 %v5983_v47, %v6149_v50  ;;  %v537_v40 = vmul.f32 %v5989_v48, %v6149_v50  ;;  %4172 = vperm.xlu0 %4919, %v4166_v41  }
  0xae   : > { %v6162_v34 = vpop.permute.xlu1 %607  ;;  %4920 = vtanh.f32 %v1032_v8  ;;  %v1036_v35 = vadd.f32 %v956_v30, %v680_v44  ;;  %v6164_v42 = vadd.f32 %v958_v5, %v682_v45  ;;  %v6166_v10 = vadd.f32 %v955_v36, %v679_v46 }
  0xaf   : > { %v656_v17 = vadd.f32 %v6162_v34, %v556_v7  ;;  %v658_v15 = vadd.f32 %v6162_v34, %v558_v12  ;;  %4922 = vtanh.f32 %v1034_v61  ;;  %v655_v19 = vadd.f32 %v6162_v34, %v555_v13 }
  0xb0   : > { %4924 = vtanh.f32 %v1031_v27  ;;  %v657_v20 = vadd.f32 %v6162_v34, %v557_v14  ;;  %v6172_v6 = vadd.f32 %v957_v24, %v681_v62  ;;  %v560_v8 = vmul.f32 %v6013_v55, %v6114_v37  ;;  %v4168_v24 = vld [vmem:[%s7585_s5 + $0x10] sm:$0xff] }
  0xb1   : > { %v6176_v5 = vpop.permute.xlu0 %704  ;;  %4926 = vtanh.f32 %v1033_v0  ;;  %v562_v30 = vmul.f32 %v6019_v21, %v6114_v37  ;;  %v6182_v36 = vmul.f32 %v5910_v58, %v6114_v37  ;;  %v6186_v61 = vmul.f32 %v5992_v49, %v6114_v37  ;;  %4182 = vperm.xlu0 %4919, %v4168_v24  }
  0xb2   : > { %v6191_v27 = vpop.permute.xlu1 %312  ;;  %v932_v0 = vmul.f32 %v5928_v1, %v6176_v5  ;;  %v934_v44 = vmul.f32 %v5973_v43, %v6176_v5  ;;  %v931_v45 = vmul.f32 %v5986_v38, %v6176_v5  ;;  %v933_v46 = vmul.f32 %v6007_v51, %v6176_v5 }
  0xb3   : > { %v516_v62 = vmul.f32 %v5907_v57, %v6191_v27  ;;  %v518_v7 = vmul.f32 %v5962_v33, %v6191_v27  ;;  %v515_v12 = vmul.f32 %v5983_v47, %v6191_v27  ;;  %v517_v13 = vmul.f32 %v5989_v48, %v6191_v27 }
  0xb4   : > { %v1012_v14 = vadd.f32 %v932_v0, %v656_v17  ;;  %v1014_v41 = vadd.f32 %v934_v44, %v658_v15  ;;  %v1011_v60 = vadd.f32 %v931_v45, %v655_v19  ;;  %v1013_v53 = vadd.f32 %v933_v46, %v657_v20 }
  0xb5   : > { %v6209_v31 = vpop.permute.xlu0 %700  ;;  %4928 = vtanh.f32 %v1036_v35  ;;  %v660_v29 = vadd.f32 %v6162_v34, %v560_v8  ;;  %v936_v57 = vmul.f32 %v6016_v16, %v6176_v5  ;;  %v662_v33 = vadd.f32 %v6162_v34, %v562_v30  ;;  %4453 = vperm.xlu0 %4919, %v4450_v25  }
  0xb6   : > { %v6215_v47 = vpop.permute.xlu1 %602  ;;  %v912_v48 = vmul.f32 %v5928_v1, %v6209_v31  ;;  %4930 = vtanh.f32 %v1012_v14  ;;  %v914_v17 = vmul.f32 %v5973_v43, %v6209_v31  ;;  %v911_v35 = vmul.f32 %v5986_v38, %v6209_v31 }
  0xb7   : > { %v636_v15 = vadd.f32 %v6215_v47, %v536_v56  ;;  %v638_v19 = vadd.f32 %v6215_v47, %v538_v11  ;;  %4932 = vtanh.f32 %v1014_v41  ;;  %v913_v20 = vmul.f32 %v6007_v51, %v6209_v31 }
  0xb8   : > { %4934 = vtanh.f32 %v1011_v60  ;;  %v635_v8 = vadd.f32 %v6215_v47, %v535_v23  ;;  %v637_v30 = vadd.f32 %v6215_v47, %v537_v40  ;;  %v6229_v24 = vadd.f32 %v936_v57, %v660_v29 }
  0xb9   : > { %v6231_v0 = vpop.permute.xlu0 %696  ;;  %v992_v44 = vadd.f32 %v912_v48, %v636_v15  ;;  %v994_v45 = vadd.f32 %v914_v17, %v638_v19  ;;  %4936 = vtanh.f32 %v1013_v53  ;;  %v938_v11 = vmul.f32 %v6034_v52, %v6176_v5 }
  0xba   : > { %v6235_v56 = vpop.permute.xlu1 %597  ;;  %v892_v60 = vmul.f32 %v5928_v1, %v6231_v0  ;;  %v894_v23 = vmul.f32 %v5973_v43, %v6231_v0  ;;  %v891_v40 = vmul.f32 %v5986_v38, %v6231_v0  ;;  %v893_v25 = vmul.f32 %v6007_v51, %v6231_v0 }
  0xbb   : > { %v4921_v29 = vpop.eup %4920  ;;  %v616_v53 = vadd.f32 %v6235_v56, %v516_v62  ;;  %4938 = vtanh.f32 %v992_v44  ;;  %v618_v46 = vadd.f32 %v6235_v56, %v518_v7  ;;  %v991_v14 = vadd.f32 %v911_v35, %v635_v8 }
  0xbc   : > { %v4923_v41 = vpop.eup %4922  ;;  %1196 = vmatprep.subr.mxu0 %v4921_v29  ;;  %4940 = vtanh.f32 %v994_v45  ;;  %v993_v1 = vadd.f32 %v913_v20, %v637_v30  ;;  %v615_v57 = vadd.f32 %v6235_v56, %v515_v12  ;;  %v617_v43 = vadd.f32 %v6235_v56, %v517_v13 }
  0xbd   : > { %v4925_v48 = vpop.eup %4924  ;;  %v972_v38 = vadd.f32 %v892_v60, %v616_v53  ;;  %v974_v17 = vadd.f32 %v894_v23, %v618_v46  ;;  %1285 = vmatprep.subr.mxu1 %v4923_v41  ;;  %4942 = vtanh.f32 %v991_v14  ;;  %v1018_v51 = vadd.f32 %v938_v11, %v662_v33 }
  0xbe   : > { %v4927_v15 = vpop.eup %4926  ;;  %1197 = vmatpush1.msra.mxu0 %v4925_v48  ;;  %4944 = vtanh.f32 %v993_v1  ;;  %v971_v62 = vadd.f32 %v891_v40, %v615_v57  ;;  %v973_v7 = vadd.f32 %v893_v25, %v617_v43  ;;  %v659_v35 = vadd.f32 %v6162_v34, %v6182_v36 }
  0xbf   : > { %4946 = vtanh.f32 %v972_v38  ;;  %1286 = vmatpush1.msra.mxu1 %v4927_v15  ;;  %v935_v12 = vmul.f32 %v5931_v3, %v6176_v5  ;;  %v661_v13 = vadd.f32 %v6162_v34, %v6186_v61  ;;  %v937_v19 = vmul.f32 %v6010_v54, %v6176_v5 }
  0xc0   : > { %4948 = vtanh.f32 %v974_v17  ;;  %v540_v33 = vmul.f32 %v6013_v55, %v6149_v50  ;;  %v916_v20 = vmul.f32 %v6016_v16, %v6209_v31  ;;  %v542_v36 = vmul.f32 %v6019_v21, %v6149_v50 }
  0xc1   : > { %4950 = vtanh.f32 %v971_v62  ;;  %v1015_v8 = vadd.f32 %v935_v12, %v659_v35  ;;  %v1017_v30 = vadd.f32 %v937_v19, %v661_v13  ;;  %v918_v44 = vmul.f32 %v6034_v52, %v6209_v31 }
  0xc2   : > { %v6265_v61 = vpop.eup %4928  ;;  %4952 = vtanh.f32 %v973_v7  ;;  %v640_v45 = vadd.f32 %v6215_v47, %v540_v33  ;;  %v642_v11 = vadd.f32 %v6215_v47, %v542_v36  ;;  %v539_v60 = vmul.f32 %v5910_v58, %v6149_v50 }
  0xc3   : > { %v4931_v23 = vpop.eup %4930  ;;  %4954 = vtanh.f32 %v6164_v42  ;;  %v915_v40 = vmul.f32 %v5931_v3, %v6209_v31  ;;  %v541_v25 = vmul.f32 %v5992_v49, %v6149_v50  ;;  %v917_v29 = vmul.f32 %v6010_v54, %v6209_v31 }
  0xc4   : > { %v4933_v53 = vpop.eup %4932  ;;  %1198 = vmatprep.subr.mxu0 %v4931_v23  ;;  %4956 = vtanh.f32 %v6166_v10  ;;  %v996_v46 = vadd.f32 %v916_v20, %v640_v45  ;;  %v998_v14 = vadd.f32 %v918_v44, %v642_v11  ;;  %v639_v41 = vadd.f32 %v6215_v47, %v539_v60  ;;  %v6312_v45 = vld [vmem:[#allocation3] sm:$0xff] }
  0xc5   : > { %v4935_v1 = vpop.eup %4934  ;;  %1287 = vmatprep.subr.mxu1 %v4933_v53  ;;  %4958 = vtanh.f32 %v6172_v6  ;;  %v641_v42 = vadd.f32 %v6215_v47, %v541_v25  ;;  %v520_v57 = vmul.f32 %v6013_v55, %v6191_v27  ;;  %v896_v43 = vmul.f32 %v6016_v16, %v6231_v0 }
  0xc6   : > { %v4937_v48 = vpop.eup %4936  ;;  %1199 = vmatpush1.msra.mxu0 %v4935_v1  ;;  %4960 = vtanh.f32 %v6229_v24  ;;  %v995_v10 = vadd.f32 %v915_v40, %v639_v41  ;;  %v522_v38 = vmul.f32 %v6019_v21, %v6191_v27  ;;  %v898_v17 = vmul.f32 %v6034_v52, %v6231_v0 }
  0xc7   : > { %1288 = vmatpush1.msra.mxu1 %v4937_v48  ;;  %4962 = vtanh.f32 %v1018_v51  ;;  %v997_v6 = vadd.f32 %v917_v29, %v641_v42  ;;  %v620_v15 = vadd.f32 %v6235_v56, %v520_v57  ;;  %v519_v55 = vmul.f32 %v5910_v58, %v6191_v27 }
  0xc8   : > { %v4939_v16 = vpop.eup %4938  ;;  %4964 = vtanh.f32 %v1015_v8  ;;  %v622_v62 = vadd.f32 %v6235_v56, %v522_v38  ;;  %v895_v24 = vmul.f32 %v5931_v3, %v6231_v0  ;;  %v521_v21 = vmul.f32 %v5992_v49, %v6191_v27 }
  0xc9   : > { %v4941_v7 = vpop.eup %4940  ;;  %1200 = vmatprep.subr.mxu0 %v4939_v16  ;;  %4966 = vtanh.f32 %v1017_v30  ;;  %v976_v52 = vadd.f32 %v896_v43, %v620_v15  ;;  %v619_v51 = vadd.f32 %v6235_v56, %v519_v55  ;;  %v897_v35 = vmul.f32 %v6010_v54, %v6231_v0  ;;  %v6339_v55 = vld [vmem:[#allocation3 + $0x8] sm:$0xff] }
  0xca   : > { %v4943_v58 = vpop.eup %4942  ;;  %1289 = vmatprep.subr.mxu1 %v4941_v7  ;;  %4968 = vtanh.f32 %v996_v46  ;;  %v978_v12 = vadd.f32 %v898_v17, %v622_v62  ;;  %v621_v13 = vadd.f32 %v6235_v56, %v521_v21  ;;  %v584_v3 = vmul.f32 %v6040_v9, %v6063_v63 }
  0xcb   : > { %v4945_v19 = vpop.eup %4944  ;;  %1201 = vmatpush1.msra.mxu0 %v4943_v58  ;;  %4970 = vtanh.f32 %v998_v14  ;;  %v975_v49 = vadd.f32 %v895_v24, %v619_v51  ;;  %v960_v33 = vmul.f32 %v6043_v26, %v6120_v2  ;;  %v586_v20 = vmul.f32 %v6046_v28, %v6063_v63 }
  0xcc   : > { %v4947_v54 = vpop.eup %4946  ;;  %1290 = vmatpush1.msra.mxu1 %v4945_v19  ;;  %4972 = vtanh.f32 %v995_v10  ;;  %v977_v36 = vadd.f32 %v897_v35, %v621_v13  ;;  %v684_v8 = vadd.f32 %v6065_v32, %v584_v3  ;;  %v962_v30 = vmul.f32 %v6049_v22, %v6120_v2 }
  0xcd   : > { %v4949_v44 = vpop.eup %4948  ;;  %1202 = vmatprep.subr.mxu0 %v4947_v54  ;;  %4974 = vtanh.f32 %v997_v6  ;;  %v686_v11 = vadd.f32 %v6065_v32, %v586_v20  ;;  %v583_v60 = vmul.f32 %v5913_v59, %v6063_v63  ;;  %v959_v23 = vmul.f32 %v5934_v4, %v6120_v2  ;;  %v6362_v54 = vld [vmem:[#allocation3 + $0x10] sm:$0xff] }
  0xce   : > { %v4951_v40 = vpop.eup %4950  ;;  %1291 = vmatprep.subr.mxu1 %v4949_v44  ;;  %4976 = vtanh.f32 %v976_v52  ;;  %v1040_v25 = vadd.f32 %v960_v33, %v684_v8  ;;  %v585_v29 = vmul.f32 %v5995_v39, %v6063_v63  ;;  %v961_v53 = vmul.f32 %v6022_v18, %v6120_v2 }
  0xcf   : > { %v4953_v46 = vpop.eup %4952  ;;  %1203 = vmatpush1.msra.mxu0 %v4951_v40  ;;  %4978 = vtanh.f32 %v978_v12  ;;  %v1042_v14 = vadd.f32 %v962_v30, %v686_v11  ;;  %v683_v41 = vadd.f32 %v6065_v32, %v583_v60  ;;  %v564_v1 = vmul.f32 %v6040_v9, %v6114_v37 }
  0xd0   : > { %v4955_v42 = vpop.eup %4954  ;;  %1292 = vmatpush1.msra.mxu1 %v4953_v46  ;;  %4725 = vmatmul.mubr.msk.f32.vlgmr.msra.gmra.mxu0 %vm1159_vm0, %v6312_v45  ;;  %4980 = vtanh.f32 %v975_v49  ;;  %v685_v57 = vadd.f32 %v6065_v32, %v585_v29  ;;  %v940_v43 = vmul.f32 %v6043_v26, %v6176_v5  ;;  %v566_v48 = vmul.f32 %v6046_v28, %v6114_v37 }
  0xd1   : > { %v4957_v10 = vpop.eup %4956  ;;  %4729 = vmatmul.mubr.msk.f32.vlgmr.msra.gmra.mxu1 %vm1159_vm0, %v6312_v45  ;;  %1374 = vmatprep.subr.mxu0 %v6265_v61  ;;  %4982 = vtanh.f32 %v977_v36  ;;  %v1039_v38 = vadd.f32 %v959_v23, %v683_v41  ;;  %v664_v17 = vadd.f32 %v6162_v34, %v564_v1  ;;  %v942_v6 = vmul.f32 %v6049_v22, %v6176_v5 }
  0xd2   : > { %v4959_v15 = vpop.eup %4958  ;;  %1463 = vmatprep.subr.mxu1 %v4955_v42  ;;  %1375 = vmatpush1.msra.mxu0 %v4957_v10  ;;  %4984 = vtanh.f32 %v1040_v25  ;;  %v1041_v16 = vadd.f32 %v961_v53, %v685_v57  ;;  %v666_v62 = vadd.f32 %v6162_v34, %v566_v48  ;;  %v563_v24 = vmul.f32 %v5913_v59, %v6114_v37  ;;  %v6385_v57 = vld [vmem:[#allocation3 + $0x18] sm:$0xff] }
  0xd3   : > { %v4961_v61 = vpop.eup %4960  ;;  %1464 = vmatpush1.msra.mxu1 %v4959_v15  ;;  %v7630_v21 = vmov 0.0   ;;  %4986 = vtanh.f32 %v1042_v14  ;;  %v1020_v7 = vadd.f32 %v940_v43, %v664_v17  ;;  %v939_v52 = vmul.f32 %v5934_v4, %v6176_v5 }
  0xd4   : > { %1242 = vmatprep.mubr.f32.mxu0 %v7630_v21  ;;  %v565_v51 = vmul.f32 %v5995_v39, %v6114_v37  ;;  %v4963_v35 = vpop.eup %4962  ;;  %1376 = vmatprep.subr.mxu0 %v4961_v61  ;;  %4988 = vtanh.f32 %v1039_v38  ;;  %v1022_v58 = vadd.f32 %v942_v6, %v666_v62  ;;  %v663_v12 = vadd.f32 %v6162_v34, %v563_v24 }
  0xd5   : > { %1331 = vmatprep.mubr.f32.mxu1 %v7630_v21  ;;  %v941_v13 = vmul.f32 %v6022_v18, %v6176_v5  ;;  %v4965_v3 = vpop.eup %4964  ;;  %1465 = vmatprep.subr.mxu1 %v4963_v35  ;;  %4990 = vtanh.f32 %v1041_v16  ;;  %v544_v49 = vmul.f32 %v6040_v9, %v6149_v50  ;;  %v920_v33 = vmul.f32 %v6043_v26, %v6209_v31 }
  0xd6   : > { %4726 = vmatmul.mubr.msk.f32.gmra.mxu0 %vm1159_vm0, %v6339_v55  ;;  %v665_v19 = vadd.f32 %v6162_v34, %v565_v51  ;;  %v4967_v20 = vpop.eup %4966  ;;  %4730 = vmatmul.mubr.msk.f32.gmra.mxu1 %vm1159_vm0, %v6339_v55  ;;  %4992 = vtanh.f32 %v1020_v7  ;;  %v1019_v36 = vadd.f32 %v939_v52, %v663_v12  ;;  %v546_v8 = vmul.f32 %v6046_v28, %v6149_v50  ;;  %v7631_v12 = vld [vmem:[#allocation19_spill] sm:$0xff] }
  0xd7   : > { %1377 = vmatpush1.msra.mxu0 %v4965_v3  ;;  %v922_v30 = vmul.f32 %v6049_v22, %v6209_v31  ;;  %v4969_v44 = vpop.eup %4968  ;;  %1466 = vmatpush1.msra.mxu1 %v4967_v20  ;;  %4994 = vtanh.f32 %v1022_v58  ;;  %v644_v60 = vadd.f32 %v6215_v47, %v544_v49  ;;  %v543_v23 = vmul.f32 %v5913_v59, %v6149_v50  ;;  %v7633_v49 = vld [vmem:[#allocation21_spill] sm:$0xff] }
  0xd8   : > { %1248 = vmatprep.mubr.f32.mxu0 %v7630_v21  ;;  %v1021_v11 = vadd.f32 %v941_v13, %v665_v19  ;;  %v4971_v40 = vpop.eup %4970  ;;  %1378 = vmatprep.subr.mxu0 %v4969_v44  ;;  %4996 = vtanh.f32 %v1019_v36  ;;  %v646_v25 = vadd.f32 %v6215_v47, %v546_v8  ;;  %v919_v29 = vmul.f32 %v5934_v4, %v6209_v31  ;;  %v7632_v19 = vld [vmem:[#allocation20_spill] sm:$0xff] }
  0xd9   : > { %1337 = vmatprep.mubr.f32.mxu1 %v7630_v21  ;;  %v545_v53 = vmul.f32 %v5995_v39, %v6149_v50  ;;  %v4973_v46 = vpop.eup %4972  ;;  %1467 = vmatprep.subr.mxu1 %v4971_v40  ;;  %v1000_v14 = vadd.f32 %v920_v33, %v644_v60  ;;  %v643_v41 = vadd.f32 %v6215_v47, %v543_v23  ;;  %v7635_v40 = vld [vmem:[#allocation11_spill] sm:$0xff] }
  0xda   : > { %4727 = vmatmul.mubr.msk.f32.gmra.mxu0 %vm1159_vm0, %v6362_v54  ;;  %4998 = vtanh.f32 %v1021_v11  ;;  %v921_v1 = vmul.f32 %v6022_v18, %v6209_v31  ;;  %v4975_v42 = vpop.eup %4974  ;;  %4731 = vmatmul.mubr.msk.f32.gmra.mxu1 %vm1159_vm0, %v6362_v54  ;;  %v1002_v43 = vadd.f32 %v922_v30, %v646_v25  ;;  %v524_v10 = vmul.f32 %v6040_v9, %v6191_v27  ;;  %v7634_v30 = vld [vmem:[#allocation22_spill] sm:$0xff] }
  0xdb   : > { %1379 = vmatpush1.msra.mxu0 %v4973_v46  ;;  %v645_v48 = vadd.f32 %v6215_v47, %v545_v53  ;;  %v4977_v38 = vpop.eup %4976  ;;  %1468 = vmatpush1.msra.mxu1 %v4975_v42  ;;  %5000 = vtanh.f32 %v1000_v14  ;;  %v999_v17 = vadd.f32 %v919_v29, %v643_v41  ;;  %v900_v6 = vmul.f32 %v6043_v26, %v6231_v0  ;;  %v7636_v46 = vld [vmem:[#allocation13_spill] sm:$0xff]  ;;  %v7637_v41 = vld [vmem:[#allocation15_spill] sm:$0xff] }
  0xdc   : > { %1254 = vmatprep.mubr.f32.mxu0 %v7630_v21  ;;  %v526_v15 = vmul.f32 %v6046_v28, %v6191_v27  ;;  %v4979_v16 = vpop.eup %4978  ;;  %1380 = vmatprep.subr.mxu0 %v4977_v38  ;;  %5002 = vtanh.f32 %v1002_v43  ;;  %v624_v9 = vadd.f32 %v6235_v56, %v524_v10  ;;  %v902_v24 = vmul.f32 %v6049_v22, %v6231_v0  ;;  %v7638_v10 = vld [vmem:[#allocation17_spill] sm:$0xff] }
  0xdd   : > { %1343 = vmatprep.mubr.f32.mxu1 %v7630_v21  ;;  %v1001_v62 = vadd.f32 %v921_v1, %v645_v48  ;;  %v4981_v61 = vpop.eup %4980  ;;  %1469 = vmatprep.subr.mxu1 %v4979_v16  ;;  %5004 = vtanh.f32 %v999_v17  ;;  %v523_v28 = vmul.f32 %v5913_v59, %v6191_v27  ;;  %v899_v7 = vmul.f32 %v5934_v4, %v6231_v0 }
  0xde   : > { %4728 = vmatmul.mubr.msk.f32.gmra.mxu0 %vm1159_vm0, %v6385_v57  ;;  %v626_v26 = vadd.f32 %v6235_v56, %v526_v15  ;;  %v4983_v52 = vpop.eup %4982  ;;  %4732 = vmatmul.mubr.msk.f32.gmra.mxu1 %vm1159_vm0, %v6385_v57  ;;  %v980_v22 = vadd.f32 %v900_v6, %v624_v9  ;;  %v525_v51 = vmul.f32 %v5995_v39, %v6191_v27 }
  0xdf   : > { %1381 = vmatpush1.msra.mxu0 %v4981_v61  ;;  %5006 = vtanh.f32 %v1001_v62  ;;  %v901_v35 = vmul.f32 %v6022_v18, %v6231_v0  ;;  %v4985_v58 = vpop.eup %4984  ;;  %1470 = vmatpush1.msra.mxu1 %v4983_v52  ;;  %v623_v4 = vadd.f32 %v6235_v56, %v523_v28  ;;  %v588_v13 = vmul.f32 %v7631_v12, %v6063_v63 }
  0xe0   : > { %1414 = vmatprep.mubr.f32.mxu0 %v7630_v21  ;;  %v982_v59 = vadd.f32 %v902_v24, %v626_v26  ;;  %v4987_v3 = vpop.eup %4986  ;;  %1552 = vmatprep.subr.mxu0 %v4985_v58  ;;  %5008 = vtanh.f32 %v980_v22  ;;  %v625_v39 = vadd.f32 %v6235_v56, %v525_v51  ;;  %v964_v18 = vmul.f32 %v7632_v19, %v6120_v2 }
  0xe1   : > { %1503 = vmatprep.mubr.f32.mxu1 %v7630_v21  ;;  %v590_v33 = vmul.f32 %v7633_v49, %v6063_v63  ;;  %v4989_v20 = vpop.eup %4988  ;;  %1641 = vmatprep.subr.mxu1 %v4987_v3  ;;  %v979_v36 = vadd.f32 %v899_v7, %v623_v4  ;;  %v688_v8 = vadd.f32 %v6065_v32, %v588_v13 }
  0xe2   : > { %4733 = vmatmul.mubr.msk.f32.vlgmr.msra.gmra.mxu0 %vm1159_vm0, %v6312_v45  ;;  %5010 = vtanh.f32 %v982_v59  ;;  %v966_v44 = vmul.f32 %v7634_v30, %v6120_v2  ;;  %v4991_v11 = vpop.eup %4990  ;;  %4737 = vmatmul.mubr.msk.f32.vlgmr.msra.gmra.mxu1 %vm1159_vm0, %v6312_v45  ;;  %v981_v60 = vadd.f32 %v901_v35, %v625_v39  ;;  %v587_v25 = vmul.f32 %v7635_v40, %v6063_v63 }
  0xe3   : > { %1553 = vmatpush1.msra.mxu0 %v4989_v20  ;;  %v690_v23 = vadd.f32 %v6065_v32, %v590_v33  ;;  %v4993_v29 = vpop.eup %4992  ;;  %1642 = vmatpush1.msra.mxu1 %v4991_v11  ;;  %5012 = vtanh.f32 %v979_v36  ;;  %v1044_v53 = vadd.f32 %v964_v18, %v688_v8  ;;  %v963_v14 = vmul.f32 %v7636_v46, %v6120_v2 }
  0xe4   : > { %1420 = vmatprep.mubr.f32.mxu0 %v7630_v21  ;;  %v589_v1 = vmul.f32 %v7637_v41, %v6063_v63  ;;  %v4995_v42 = vpop.eup %4994  ;;  %1554 = vmatprep.subr.mxu0 %v4993_v29  ;;  %5014 = vtanh.f32 %v981_v60  ;;  %v687_v48 = vadd.f32 %v6065_v32, %v587_v25  ;;  %v965_v38 = vmul.f32 %v7638_v10, %v6120_v2 }
  0xe5   : > { %1509 = vmatprep.mubr.f32.mxu1 %v7630_v21  ;;  %v1046_v43 = vadd.f32 %v966_v44, %v690_v23  ;;  %v4997_v17 = vpop.eup %4996  ;;  %1643 = vmatprep.subr.mxu1 %v4995_v42  ;;  %5016 = vtanh.f32 %v1044_v53  ;;  %v568_v15 = vmul.f32 %v7631_v12, %v6114_v37  ;;  %v944_v16 = vmul.f32 %v7632_v19, %v6176_v5 }
  0xe6   : > { %4734 = vmatmul.mubr.msk.f32.gmra.mxu0 %vm1159_vm0, %v6339_v55  ;;  %v689_v6 = vadd.f32 %v6065_v32, %v589_v1  ;;  %4738 = vmatmul.mubr.msk.f32.gmra.mxu1 %vm1159_vm0, %v6339_v55  ;;  %v1043_v9 = vadd.f32 %v963_v14, %v687_v48  ;;  %v570_v24 = vmul.f32 %v7633_v49, %v6114_v37 }
  0xe7   : > { %v4999_v62 = vpop.eup %4998  ;;  %1555 = vmatpush1.msra.mxu0 %v4997_v17  ;;  %5018 = vtanh.f32 %v1046_v43  ;;  %v946_v61 = vmul.f32 %v7634_v30, %v6176_v5  ;;  %1426 = vmatprep.mubr.f32.mxu0 %v7630_v21  ;;  %v668_v28 = vadd.f32 %v6162_v34, %v568_v15  ;;  %v567_v7 = vmul.f32 %v7635_v40, %v6114_v37 }
  0xe8   : > { %1644 = vmatpush1.msra.mxu1 %v4999_v62  ;;  %v1045_v26 = vadd.f32 %v965_v38, %v689_v6  ;;  %v5001_v52 = vpop.eup %5000  ;;  %1515 = vmatprep.mubr.f32.mxu1 %v7630_v21  ;;  %5020 = vtanh.f32 %v1043_v9  ;;  %v670_v22 = vadd.f32 %v6162_v34, %v570_v24  ;;  %v943_v51 = vmul.f32 %v7636_v46, %v6176_v5 }
  0xe9   : > { %v569_v35 = vmul.f32 %v7637_v41, %v6114_v37  ;;  %v5003_v58 = vpop.eup %5002  ;;  %1556 = vmatprep.subr.mxu0 %v5001_v52  ;;  %v1024_v59 = vadd.f32 %v944_v16, %v668_v28  ;;  %v667_v4 = vadd.f32 %v6162_v34, %v567_v7  ;;  %v945_v13 = vmul.f32 %v7638_v10, %v6176_v5 }
  0xea   : > { %4735 = vmatmul.mubr.msk.f32.gmra.mxu0 %vm1159_vm0, %v6362_v54  ;;  %5022 = vtanh.f32 %v1045_v26  ;;  %v5005_v3 = vpop.eup %5004  ;;  %1645 = vmatprep.subr.mxu1 %v5003_v58  ;;  %v1026_v39 = vadd.f32 %v946_v61, %v670_v22  ;;  %v548_v33 = vmul.f32 %v7631_v12, %v6149_v50  ;;  %v924_v8 = vmul.f32 %v7632_v19, %v6209_v31 }
  0xeb   : > { %4739 = vmatmul.mubr.msk.f32.gmra.mxu1 %vm1159_vm0, %v6362_v54  ;;  %v669_v18 = vadd.f32 %v6162_v34, %v569_v35  ;;  %1557 = vmatpush1.msra.mxu0 %v5005_v3  ;;  %5024 = vtanh.f32 %v1024_v59  ;;  %v1023_v36 = vadd.f32 %v943_v51, %v667_v4  ;;  %v550_v44 = vmul.f32 %v7633_v49, %v6149_v50 }
  0xec   : > { %v5007_v20 = vpop.eup %5006  ;;  %1432 = vmatprep.mubr.f32.mxu0 %v7630_v21  ;;  %1521 = vmatprep.mubr.f32.mxu1 %v7630_v21  ;;  %5026 = vtanh.f32 %v1026_v39  ;;  %v648_v60 = vadd.f32 %v6215_v47, %v548_v33  ;;  %v926_v23 = vmul.f32 %v7634_v30, %v6209_v31  ;;  %v547_v53 = vmul.f32 %v7635_v40, %v6149_v50  ;;  %v7641_v33 = vld [vmem:[#allocation25_spill] sm:$0xff] }
  0xed   : > { %1646 = vmatpush1.msra.mxu1 %v5007_v20  ;;  %v1025_v11 = vadd.f32 %v945_v13, %v669_v18  ;;  %v5009_v25 = vpop.eup %5008  ;;  %5028 = vtanh.f32 %v1023_v36  ;;  %v650_v29 = vadd.f32 %v6215_v47, %v550_v44  ;;  %v923_v14 = vmul.f32 %v7636_v46, %v6209_v31 }
  0xee   : > { %4736 = vmatmul.mubr.msk.f32.gmra.mxu0 %vm1159_vm0, %v6385_v57  ;;  %1558 = vmatprep.subr.mxu0 %v5009_v25  ;;  %v1004_v42 = vadd.f32 %v924_v8, %v648_v60  ;;  %v549_v43 = vmul.f32 %v7637_v41, %v6149_v50  ;;  %v925_v48 = vmul.f32 %v7638_v10, %v6209_v31 }
  0xef   : > { %v5011_v1 = vpop.eup %5010  ;;  %4740 = vmatmul.mubr.msk.f32.gmra.mxu1 %vm1159_vm0, %v6385_v57  ;;  %5030 = vtanh.f32 %v1025_v11  ;;  %1592 = vmatprep.mubr.f32.mxu0 %v7630_v21  ;;  %v1006_v38 = vadd.f32 %v926_v23, %v650_v29  ;;  %v647_v17 = vadd.f32 %v6215_v47, %v547_v53  ;;  %v528_v6 = vmul.f32 %v7631_v12, %v6191_v27  ;;  %v7643_v11 = vld [vmem:[#allocation12_spill] sm:$0xff]  ;;  %v7644_v29 = vld [vmem:[#allocation14_spill] sm:$0xff] }
  0xf0   : > { %1647 = vmatprep.subr.mxu1 %v5011_v1  ;;  %v5013_v15 = vpop.eup %5012  ;;  %1681 = vmatprep.mubr.f32.mxu1 %v7630_v21  ;;  %5032 = vtanh.f32 %v1004_v42  ;;  %v649_v16 = vadd.f32 %v6215_v47, %v549_v43  ;;  %v904_v62 = vmul.f32 %v7632_v19, %v6231_v0  ;;  %v530_v9 = vmul.f32 %v7633_v49, %v6191_v27 }
  0xf1   : > { %v5015_v24 = vpop.eup %5014  ;;  %1559 = vmatpush1.msra.mxu0 %v5013_v15  ;;  %5034 = vtanh.f32 %v1006_v38  ;;  %v1003_v61 = vadd.f32 %v923_v14, %v647_v17  ;;  %v628_v26 = vadd.f32 %v6235_v56, %v528_v6  ;;  %v906_v12 = vmul.f32 %v7634_v30, %v6231_v0  ;;  %v7645_v14 = vld [vmem:[#allocation16_spill] sm:$0xff]  ;;  %v7646_v38 = vld [vmem:[#allocation18_spill] sm:$0xff] }
  0xf2   : > { %v5017_v28 = vpop.eup %5016  ;;  %1648 = vmatpush1.msra.mxu1 %v5015_v24  ;;  %4741 = vmatmul.mubr.msk.f32.vlgmr.msra.gmra.mxu0 %vm1159_vm0, %v6312_v45  ;;  %v1005_v7 = vadd.f32 %v925_v48, %v649_v16  ;;  %v630_v19 = vadd.f32 %v6235_v56, %v530_v9  ;;  %v527_v49 = vmul.f32 %v7635_v40, %v6191_v27 }
  0xf3   : > { %1730 = vmatprep.subr.mxu0 %v5017_v28  ;;  %4745 = vmatmul.mubr.msk.f32.vlgmr.msra.gmra.mxu1 %vm1159_vm0, %v6312_v45  ;;  %5036 = vtanh.f32 %v1003_v61  ;;  %v984_v22 = vadd.f32 %v904_v62, %v628_v26  ;;  %v903_v30 = vmul.f32 %v7636_v46, %v6231_v0  ;;  %v529_v51 = vmul.f32 %v7637_v41, %v6191_v27  ;;  %v7639_v46 = vld [vmem:[#allocation23_spill] sm:$0xff]  ;;  %v7640_v41 = vld [vmem:[#allocation24_spill] sm:$0xff] }
  0xf4   : > { %v5019_v52 = vpop.eup %5018  ;;  %1598 = vmatprep.mubr.f32.mxu0 %v7630_v21  ;;  %5038 = vtanh.f32 %v1005_v7  ;;  %v986_v35 = vadd.f32 %v906_v12, %v630_v19  ;;  %v627_v40 = vadd.f32 %v6235_v56, %v527_v49  ;;  %v905_v58 = vmul.f32 %v7638_v10, %v6231_v0  ;;  %1687 = vmatprep.mubr.f32.mxu1 %v7630_v21  ;;  %v7642_v10 = vld [vmem:[#allocation26_spill] sm:$0xff] }
  0xf5   : > { %1819 = vmatprep.subr.mxu1 %v5019_v52  ;;  %v5021_v59 = vpop.eup %5020  ;;  %5040 = vtanh.f32 %v984_v22  ;;  %v629_v4 = vadd.f32 %v6235_v56, %v529_v51  ;;  %v592_v13 = vmul.f32 %v7639_v46, %v6063_v63  ;;  %v968_v3 = vmul.f32 %v7640_v41, %v6120_v2 }
  0xf6   : > { %1731 = vmatpush1.msra.mxu0 %v5021_v59  ;;  %5042 = vtanh.f32 %v986_v35  ;;  %v983_v18 = vadd.f32 %v903_v30, %v627_v40  ;;  %v594_v20 = vmul.f32 %v7641_v33, %v6063_v63  ;;  %v970_v36 = vmul.f32 %v7642_v10, %v6120_v2 }
  0xf7   : > { %v5023_v39 = vpop.eup %5022  ;;  %4742 = vmatmul.mubr.msk.f32.gmra.mxu0 %vm1159_vm0, %v6339_v55  ;;  %v985_v8 = vadd.f32 %v905_v58, %v629_v4  ;;  %v692_v44 = vadd.f32 %v6065_v32, %v592_v13  ;;  %v591_v60 = vmul.f32 %v7643_v11, %v6063_v63  ;;  %4746 = vmatmul.mubr.msk.f32.gmra.mxu1 %vm1159_vm0, %v6339_v55 }
  0xf8   : > { %1820 = vmatpush1.msra.mxu1 %v5023_v39  ;;  %v5025_v23 = vpop.eup %5024  ;;  %5044 = vtanh.f32 %v983_v18  ;;  %1604 = vmatprep.mubr.f32.mxu0 %v7630_v21  ;;  %v694_v25 = vadd.f32 %v6065_v32, %v594_v20  ;;  %v967_v53 = vmul.f32 %v7644_v29, %v6120_v2  ;;  %v593_v1 = vmul.f32 %v7645_v14, %v6063_v63 }
  0xf9   : > { %v5027_v42 = vpop.eup %5026  ;;  %1732 = vmatprep.subr.mxu0 %v5025_v23  ;;  %5046 = vtanh.f32 %v985_v8  ;;  %1693 = vmatprep.mubr.f32.mxu1 %v7630_v21  ;;  %v1048_v43 = vadd.f32 %v968_v3, %v692_v44  ;;  %v691_v48 = vadd.f32 %v6065_v32, %v591_v60  ;;  %v969_v17 = vmul.f32 %v7646_v38, %v6120_v2 }
  0xfa   : > { %v5029_v6 = vpop.eup %5028  ;;  %1821 = vmatprep.subr.mxu1 %v5027_v42  ;;  %v1050_v15 = vadd.f32 %v970_v36, %v694_v25  ;;  %v693_v16 = vadd.f32 %v6065_v32, %v593_v1  ;;  %v572_v62 = vmul.f32 %v7639_v46, %v6114_v37  ;;  %v948_v63 = vmul.f32 %v7640_v41, %v6176_v5 }
  0xfb   : > { %1733 = vmatpush1.msra.mxu0 %v5029_v6  ;;  %5048 = vtanh.f32 %v1048_v43  ;;  %v1047_v24 = vadd.f32 %v967_v53, %v691_v48  ;;  %v574_v61 = vmul.f32 %v7641_v33, %v6114_v37  ;;  %v950_v2 = vmul.f32 %v7642_v10, %v6176_v5  ;;  %4747 = vmatmul.mubr.msk.f32.gmra.mxu1 %vm1159_vm0, %v6362_v54 }
  0xfc   : > { %v5031_v9 = vpop.eup %5030  ;;  %5050 = vtanh.f32 %v1050_v15  ;;  %4743 = vmatmul.mubr.msk.f32.gmra.mxu0 %vm1159_vm0, %v6362_v54  ;;  %v1049_v32 = vadd.f32 %v969_v17, %v693_v16  ;;  %v672_v26 = vadd.f32 %v6162_v34, %v572_v62  ;;  %v571_v12 = vmul.f32 %v7643_v11, %v6114_v37  ;;  %1699 = vmatprep.mubr.f32.mxu1 %v7630_v21 }
  0xfd   : > { %1822 = vmatpush1.msra.mxu1 %v5031_v9  ;;  %v5033_v28 = vpop.eup %5032  ;;  %1610 = vmatprep.mubr.f32.mxu0 %v7630_v21  ;;  %5052 = vtanh.f32 %v1047_v24  ;;  %v674_v7 = vadd.f32 %v6162_v34, %v574_v61  ;;  %v947_v19 = vmul.f32 %v7644_v29, %v6176_v5  ;;  %v573_v49 = vmul.f32 %v7645_v14, %v6114_v37 }
  0xfe   : > { %v5035_v52 = vpop.eup %5034  ;;  %1734 = vmatprep.subr.mxu0 %v5033_v28  ;;  %5054 = vtanh.f32 %v1049_v32  ;;  %v1028_v22 = vadd.f32 %v948_v63, %v672_v26  ;;  %v671_v30 = vadd.f32 %v6162_v34, %v571_v12  ;;  %v949_v51 = vmul.f32 %v7646_v38, %v6176_v5 }
  0xff   : > { %1823 = vmatprep.subr.mxu1 %v5035_v52  ;;  %v1030_v35 = vadd.f32 %v950_v2, %v674_v7  ;;  %v673_v40 = vadd.f32 %v6162_v34, %v573_v49  ;;  %v552_v58 = vmul.f32 %v7639_v46, %v6149_v50  ;;  %v928_v37 = vmul.f32 %v7640_v41, %v6209_v31 }
 0x100   : > { %v5037_v59 = vpop.eup %5036  ;;  %4744 = vmatmul.mubr.msk.f32.gmra.mxu0 %vm1159_vm0, %v6385_v57  ;;  %5056 = vtanh.f32 %v1028_v22  ;;  %v1027_v4 = vadd.f32 %v947_v19, %v671_v30  ;;  %v554_v13 = vmul.f32 %v7641_v33, %v6149_v50  ;;  %v930_v5 = vmul.f32 %v7642_v10, %v6209_v31  ;;  %4748 = vmatmul.mubr.msk.f32.gmra.mxu1 %vm1159_vm0, %v6385_v57 }
 0x101   : > { %v5039_v3 = vpop.eup %5038  ;;  %1735 = vmatpush1.msra.mxu0 %v5037_v59  ;;  %5058 = vtanh.f32 %v1030_v35  ;;  %v1029_v34 = vadd.f32 %v949_v51, %v673_v40  ;;  %v652_v39 = vadd.f32 %v6215_v47, %v552_v58  ;;  %v551_v18 = vmul.f32 %v7643_v11, %v6149_v50  ;;  %1770 = vmatprep.mubr.f32.mxu0 %v7630_v21 }
 0x102   : > { %v5041_v20 = vpop.eup %5040  ;;  %1824 = vmatpush1.msra.mxu1 %v5039_v3  ;;  %5060 = vtanh.f32 %v1027_v4  ;;  %v654_v36 = vadd.f32 %v6215_v47, %v554_v13  ;;  %v927_v8 = vmul.f32 %v7644_v29, %v6209_v31  ;;  %v553_v44 = vmul.f32 %v7645_v14, %v6149_v50  ;;  %1859 = vmatprep.mubr.f32.mxu1 %v7630_v21 }
 0x103   : > { %v5043_v60 = vpop.eup %5042  ;;  %1736 = vmatprep.subr.mxu0 %v5041_v20  ;;  %5062 = vtanh.f32 %v1029_v34  ;;  %v1008_v23 = vadd.f32 %v928_v37, %v652_v39  ;;  %v651_v25 = vadd.f32 %v6215_v47, %v551_v18  ;;  %v929_v53 = vmul.f32 %v7646_v38, %v6209_v31  ;;  %v6681_v39 = vpop.permute.xlu0 %1151 }
 0x104   : > { %1825 = vmatprep.subr.mxu1 %v5043_v60  ;;  %v1010_v1 = vadd.f32 %v930_v5, %v654_v36  ;;  %v653_v42 = vadd.f32 %v6215_v47, %v553_v44  ;;  %v532_v43 = vmul.f32 %v7639_v46, %v6191_v27  ;;  %v908_v50 = vmul.f32 %v7640_v41, %v6231_v0 }
 0x105   : > { %v5045_v48 = vpop.eup %5044  ;;  %5064 = vtanh.f32 %v1008_v23  ;;  %v1007_v17 = vadd.f32 %v927_v8, %v651_v25  ;;  %v534_v6 = vmul.f32 %v7641_v33, %v6191_v27  ;;  %v910_v15 = vmul.f32 %v7642_v10, %v6231_v0 }
 0x106   : > { %v5047_v31 = vpop.eup %5046  ;;  %1737 = vmatpush1.msra.mxu0 %v5045_v48  ;;  %5066 = vtanh.f32 %v1010_v1  ;;  %v1009_v16 = vadd.f32 %v929_v53, %v653_v42  ;;  %v632_v47 = vadd.f32 %v6235_v56, %v532_v43  ;;  %v531_v46 = vmul.f32 %v7643_v11, %v6191_v27 }
 0x107   : > { %1826 = vmatpush1.msra.mxu1 %v5047_v31  ;;  %4749 = vmatmul.mubr.msk.f32.vlgmr.msra.gmra.mxu0 %vm1159_vm0, %v6312_v45  ;;  %5068 = vtanh.f32 %v1007_v17  ;;  %v634_v41 = vadd.f32 %v6235_v56, %v534_v6  ;;  %v907_v33 = vmul.f32 %v7644_v29, %v6231_v0  ;;  %v533_v10 = vmul.f32 %v7645_v14, %v6191_v27 }
 0x108   : > { %v5049_v62 = vpop.eup %5048  ;;  %4753 = vmatmul.mubr.msk.f32.vlgmr.msra.gmra.mxu1 %vm1159_vm0, %v6312_v45  ;;  %1776 = vmatprep.mubr.f32.mxu0 %v7630_v21  ;;  %5070 = vtanh.f32 %v1009_v16  ;;  %v988_v11 = vadd.f32 %v908_v50, %v632_v47  ;;  %v631_v63 = vadd.f32 %v6235_v56, %v531_v46  ;;  %v909_v9 = vmul.f32 %v7646_v38, %v6231_v0 }
 0x109   : > { %v5051_v24 = vpop.eup %5050  ;;  %1908 = vmatprep.subr.mxu0 %v5049_v62  ;;  %1865 = vmatprep.mubr.f32.mxu1 %v7630_v21  ;;  %v990_v29 = vadd.f32 %v910_v15, %v634_v41  ;;  %v633_v27 = vadd.f32 %v6235_v56, %v533_v10 }
 0x10a   : > { %v5053_v14 = vpop.eup %5052  ;;  %1997 = vmatprep.subr.mxu1 %v5051_v24  ;;  %5072 = vtanh.f32 %v988_v11  ;;  %v987_v61 = vadd.f32 %v907_v33, %v631_v63 }
 0x10b   : > { %v5055_v2 = vpop.eup %5054  ;;  %1909 = vmatpush1.msra.mxu0 %v5053_v14  ;;  %5074 = vtanh.f32 %v990_v29  ;;  %v989_v32 = vadd.f32 %v909_v9, %v633_v27 }
 0x10c   : > { %1998 = vmatpush1.msra.mxu1 %v5055_v2  ;;  %4750 = vmatmul.mubr.msk.f32.gmra.mxu0 %vm1159_vm0, %v6339_v55  ;;  %5076 = vtanh.f32 %v987_v61 }
 0x10d   : > { %v5057_v0 = vpop.eup %5056  ;;  %4754 = vmatmul.mubr.msk.f32.gmra.mxu1 %vm1159_vm0, %v6339_v55  ;;  %5078 = vtanh.f32 %v989_v32  ;;  %1782 = vmatprep.mubr.f32.mxu0 %v7630_v21 }
 0x10e   : > { %v5059_v56 = vpop.eup %5058  ;;  %1910 = vmatprep.subr.mxu0 %v5057_v0  ;;  %1871 = vmatprep.mubr.f32.mxu1 %v7630_v21 }
 0x10f   : > { %v5061_v38 = vpop.eup %5060  ;;  %1999 = vmatprep.subr.mxu1 %v5059_v56 }
 0x110   : > { %v5063_v26 = vpop.eup %5062  ;;  %1911 = vmatpush1.msra.mxu0 %v5061_v38 }
 0x111   : > { %2000 = vmatpush1.msra.mxu1 %v5063_v26  ;;  %4751 = vmatmul.mubr.msk.f32.gmra.mxu0 %vm1159_vm0, %v6362_v54 }
 0x112   : > { %v5065_v12 = vpop.eup %5064  ;;  %4755 = vmatmul.mubr.msk.f32.gmra.mxu1 %vm1159_vm0, %v6362_v54  ;;  %1788 = vmatprep.mubr.f32.mxu0 %v7630_v21 }
 0x113   : > { %v5067_v28 = vpop.eup %5066  ;;  %1912 = vmatprep.subr.mxu0 %v5065_v12  ;;  %1877 = vmatprep.mubr.f32.mxu1 %v7630_v21 }
 0x114   : > { %v5069_v7 = vpop.eup %5068  ;;  %2001 = vmatprep.subr.mxu1 %v5067_v28 }
 0x115   : > { %v5071_v19 = vpop.eup %5070  ;;  %1913 = vmatpush1.msra.mxu0 %v5069_v7 }
 0x116   : > { %2002 = vmatpush1.msra.mxu1 %v5071_v19  ;;  %4752 = vmatmul.mubr.msk.f32.gmra.mxu0 %vm1159_vm0, %v6385_v57 }
 0x117   : > { %v5073_v49 = vpop.eup %5072  ;;  %4756 = vmatmul.mubr.msk.f32.gmra.mxu1 %vm1159_vm0, %v6385_v57  ;;  %1948 = vmatprep.mubr.f32.mxu0 %v7630_v21 }
 0x118   : > { %v5075_v52 = vpop.eup %5074  ;;  %1914 = vmatprep.subr.mxu0 %v5073_v49  ;;  %2037 = vmatprep.mubr.f32.mxu1 %v7630_v21 }
 0x119   : > { %v5077_v22 = vpop.eup %5076  ;;  %2003 = vmatprep.subr.mxu1 %v5075_v52 }
 0x11a   : > { %v5079_v30 = vpop.eup %5078  ;;  %1915 = vmatpush1.msra.mxu0 %v5077_v22 }
 0x11b   : > { %2004 = vmatpush1.msra.mxu1 %v5079_v30  ;;  %4757 = vmatmul.mubr.msk.f32.vlgmr.msra.gmra.mxu0 %vm1159_vm0, %v6312_v45 }
 0x11c   : > { %4761 = vmatmul.mubr.msk.f32.vlgmr.msra.gmra.mxu1 %vm1159_vm0, %v6312_v45  ;;  %1954 = vmatprep.mubr.f32.mxu0 %v7630_v21  ;;  %v6672_v45 = vpop.permute.xlu1 %1156 }
 0x11d   : > { %2043 = vmatprep.mubr.f32.mxu1 %v7630_v21 }
 0x11f   : > { %4758 = vmatmul.mubr.msk.f32.gmra.mxu0 %vm1159_vm0, %v6339_v55 }
 0x120   : > { %4762 = vmatmul.mubr.msk.f32.gmra.mxu1 %vm1159_vm0, %v6339_v55  ;;  %1960 = vmatprep.mubr.f32.mxu0 %v7630_v21  ;;  %v6674_v55 = vpop.permute.xlu1 %1146 }
 0x121   : > { %2049 = vmatprep.mubr.f32.mxu1 %v7630_v21 }
 0x123   : > { %4759 = vmatmul.mubr.msk.f32.gmra.mxu0 %vm1159_vm0, %v6362_v54 }
 0x124   : > { %4763 = vmatmul.mubr.msk.f32.gmra.mxu1 %vm1159_vm0, %v6362_v54  ;;  %1966 = vmatprep.mubr.f32.mxu0 %v7630_v21  ;;  %v6676_v37 = vpop.permute.xlu1 %1141 }
 0x125   : > { %2055 = vmatprep.mubr.f32.mxu1 %v7630_v21 }
 0x127   : > { %4760 = vmatmul.mubr.msk.f32.gmra.mxu0 %vm1159_vm0, %v6385_v57 }
 0x128   : > { %4764 = vmatmul.mubr.msk.f32.gmra.mxu1 %vm1159_vm0, %v6385_v57  ;;  %2248 = vmatprep.mubr.f32.mxu0 %v7630_v21 }
 0x129   : > { %2337 = vmatprep.mubr.f32.mxu1 %v7630_v21 }
 0x190   : > { %v1238_v51 = vpop.f32.mrf.mxu0 }
 0x191   : > { %v1327_v54 = vpop.f32.mrf.mxu1  ;;  %v1239_v4 = vadd.f32 %v1238_v51, %v6676_v37 }
 0x192   : > { %v1240_v35 = vpop.f32.mrf.mxu0  ;;  %v1328_v62 = vadd.f32 %v1327_v54, %v6676_v37 }
 0x193   : > { %v1329_v40 = vpop.f32.mrf.mxu1  ;;  %v1241_v57 = vadd.f32 %v1240_v35, %v6676_v37  ;;  %5080 = vtanh.f32 %v1239_v4 }
 0x194   : > { %v1330_v33 = vadd.f32 %v1329_v40, %v6676_v37 }
 0x195   : > { %5082 = vtanh.f32 %v1241_v57 }
 0x196   : > { %v1244_v58 = vpop.f32.mrf.mxu0  ;;  %v1333_v59 = vpop.f32.mrf.mxu1 }
 0x197   : > { %v1245_v3 = vadd.f32 %v1244_v58, %v6674_v55  ;;  %v1334_v46 = vadd.f32 %v1333_v59, %v6674_v55 }
 0x198   : > { %v1246_v13 = vpop.f32.mrf.mxu0  ;;  %v1335_v5 = vpop.f32.mrf.mxu1 }
 0x199   : > { %v1247_v18 = vadd.f32 %v1246_v13, %v6674_v55  ;;  %5084 = vtanh.f32 %v1245_v3  ;;  %v1336_v16 = vadd.f32 %v1335_v5, %v6674_v55 }
 0x19a   : > { %v1250_v34 = vpop.f32.mrf.mxu0  ;;  %v1339_v20 = vpop.f32.mrf.mxu1 }
 0x19b   : > { %v1251_v36 = vadd.f32 %v1250_v34, %v6681_v39  ;;  %5086 = vtanh.f32 %v1247_v18  ;;  %v1340_v15 = vadd.f32 %v1339_v20, %v6681_v39 }
 0x19c   : > { %v1252_v8 = vpop.f32.mrf.mxu0  ;;  %v1341_v60 = vpop.f32.mrf.mxu1 }
 0x19d   : > { %v1253_v44 = vadd.f32 %v1252_v8, %v6681_v39  ;;  %5088 = vtanh.f32 %v1251_v36  ;;  %v1342_v48 = vadd.f32 %v1341_v60, %v6681_v39 }
 0x19e   : > { %v1256_v23 = vpop.f32.mrf.mxu0  ;;  %v1345_v53 = vpop.f32.mrf.mxu1 }
 0x19f   : > { %v1257_v25 = vadd.f32 %v1256_v23, %v6672_v45  ;;  %5090 = vtanh.f32 %v1253_v44  ;;  %v1346_v42 = vadd.f32 %v1345_v53, %v6672_v45 }
 0x1a0   : > { %v1258_v1 = vpop.f32.mrf.mxu0  ;;  %v1347_v50 = vpop.f32.mrf.mxu1 }
 0x1a1   : > { %v1259_v43 = vadd.f32 %v1258_v1, %v6672_v45  ;;  %5092 = vtanh.f32 %v1257_v25  ;;  %v1348_v17 = vadd.f32 %v1347_v50, %v6672_v45  ;;  %v6704_v9 = vpop.eup %5080  ;;  %v6722_v25 = vld [vmem:[#allocation3 + $0x20] sm:$0xff] }
 0x1a2   : > { %v6691_v6 = vpop.f32.mrf.mxu0  ;;  %v6694_v31 = vpop.f32.mrf.mxu1 }
 0x1a3   : > { %5094 = vtanh.f32 %v1259_v43  ;;  %v5083_v29 = vpop.eup %5082 }
 0x1a4   : > { %5096 = vtanh.f32 %v1348_v17  ;;  %v1418_v47 = vpop.f32.mrf.mxu0  ;;  %v6698_v41 = vpop.f32.mrf.mxu1 }
 0x1a5   : > { %5098 = vtanh.f32 %v1346_v42  ;;  %v1419_v61 = vadd.f32 %v1418_v47, %v6676_v37  ;;  %v1508_v43 = vadd.f32 %v6698_v41, %v6676_v37  ;;  %v6742_v47 = vld [vmem:[#allocation3 + $0x28] sm:$0xff] }
 0x1a6   : > { %5100 = vtanh.f32 %v1342_v48  ;;  %v1422_v10 = vpop.f32.mrf.mxu0  ;;  %v6702_v11 = vpop.f32.mrf.mxu1  ;;  %v1417_v48 = vadd.f32 %v6691_v6, %v6676_v37 }
 0x1a7   : > { %5102 = vtanh.f32 %v1340_v15  ;;  %v5085_v14 = vpop.eup %5084  ;;  %v1423_v0 = vadd.f32 %v1422_v10, %v6674_v55  ;;  %v1512_v1 = vadd.f32 %v6702_v11, %v6674_v55  ;;  %v1506_v15 = vadd.f32 %v6694_v31, %v6676_v37  ;;  %v6757_v11 = vld [vmem:[#allocation3 + $0x30] sm:$0xff] }
 0x1a8   : > { %5104 = vtanh.f32 %v1336_v16  ;;  %v1424_v63 = vpop.f32.mrf.mxu0  ;;  %v1513_v24 = vpop.f32.mrf.mxu1 }
 0x1a9   : > { %5106 = vtanh.f32 %v1334_v46  ;;  %v5087_v32 = vpop.eup %5086  ;;  %v1425_v36 = vadd.f32 %v1424_v63, %v6674_v55  ;;  %v1514_v60 = vadd.f32 %v1513_v24, %v6674_v55 }
 0x1aa   : > { %5108 = vtanh.f32 %v1330_v33  ;;  %v1428_v27 = vpop.f32.mrf.mxu0  ;;  %v5089_v38 = vpop.eup %5088 }
 0x1ab   : > { %5110 = vtanh.f32 %v1328_v62  ;;  %v1517_v2 = vpop.f32.mrf.mxu1  ;;  %v1429_v57 = vadd.f32 %v1428_v27, %v6681_v39 }
 0x1ac   : > { %v1430_v56 = vpop.f32.mrf.mxu0  ;;  %v5091_v28 = vpop.eup %5090  ;;  %5112 = vtanh.f32 %v1419_v61  ;;  %v1518_v34 = vadd.f32 %v1517_v2, %v6681_v39 }
 0x1ad   : > { %v1431_v26 = vadd.f32 %v1430_v56, %v6681_v39  ;;  %v1519_v12 = vpop.f32.mrf.mxu1  ;;  %5114 = vtanh.f32 %v1423_v0 }
 0x1ae   : > { %v1434_v7 = vpop.f32.mrf.mxu0  ;;  %v5093_v19 = vpop.eup %5092  ;;  %v1520_v59 = vadd.f32 %v1519_v12, %v6681_v39 }
 0x1af   : > { %v1435_v49 = vadd.f32 %v1434_v7, %v6672_v45  ;;  %v1523_v52 = vpop.f32.mrf.mxu1  ;;  %5116 = vtanh.f32 %v1431_v26 }
 0x1b0   : > { %v5095_v22 = vpop.eup %5094  ;;  %v1436_v30 = vpop.f32.mrf.mxu0  ;;  %v1524_v54 = vadd.f32 %v1523_v52, %v6672_v45 }
 0x1b1   : > { %v5097_v51 = vpop.eup %5096  ;;  %v1437_v35 = vadd.f32 %v1436_v30, %v6672_v45  ;;  %v1525_v40 = vpop.f32.mrf.mxu1  ;;  %2208 = vmatprep.subr.mxu0 %v5095_v22  ;;  %5118 = vtanh.f32 %v1435_v49  ;;  %v6769_v49 = vld [vmem:[#allocation3 + $0x38] sm:$0xff] }
 0x1b2   : > { %v5099_v58 = vpop.eup %5098  ;;  %v1526_v4 = vadd.f32 %v1525_v40, %v6672_v45  ;;  %2297 = vmatprep.subr.mxu1 %v5097_v51  ;;  %2209 = vmatpush1.msra.mxu0 %v5093_v19  ;;  %v1594_v5 = vpop.f32.mrf.mxu0 }
 0x1b3   : > { %v5101_v13 = vpop.eup %5100  ;;  %5120 = vtanh.f32 %v1437_v35  ;;  %2298 = vmatpush1.msra.mxu1 %v5099_v58  ;;  %2210 = vmatprep.subr.mxu0 %v5091_v28  ;;  %v6716_v18 = vpop.f32.mrf.mxu1  ;;  %v1595_v10 = vadd.f32 %v1594_v5, %v6676_v37 }
 0x1b4   : > { %v5103_v3 = vpop.eup %5102  ;;  %5122 = vtanh.f32 %v1526_v4  ;;  %2299 = vmatprep.subr.mxu1 %v5101_v13  ;;  %2211 = vmatpush1.msra.mxu0 %v5089_v38  ;;  %v1596_v8 = vpop.f32.mrf.mxu0 }
 0x1b5   : > { %v5105_v20 = vpop.eup %5104  ;;  %5124 = vtanh.f32 %v1524_v54  ;;  %2300 = vmatpush1.msra.mxu1 %v5103_v3  ;;  %2212 = vmatprep.subr.mxu0 %v5087_v32  ;;  %v6720_v23 = vpop.f32.mrf.mxu1 }
 0x1b6   : > { %v5107_v44 = vpop.eup %5106  ;;  %5126 = vtanh.f32 %v1520_v59  ;;  %2301 = vmatprep.subr.mxu1 %v5105_v20  ;;  %2213 = vmatpush1.msra.mxu0 %v5085_v14 }
 0x1b7   : > { %v5109_v53 = vpop.eup %5108  ;;  %5128 = vtanh.f32 %v1429_v57  ;;  %2302 = vmatpush1.msra.mxu1 %v5107_v44  ;;  %2214 = vmatprep.subr.mxu0 %v5083_v29  ;;  %v1600_v50 = vpop.f32.mrf.mxu0 }
 0x1b8   : > { %v5111_v42 = vpop.eup %5110  ;;  %5130 = vtanh.f32 %v1518_v34  ;;  %2303 = vmatprep.subr.mxu1 %v5109_v53  ;;  %2215 = vmatpush1.msra.mxu0 %v6704_v9  ;;  %v6731_v17 = vpop.f32.mrf.mxu1  ;;  %v1597_v9 = vadd.f32 %v1596_v8, %v6676_v37  ;;  %v1601_v27 = vadd.f32 %v1600_v50, %v6674_v55  ;;  %v1684_v53 = vadd.f32 %v6716_v18, %v6676_v37 }
 0x1b9   : > { %5132 = vtanh.f32 %v1425_v36  ;;  %2304 = vmatpush1.msra.mxu1 %v5111_v42  ;;  %4769 = vmatmul.mubr.msk.f32.vlgmr.msra.gmra.mxu0 %vm1159_vm0, %v6722_v25  ;;  %v6737_v16 = vpop.f32.mrf.mxu0  ;;  %v6747_v46 = vpop.eup %5112  ;;  %v1690_v8 = vadd.f32 %v6731_v17, %v6674_v55 }
 0x1ba   : > { %5134 = vtanh.f32 %v1514_v60  ;;  %4773 = vmatmul.mubr.msk.f32.vlgmr.msra.gmra.mxu1 %vm1159_vm0, %v6722_v25  ;;  %2254 = vmatprep.mubr.f32.mxu0 %v7630_v21  ;;  %v6744_v6 = vpop.f32.mrf.mxu1  ;;  %v6749_v41 = vpop.eup %5114  ;;  %v1603_v57 = vadd.f32 %v6737_v16, %v6674_v55  ;;  %v1686_v60 = vadd.f32 %v6720_v23, %v6676_v37 }
 0x1bb   : > { %5136 = vtanh.f32 %v1512_v1  ;;  %2343 = vmatprep.mubr.f32.mxu1 %v7630_v21  ;;  %v1692_v34 = vadd.f32 %v6744_v6, %v6674_v55 }
 0x1bc   : > { %5138 = vtanh.f32 %v1508_v43  ;;  %v1606_v31 = vpop.f32.mrf.mxu0  ;;  %v5117_v33 = vpop.eup %5116 }
 0x1bd   : > { %5140 = vtanh.f32 %v1417_v48  ;;  %4770 = vmatmul.mubr.msk.f32.gmra.mxu0 %vm1159_vm0, %v6742_v47  ;;  %v1695_v62 = vpop.f32.mrf.mxu1  ;;  %v1607_v40 = vadd.f32 %v1606_v31, %v6681_v39 }
 0x1be   : > { %5142 = vtanh.f32 %v1506_v15  ;;  %4774 = vmatmul.mubr.msk.f32.gmra.mxu1 %vm1159_vm0, %v6742_v47  ;;  %2260 = vmatprep.mubr.f32.mxu0 %v7630_v21  ;;  %v5119_v63 = vpop.eup %5118  ;;  %v1608_v24 = vpop.f32.mrf.mxu0  ;;  %v1696_v59 = vadd.f32 %v1695_v62, %v6681_v39 }
 0x1bf   : > { %2349 = vmatprep.mubr.f32.mxu1 %v7630_v21  ;;  %v1697_v14 = vpop.f32.mrf.mxu1  ;;  %v1609_v2 = vadd.f32 %v1608_v24, %v6681_v39  ;;  %5144 = vtanh.f32 %v1595_v10 }
 0x1c0   : > { %v5121_v29 = vpop.eup %5120  ;;  %v1612_v32 = vpop.f32.mrf.mxu0  ;;  %5146 = vtanh.f32 %v1597_v9  ;;  %v1698_v54 = vadd.f32 %v1697_v14, %v6681_v39 }
 0x1c1   : > { %v5123_v61 = vpop.eup %5122  ;;  %4771 = vmatmul.mubr.msk.f32.gmra.mxu0 %vm1159_vm0, %v6757_v11  ;;  %2386 = vmatprep.subr.mxu0 %v5121_v29  ;;  %v1701_v56 = vpop.f32.mrf.mxu1  ;;  %5148 = vtanh.f32 %v1601_v27  ;;  %v1613_v28 = vadd.f32 %v1612_v32, %v6672_v45 }
 0x1c2   : > { %v5125_v0 = vpop.eup %5124  ;;  %4775 = vmatmul.mubr.msk.f32.gmra.mxu1 %vm1159_vm0, %v6757_v11  ;;  %2475 = vmatprep.subr.mxu1 %v5123_v61  ;;  %v1614_v26 = vpop.f32.mrf.mxu0  ;;  %5150 = vtanh.f32 %v1609_v2  ;;  %v1702_v22 = vadd.f32 %v1701_v56, %v6672_v45 }
 0x1c3   : > { %v5127_v38 = vpop.eup %5126  ;;  %2387 = vmatpush1.msra.mxu0 %v5119_v63  ;;  %2476 = vmatpush1.msra.mxu1 %v5125_v0  ;;  %v1615_v7 = vadd.f32 %v1614_v26, %v6672_v45  ;;  %v1703_v19 = vpop.f32.mrf.mxu1 }
 0x1c4   : > { %v5129_v12 = vpop.eup %5128  ;;  %2388 = vmatprep.subr.mxu0 %v5117_v33  ;;  %2477 = vmatprep.subr.mxu1 %v5127_v38  ;;  %v1704_v30 = vadd.f32 %v1703_v19, %v6672_v45 }
 0x1c5   : > { %v5131_v52 = vpop.eup %5130  ;;  %2266 = vmatprep.mubr.f32.mxu0 %v7630_v21  ;;  %2355 = vmatprep.mubr.f32.mxu1 %v7630_v21  ;;  %5152 = vtanh.f32 %v1615_v7 }
 0x1c6   : > { %v5133_v51 = vpop.eup %5132  ;;  %2389 = vmatpush1.msra.mxu0 %v5129_v12  ;;  %2478 = vmatpush1.msra.mxu1 %v5131_v52  ;;  %5154 = vtanh.f32 %v1704_v30 }
 0x1c7   : > { %v5135_v35 = vpop.eup %5134  ;;  %4772 = vmatmul.mubr.msk.f32.gmra.mxu0 %vm1159_vm0, %v6769_v49  ;;  %4776 = vmatmul.mubr.msk.f32.gmra.mxu1 %vm1159_vm0, %v6769_v49  ;;  %5156 = vtanh.f32 %v1613_v28  ;;  %v1772_v4 = vpop.f32.mrf.mxu0 }
 0x1c8   : > { %v5137_v58 = vpop.eup %5136  ;;  %2390 = vmatprep.subr.mxu0 %v5133_v51  ;;  %2479 = vmatprep.subr.mxu1 %v5135_v35  ;;  %5158 = vtanh.f32 %v1702_v22  ;;  %v6784_v5 = vpop.f32.mrf.mxu1  ;;  %v1773_v15 = vadd.f32 %v1772_v4, %v6676_v37 }
 0x1c9   : > { %v5139_v13 = vpop.eup %5138  ;;  %2391 = vmatpush1.msra.mxu0 %v6749_v41  ;;  %2480 = vmatpush1.msra.mxu1 %v5137_v58  ;;  %5160 = vtanh.f32 %v1698_v54  ;;  %v1774_v20 = vpop.f32.mrf.mxu0 }
 0x1ca   : > { %v5141_v3 = vpop.eup %5140  ;;  %2392 = vmatprep.subr.mxu0 %v6747_v46  ;;  %2481 = vmatprep.subr.mxu1 %v5139_v13  ;;  %5162 = vtanh.f32 %v1607_v40  ;;  %v6792_v44 = vpop.f32.mrf.mxu1  ;;  %v1775_v46 = vadd.f32 %v1774_v20, %v6676_v37  ;;  %v1862_v20 = vadd.f32 %v6784_v5, %v6676_v37 }
 0x1cb   : > { %v5143_v36 = vpop.eup %5142  ;;  %2393 = vmatpush1.msra.mxu0 %v5141_v3  ;;  %2426 = vmatprep.mubr.f32.mxu0 %v7630_v21  ;;  %5164 = vtanh.f32 %v1696_v59  ;;  %v1864_v3 = vadd.f32 %v6792_v44, %v6676_v37 }
 0x1cc   : > { %2482 = vmatpush1.msra.mxu1 %v5143_v36  ;;  %2515 = vmatprep.mubr.f32.mxu1 %v7630_v21  ;;  %5166 = vtanh.f32 %v1603_v57  ;;  %v1778_v1 = vpop.f32.mrf.mxu0  ;;  %v6808_v23 = vpop.eup %5144 }
 0x1cd   : > { %4777 = vmatmul.mubr.msk.f32.vlgmr.msra.gmra.mxu0 %vm1159_vm0, %v6722_v25  ;;  %4781 = vmatmul.mubr.msk.f32.vlgmr.msra.gmra.mxu1 %vm1159_vm0, %v6722_v25  ;;  %5168 = vtanh.f32 %v1692_v34  ;;  %v6804_v42 = vpop.f32.mrf.mxu1  ;;  %v6812_v18 = vpop.eup %5146  ;;  %v1779_v33 = vadd.f32 %v1778_v1, %v6674_v55 }
 0x1ce   : > { %2432 = vmatprep.mubr.f32.mxu0 %v7630_v21  ;;  %2521 = vmatprep.mubr.f32.mxu1 %v7630_v21  ;;  %5170 = vtanh.f32 %v1690_v8  ;;  %v6810_v43 = vpop.f32.mrf.mxu0  ;;  %v5149_v48 = vpop.eup %5148  ;;  %v1868_v13 = vadd.f32 %v6804_v42, %v6674_v55 }
 0x1cf   : > { %5172 = vtanh.f32 %v1686_v60  ;;  %v6814_v50 = vpop.f32.mrf.mxu1  ;;  %v5151_v17 = vpop.eup %5150  ;;  %v1781_v35 = vadd.f32 %v6810_v43, %v6674_v55 }
 0x1d0   : > { %5174 = vtanh.f32 %v1684_v53  ;;  %v1870_v59 = vadd.f32 %v6814_v50, %v6674_v55 }
 0x1d1   : > { %4778 = vmatmul.mubr.msk.f32.gmra.mxu0 %vm1159_vm0, %v6742_v47  ;;  %4782 = vmatmul.mubr.msk.f32.gmra.mxu1 %vm1159_vm0, %v6742_v47  ;;  %v1784_v16 = vpop.f32.mrf.mxu0  ;;  %5176 = vtanh.f32 %v1773_v15 }
 0x1d2   : > { %2438 = vmatprep.mubr.f32.mxu0 %v7630_v21  ;;  %2527 = vmatprep.mubr.f32.mxu1 %v7630_v21  ;;  %v5153_v6 = vpop.eup %5152  ;;  %v1873_v41 = vpop.f32.mrf.mxu1  ;;  %v1785_v63 = vadd.f32 %v1784_v16, %v6681_v39  ;;  %5178 = vtanh.f32 %v1775_v46 }
 0x1d3   : > { %v5155_v31 = vpop.eup %5154  ;;  %v1786_v10 = vpop.f32.mrf.mxu0  ;;  %2564 = vmatprep.subr.mxu0 %v5153_v6  ;;  %5180 = vtanh.f32 %v1779_v33  ;;  %v1874_v30 = vadd.f32 %v1873_v41, %v6681_v39 }
 0x1d4   : > { %v5157_v62 = vpop.eup %5156  ;;  %v1875_v9 = vpop.f32.mrf.mxu1  ;;  %v1787_v29 = vadd.f32 %v1786_v10, %v6681_v39  ;;  %2653 = vmatprep.subr.mxu1 %v5155_v31  ;;  %5182 = vtanh.f32 %v1785_v63 }
 0x1d5   : > { %4779 = vmatmul.mubr.msk.f32.gmra.mxu0 %vm1159_vm0, %v6757_v11  ;;  %4783 = vmatmul.mubr.msk.f32.gmra.mxu1 %vm1159_vm0, %v6757_v11  ;;  %v5159_v24 = vpop.eup %5158  ;;  %v1876_v19 = vadd.f32 %v1875_v9, %v6681_v39 }
 0x1d6   : > { %2565 = vmatpush1.msra.mxu0 %v5157_v62  ;;  %v5161_v27 = vpop.eup %5160  ;;  %v1790_v14 = vpop.f32.mrf.mxu0  ;;  %2654 = vmatpush1.msra.mxu1 %v5159_v24  ;;  %5184 = vtanh.f32 %v1787_v29 }
 0x1d7   : > { %2566 = vmatprep.subr.mxu0 %v5151_v17  ;;  %v5163_v61 = vpop.eup %5162  ;;  %v1791_v2 = vadd.f32 %v1790_v14, %v6672_v45  ;;  %v1879_v32 = vpop.f32.mrf.mxu1  ;;  %2655 = vmatprep.subr.mxu1 %v5161_v27 }
 0x1d8   : > { %2444 = vmatprep.mubr.f32.mxu0 %v7630_v21  ;;  %v5165_v0 = vpop.eup %5164  ;;  %v1792_v56 = vpop.f32.mrf.mxu0  ;;  %2533 = vmatprep.mubr.f32.mxu1 %v7630_v21  ;;  %v1880_v26 = vadd.f32 %v1879_v32, %v6672_v45 }
 0x1d9   : > { %2567 = vmatpush1.msra.mxu0 %v5163_v61  ;;  %v5167_v38 = vpop.eup %5166  ;;  %v1793_v12 = vadd.f32 %v1792_v56, %v6672_v45  ;;  %v1881_v28 = vpop.f32.mrf.mxu1  ;;  %2656 = vmatpush1.msra.mxu1 %v5165_v0  ;;  %5186 = vtanh.f32 %v1791_v2 }
 0x1da   : > { %4780 = vmatmul.mubr.msk.f32.gmra.mxu0 %vm1159_vm0, %v6769_v49  ;;  %v5169_v7 = vpop.eup %5168  ;;  %v1882_v52 = vadd.f32 %v1881_v28, %v6672_v45  ;;  %4784 = vmatmul.mubr.msk.f32.gmra.mxu1 %vm1159_vm0, %v6769_v49 }
 0x1db   : > { %2568 = vmatprep.subr.mxu0 %v5167_v38  ;;  %v5171_v22 = vpop.eup %5170  ;;  %5188 = vtanh.f32 %v1793_v12  ;;  %v1950_v51 = vpop.f32.mrf.mxu0  ;;  %2657 = vmatprep.subr.mxu1 %v5169_v7 }
 0x1dc   : > { %2569 = vmatpush1.msra.mxu0 %v5149_v48  ;;  %v5173_v54 = vpop.eup %5172  ;;  %5190 = vtanh.f32 %v1882_v52  ;;  %v6845_v40 = vpop.f32.mrf.mxu1  ;;  %2658 = vmatpush1.msra.mxu1 %v5171_v22  ;;  %v1951_v42 = vadd.f32 %v1950_v51, %v6676_v37 }
 0x1dd   : > { %2570 = vmatprep.subr.mxu0 %v6812_v18  ;;  %v5175_v58 = vpop.eup %5174  ;;  %5192 = vtanh.f32 %v1880_v26  ;;  %v1952_v4 = vpop.f32.mrf.mxu0  ;;  %2659 = vmatprep.subr.mxu1 %v5173_v54  ;;  %v2040_v52 = vadd.f32 %v6845_v40, %v6676_v37 }
 0x1de   : > { %2571 = vmatpush1.msra.mxu0 %v6808_v23  ;;  %5194 = vtanh.f32 %v1876_v19  ;;  %v6853_v57 = vpop.f32.mrf.mxu1  ;;  %2604 = vmatprep.mubr.f32.mxu0 %v7630_v21  ;;  %v6871_v44 = vpop.eup %5176  ;;  %v1953_v18 = vadd.f32 %v1952_v4, %v6676_v37 }
 0x1df   : > { %2660 = vmatpush1.msra.mxu1 %v5175_v58  ;;  %5196 = vtanh.f32 %v1874_v30  ;;  %v1956_v34 = vpop.f32.mrf.mxu0  ;;  %2693 = vmatprep.mubr.f32.mxu1 %v7630_v21  ;;  %v6875_v53 = vpop.eup %5178  ;;  %v2042_v19 = vadd.f32 %v6853_v57, %v6676_v37 }
 0x1e0   : > { %4785 = vmatmul.mubr.msk.f32.vlgmr.msra.gmra.mxu0 %vm1159_vm0, %v6722_v25  ;;  %5198 = vtanh.f32 %v1781_v35  ;;  %v6863_v36 = vpop.f32.mrf.mxu1  ;;  %4789 = vmatmul.mubr.msk.f32.vlgmr.msra.gmra.mxu1 %vm1159_vm0, %v6722_v25  ;;  %v5181_v1 = vpop.eup %5180  ;;  %v1957_v17 = vadd.f32 %v1956_v34, %v6674_v55 }
 0x1e1   : > { %2610 = vmatprep.mubr.f32.mxu0 %v7630_v21  ;;  %5200 = vtanh.f32 %v1870_v59  ;;  %v6868_v8 = vpop.f32.mrf.mxu0  ;;  %2699 = vmatprep.mubr.f32.mxu1 %v7630_v21  ;;  %v5183_v43 = vpop.eup %5182  ;;  %v2046_v7 = vadd.f32 %v6863_v36, %v6674_v55 }
 0x1e2   : > { %5202 = vtanh.f32 %v1868_v13  ;;  %v6873_v60 = vpop.f32.mrf.mxu1  ;;  %v1959_v26 = vadd.f32 %v6868_v8, %v6674_v55 }
 0x1e3   : > { %5204 = vtanh.f32 %v1864_v3  ;;  %v1962_v5 = vpop.f32.mrf.mxu0  ;;  %v5185_v48 = vpop.eup %5184  ;;  %v2048_v28 = vadd.f32 %v6873_v60, %v6674_v55 }
 0x1e4   : > { %4786 = vmatmul.mubr.msk.f32.gmra.mxu0 %vm1159_vm0, %v6742_v47  ;;  %5206 = vtanh.f32 %v1862_v20  ;;  %v2051_v23 = vpop.f32.mrf.mxu1  ;;  %4790 = vmatmul.mubr.msk.f32.gmra.mxu1 %vm1159_vm0, %v6742_v47  ;;  %v1963_v0 = vadd.f32 %v1962_v5, %v6681_v39 }
 0x1e5   : > { %2616 = vmatprep.mubr.f32.mxu0 %v7630_v21  ;;  %v1964_v50 = vpop.f32.mrf.mxu0  ;;  %2705 = vmatprep.mubr.f32.mxu1 %v7630_v21  ;;  %5208 = vtanh.f32 %v1951_v42  ;;  %v2052_v38 = vadd.f32 %v2051_v23, %v6681_v39 }
 0x1e6   : > { %v2053_v15 = vpop.f32.mrf.mxu1  ;;  %v5187_v16 = vpop.eup %5186  ;;  %v1965_v6 = vadd.f32 %v1964_v50, %v6681_v39  ;;  %5210 = vtanh.f32 %v1953_v18 }
 0x1e7   : > { %v1968_v46 = vpop.f32.mrf.mxu0  ;;  %5212 = vtanh.f32 %v1957_v17  ;;  %v2054_v2 = vadd.f32 %v2053_v15, %v6681_v39 }
 0x1e8   : > { %4787 = vmatmul.mubr.msk.f32.gmra.mxu0 %vm1159_vm0, %v6757_v11  ;;  %v5189_v41 = vpop.eup %5188  ;;  %v2057_v31 = vpop.f32.mrf.mxu1  ;;  %4791 = vmatmul.mubr.msk.f32.gmra.mxu1 %vm1159_vm0, %v6757_v11  ;;  %v1969_v63 = vadd.f32 %v1968_v46, %v6672_v45  ;;  %5214 = vtanh.f32 %v1965_v6 }
 0x1e9   : > { %2622 = vmatprep.mubr.f32.mxu0 %v7630_v21  ;;  %v5191_v33 = vpop.eup %5190  ;;  %v1970_v10 = vpop.f32.mrf.mxu0  ;;  %2742 = vmatprep.subr.mxu0 %v5189_v41  ;;  %v2058_v27 = vadd.f32 %v2057_v31, %v6672_v45 }
 0x1ea   : > { %2711 = vmatprep.mubr.f32.mxu1 %v7630_v21  ;;  %v5193_v62 = vpop.eup %5192  ;;  %v1971_v9 = vadd.f32 %v1970_v10, %v6672_v45  ;;  %v2059_v24 = vpop.f32.mrf.mxu1  ;;  %2831 = vmatprep.subr.mxu1 %v5191_v33 }
 0x1eb   : > { %2743 = vmatpush1.msra.mxu0 %v5187_v16  ;;  %v5195_v29 = vpop.eup %5194  ;;  %v2060_v14 = vadd.f32 %v2059_v24, %v6672_v45  ;;  %2832 = vmatpush1.msra.mxu1 %v5193_v62 }
 0x1ec   : > { %2744 = vmatprep.subr.mxu0 %v5185_v48  ;;  %v5197_v61 = vpop.eup %5196  ;;  %5216 = vtanh.f32 %v1971_v9  ;;  %2833 = vmatprep.subr.mxu1 %v5195_v29 }
 0x1ed   : > { %2745 = vmatpush1.msra.mxu0 %v5183_v43  ;;  %v5199_v32 = vpop.eup %5198  ;;  %5218 = vtanh.f32 %v2060_v14  ;;  %2834 = vmatpush1.msra.mxu1 %v5197_v61 }
 0x1ee   : > { %4788 = vmatmul.mubr.msk.f32.gmra.mxu0 %vm1159_vm0, %v6769_v49  ;;  %v5201_v56 = vpop.eup %5200  ;;  %5220 = vtanh.f32 %v1969_v63  ;;  %4792 = vmatmul.mubr.msk.f32.gmra.mxu1 %vm1159_vm0, %v6769_v49 }
 0x1ef   : > { %2746 = vmatprep.subr.mxu0 %v5199_v32  ;;  %v5203_v45 = vpop.eup %5202  ;;  %5222 = vtanh.f32 %v2058_v27  ;;  %2835 = vmatprep.subr.mxu1 %v5201_v56 }
 0x1f0   : > { %2747 = vmatpush1.msra.mxu0 %v5181_v1  ;;  %v5205_v12 = vpop.eup %5204  ;;  %5224 = vtanh.f32 %v2054_v2  ;;  %2836 = vmatpush1.msra.mxu1 %v5203_v45 }
 0x1f1   : > { %2748 = vmatprep.subr.mxu0 %v6875_v53  ;;  %v5207_v39 = vpop.eup %5206  ;;  %5226 = vtanh.f32 %v1963_v0  ;;  %2837 = vmatprep.subr.mxu1 %v5205_v12 }
 0x1f2   : > { %2749 = vmatpush1.msra.mxu0 %v6871_v44  ;;  %5228 = vtanh.f32 %v2052_v38  ;;  %2782 = vmatprep.mubr.f32.mxu0 %v7630_v21  ;;  %v5209_v55 = vpop.eup %5208 }
 0x1f3   : > { %2838 = vmatpush1.msra.mxu1 %v5207_v39  ;;  %5230 = vtanh.f32 %v1959_v26  ;;  %2871 = vmatprep.mubr.f32.mxu1 %v7630_v21  ;;  %v5211_v22 = vpop.eup %5210 }
 0x1f4   : > { %4793 = vmatmul.mubr.msk.f32.vlgmr.msra.gmra.mxu0 %vm1159_vm0, %v6722_v25  ;;  %5232 = vtanh.f32 %v2048_v28  ;;  %4797 = vmatmul.mubr.msk.f32.vlgmr.msra.gmra.mxu1 %vm1159_vm0, %v6722_v25  ;;  %v5213_v30 = vpop.eup %5212 }
 0x1f5   : > { %2788 = vmatprep.mubr.f32.mxu0 %v7630_v21  ;;  %5234 = vtanh.f32 %v2046_v7  ;;  %2877 = vmatprep.mubr.f32.mxu1 %v7630_v21  ;;  %v5215_v37 = vpop.eup %5214 }
 0x1f6   : > { %5236 = vtanh.f32 %v2042_v19 }
 0x1f7   : > { %5238 = vtanh.f32 %v2040_v52 }
 0x1f8   : > { %4794 = vmatmul.mubr.msk.f32.gmra.mxu0 %vm1159_vm0, %v6742_v47  ;;  %4798 = vmatmul.mubr.msk.f32.gmra.mxu1 %vm1159_vm0, %v6742_v47 }
 0x1f9   : > { %2794 = vmatprep.mubr.f32.mxu0 %v7630_v21  ;;  %v5217_v51 = vpop.eup %5216  ;;  %2883 = vmatprep.mubr.f32.mxu1 %v7630_v21 }
 0x1fa   : > { %v5219_v54 = vpop.eup %5218  ;;  %2920 = vmatprep.subr.mxu0 %v5217_v51 }
 0x1fb   : > { %v5221_v35 = vpop.eup %5220  ;;  %3009 = vmatprep.subr.mxu1 %v5219_v54 }
 0x1fc   : > { %4795 = vmatmul.mubr.msk.f32.gmra.mxu0 %vm1159_vm0, %v6757_v11  ;;  %v5223_v40 = vpop.eup %5222  ;;  %4799 = vmatmul.mubr.msk.f32.gmra.mxu1 %vm1159_vm0, %v6757_v11 }
 0x1fd   : > { %2921 = vmatpush1.msra.mxu0 %v5221_v35  ;;  %v5225_v58 = vpop.eup %5224  ;;  %3010 = vmatpush1.msra.mxu1 %v5223_v40 }
 0x1fe   : > { %2922 = vmatprep.subr.mxu0 %v5215_v37  ;;  %v5227_v59 = vpop.eup %5226  ;;  %3011 = vmatprep.subr.mxu1 %v5225_v58 }
 0x1ff   : > { %2800 = vmatprep.mubr.f32.mxu0 %v7630_v21  ;;  %v5229_v4 = vpop.eup %5228  ;;  %2889 = vmatprep.mubr.f32.mxu1 %v7630_v21 }
 0x200   : > { %2923 = vmatpush1.msra.mxu0 %v5227_v59  ;;  %v5231_v13 = vpop.eup %5230  ;;  %3012 = vmatpush1.msra.mxu1 %v5229_v4 }
 0x201   : > { %4796 = vmatmul.mubr.msk.f32.gmra.mxu0 %vm1159_vm0, %v6769_v49  ;;  %v5233_v57 = vpop.eup %5232  ;;  %4800 = vmatmul.mubr.msk.f32.gmra.mxu1 %vm1159_vm0, %v6769_v49 }
 0x202   : > { %2924 = vmatprep.subr.mxu0 %v5231_v13  ;;  %v5235_v3 = vpop.eup %5234  ;;  %3013 = vmatprep.subr.mxu1 %v5233_v57 }
 0x203   : > { %2925 = vmatpush1.msra.mxu0 %v5213_v30  ;;  %v5237_v34 = vpop.eup %5236  ;;  %3014 = vmatpush1.msra.mxu1 %v5235_v3 }
 0x204   : > { %2926 = vmatprep.subr.mxu0 %v5211_v22  ;;  %v5239_v20 = vpop.eup %5238  ;;  %3015 = vmatprep.subr.mxu1 %v5237_v34 }
 0x205   : > { %2927 = vmatpush1.msra.mxu0 %v5209_v55  ;;  %2960 = vmatprep.mubr.f32.mxu0 %v7630_v21 }
 0x206   : > { %3016 = vmatpush1.msra.mxu1 %v5239_v20  ;;  %3049 = vmatprep.mubr.f32.mxu1 %v7630_v21 }
 0x207   : > { %4801 = vmatmul.mubr.msk.f32.vlgmr.msra.gmra.mxu0 %vm1159_vm0, %v6722_v25  ;;  %4805 = vmatmul.mubr.msk.f32.vlgmr.msra.gmra.mxu1 %vm1159_vm0, %v6722_v25 }
 0x208   : > { %2966 = vmatprep.mubr.f32.mxu0 %v7630_v21  ;;  %3055 = vmatprep.mubr.f32.mxu1 %v7630_v21 }
 0x20b   : > { %4802 = vmatmul.mubr.msk.f32.gmra.mxu0 %vm1159_vm0, %v6742_v47  ;;  %4806 = vmatmul.mubr.msk.f32.gmra.mxu1 %vm1159_vm0, %v6742_v47  ;;  %v6966_v47 = vpop.permute.xlu1 %2164 }
 0x20c   : > { %2972 = vmatprep.mubr.f32.mxu0 %v7630_v21  ;;  %3061 = vmatprep.mubr.f32.mxu1 %v7630_v21 }
 0x20f   : > { %4803 = vmatmul.mubr.msk.f32.gmra.mxu0 %vm1159_vm0, %v6757_v11  ;;  %4807 = vmatmul.mubr.msk.f32.gmra.mxu1 %vm1159_vm0, %v6757_v11  ;;  %v6968_v11 = vpop.permute.xlu0 %2169  ;;  %v6970_v1 = vpop.permute.xlu1 %2154 }
 0x210   : > { %2978 = vmatprep.mubr.f32.mxu0 %v7630_v21  ;;  %3067 = vmatprep.mubr.f32.mxu1 %v7630_v21 }
 0x213   : > { %4804 = vmatmul.mubr.msk.f32.gmra.mxu0 %vm1159_vm0, %v6769_v49  ;;  %4808 = vmatmul.mubr.msk.f32.gmra.mxu1 %vm1159_vm0, %v6769_v49  ;;  %v6973_v43 = vpop.permute.xlu0 %2159 }
 0x214   : > { %3260 = vmatprep.mubr.f32.mxu0 %v7630_v21  ;;  %3349 = vmatprep.mubr.f32.mxu1 %v7630_v21 }
 0x279   : > { %v2250_v25 = vpop.f32.mrf.mxu0 }
 0x27a   : > { %v2339_v36 = vpop.f32.mrf.mxu1  ;;  %v2251_v49 = vadd.f32 %v2250_v25, %v6970_v1 }
 0x27b   : > { %v2252_v8 = vpop.f32.mrf.mxu0  ;;  %v2340_v45 = vadd.f32 %v2339_v36, %v6970_v1 }
 0x27c   : > { %v2341_v44 = vpop.f32.mrf.mxu1  ;;  %v2253_v18 = vadd.f32 %v2252_v8, %v6970_v1  ;;  %5240 = vtanh.f32 %v2251_v49 }
 0x27d   : > { %v2256_v60 = vpop.f32.mrf.mxu0  ;;  %v2342_v0 = vadd.f32 %v2341_v44, %v6970_v1 }
 0x27e   : > { %v2345_v53 = vpop.f32.mrf.mxu1  ;;  %v2257_v48 = vadd.f32 %v2256_v60, %v6973_v43  ;;  %5242 = vtanh.f32 %v2253_v18 }
 0x27f   : > { %v2258_v5 = vpop.f32.mrf.mxu0  ;;  %v2346_v32 = vadd.f32 %v2345_v53, %v6973_v43 }
 0x280   : > { %v2347_v42 = vpop.f32.mrf.mxu1  ;;  %v2259_v15 = vadd.f32 %v2258_v5, %v6973_v43  ;;  %5244 = vtanh.f32 %v2257_v48 }
 0x281   : > { %v2262_v23 = vpop.f32.mrf.mxu0  ;;  %v2348_v14 = vadd.f32 %v2347_v42, %v6973_v43 }
 0x282   : > { %v2351_v50 = vpop.f32.mrf.mxu1  ;;  %v2263_v6 = vadd.f32 %v2262_v23, %v6966_v47  ;;  %5246 = vtanh.f32 %v2259_v15  ;;  %v7009_v15 = vld [vmem:[#allocation3 + $0x40] sm:$0xff] }
 0x283   : > { %v2264_v17 = vpop.f32.mrf.mxu0  ;;  %v2352_v27 = vadd.f32 %v2351_v50, %v6966_v47 }
 0x284   : > { %v2353_v16 = vpop.f32.mrf.mxu1  ;;  %v2265_v46 = vadd.f32 %v2264_v17, %v6966_v47  ;;  %5248 = vtanh.f32 %v2263_v6 }
 0x285   : > { %v2354_v29 = vadd.f32 %v2353_v16, %v6966_v47 }
 0x286   : > { %5250 = vtanh.f32 %v2265_v46 }
 0x287   : > { %v2268_v41 = vpop.f32.mrf.mxu0  ;;  %v2357_v31 = vpop.f32.mrf.mxu1 }
 0x288   : > { %v2269_v33 = vadd.f32 %v2268_v41, %v6968_v11  ;;  %v2358_v63 = vadd.f32 %v2357_v31, %v6968_v11 }
 0x289   : > { %v2270_v10 = vpop.f32.mrf.mxu0  ;;  %v2359_v62 = vpop.f32.mrf.mxu1 }
 0x28a   : > { %v2271_v9 = vadd.f32 %v2270_v10, %v6968_v11  ;;  %v2360_v24 = vadd.f32 %v2359_v62, %v6968_v11  ;;  %5252 = vtanh.f32 %v2269_v33  ;;  %v6996_v28 = vpop.eup %5240 }
 0x28b   : > { %v5243_v39 = vpop.eup %5242 }
 0x28c   : > { %5254 = vtanh.f32 %v2271_v9 }
 0x28d   : > { %5256 = vtanh.f32 %v2360_v24  ;;  %v2428_v61 = vpop.f32.mrf.mxu0  ;;  %v6987_v2 = vpop.f32.mrf.mxu1  ;;  %v7027_v24 = vld [vmem:[#allocation3 + $0x48] sm:$0xff] }
 0x28e   : > { %5258 = vtanh.f32 %v2358_v63  ;;  %v5245_v52 = vpop.eup %5244  ;;  %v2429_v22 = vadd.f32 %v2428_v61, %v6970_v1 }
 0x28f   : > { %5260 = vtanh.f32 %v2354_v29  ;;  %v2430_v56 = vpop.f32.mrf.mxu0  ;;  %v6991_v38 = vpop.f32.mrf.mxu1  ;;  %v2518_v29 = vadd.f32 %v6987_v2, %v6970_v1  ;;  %v7047_v2 = vld [vmem:[#allocation3 + $0x50] sm:$0xff] }
 0x290   : > { %5262 = vtanh.f32 %v2352_v27  ;;  %v5247_v55 = vpop.eup %5246  ;;  %v2431_v54 = vadd.f32 %v2430_v56, %v6970_v1  ;;  %v2520_v63 = vadd.f32 %v6991_v38, %v6970_v1 }
 0x291   : > { %5264 = vtanh.f32 %v2348_v14  ;;  %v2434_v26 = vpop.f32.mrf.mxu0  ;;  %v6994_v12 = vpop.f32.mrf.mxu1 }
 0x292   : > { %5266 = vtanh.f32 %v2346_v32  ;;  %v5249_v51 = vpop.eup %5248  ;;  %v2435_v40 = vadd.f32 %v2434_v26, %v6973_v43  ;;  %v2524_v10 = vadd.f32 %v6994_v12, %v6973_v43 }
 0x293   : > { %5268 = vtanh.f32 %v2342_v0  ;;  %v2436_v7 = vpop.f32.mrf.mxu0  ;;  %v2525_v19 = vpop.f32.mrf.mxu1 }
 0x294   : > { %5270 = vtanh.f32 %v2340_v45  ;;  %v5251_v35 = vpop.eup %5250  ;;  %v2437_v6 = vadd.f32 %v2436_v7, %v6973_v43  ;;  %v2526_v31 = vadd.f32 %v2525_v19, %v6973_v43 }
 0x295   : > { %v2440_v30 = vpop.f32.mrf.mxu0  ;;  %v2529_v37 = vpop.f32.mrf.mxu1  ;;  %5272 = vtanh.f32 %v2429_v22 }
 0x296   : > { %v2441_v13 = vadd.f32 %v2440_v30, %v6966_v47  ;;  %5274 = vtanh.f32 %v2431_v54  ;;  %v2530_v17 = vadd.f32 %v2529_v37, %v6966_v47 }
 0x297   : > { %v2442_v58 = vpop.f32.mrf.mxu0  ;;  %v2531_v59 = vpop.f32.mrf.mxu1  ;;  %5276 = vtanh.f32 %v2435_v40 }
 0x298   : > { %v5253_v4 = vpop.eup %5252  ;;  %v2443_v3 = vadd.f32 %v2442_v58, %v6966_v47  ;;  %5278 = vtanh.f32 %v2441_v13  ;;  %v2532_v18 = vadd.f32 %v2531_v59, %v6966_v47  ;;  %v7061_v58 = vld [vmem:[#allocation3 + $0x58] sm:$0xff] }
 0x299   : > { %v5255_v57 = vpop.eup %5254 }
 0x29a   : > { %v5257_v34 = vpop.eup %5256  ;;  %v2446_v20 = vpop.f32.mrf.mxu0  ;;  %3220 = vmatprep.subr.mxu0 %v5255_v57  ;;  %5280 = vtanh.f32 %v2443_v3 }
 0x29b   : > { %v5259_v25 = vpop.eup %5258  ;;  %v2447_v36 = vadd.f32 %v2446_v20, %v6968_v11  ;;  %v2535_v8 = vpop.f32.mrf.mxu1  ;;  %3309 = vmatprep.subr.mxu1 %v5257_v34  ;;  %3221 = vmatpush1.msra.mxu0 %v5253_v4 }
 0x29c   : > { %v5261_v44 = vpop.eup %5260  ;;  %v2448_v60 = vpop.f32.mrf.mxu0  ;;  %3310 = vmatpush1.msra.mxu1 %v5259_v25  ;;  %3222 = vmatprep.subr.mxu0 %v5251_v35  ;;  %v2536_v5 = vadd.f32 %v2535_v8, %v6968_v11 }
 0x29d   : > { %v5263_v53 = vpop.eup %5262  ;;  %v2449_v42 = vadd.f32 %v2448_v60, %v6968_v11  ;;  %v2537_v49 = vpop.f32.mrf.mxu1  ;;  %3311 = vmatprep.subr.mxu1 %v5261_v44  ;;  %3223 = vmatpush1.msra.mxu0 %v5249_v51  ;;  %5282 = vtanh.f32 %v2447_v36 }
 0x29e   : > { %v5265_v23 = vpop.eup %5264  ;;  %v2538_v50 = vadd.f32 %v2537_v49, %v6968_v11  ;;  %3312 = vmatpush1.msra.mxu1 %v5263_v53  ;;  %3224 = vmatprep.subr.mxu0 %v5247_v55 }
 0x29f   : > { %v5267_v48 = vpop.eup %5266  ;;  %5284 = vtanh.f32 %v2449_v42  ;;  %3313 = vmatprep.subr.mxu1 %v5265_v23  ;;  %3225 = vmatpush1.msra.mxu0 %v5245_v52 }
 0x2a0   : > { %v5269_v16 = vpop.eup %5268  ;;  %5286 = vtanh.f32 %v2538_v50  ;;  %v2606_v46 = vpop.f32.mrf.mxu0  ;;  %3314 = vmatpush1.msra.mxu1 %v5267_v48  ;;  %3226 = vmatprep.subr.mxu0 %v5243_v39 }
 0x2a1   : > { %v5271_v41 = vpop.eup %5270  ;;  %5288 = vtanh.f32 %v2536_v5  ;;  %v7013_v33 = vpop.f32.mrf.mxu1  ;;  %3315 = vmatprep.subr.mxu1 %v5269_v16  ;;  %3227 = vmatpush1.msra.mxu0 %v6996_v28  ;;  %v2607_v12 = vadd.f32 %v2606_v46, %v6970_v1 }
 0x2a2   : > { %5290 = vtanh.f32 %v2532_v18  ;;  %v2608_v62 = vpop.f32.mrf.mxu0  ;;  %3316 = vmatpush1.msra.mxu1 %v5271_v41  ;;  %4813 = vmatmul.mubr.msk.f32.vlgmr.msra.gmra.mxu0 %vm1159_vm0, %v7009_v15  ;;  %v7034_v61 = vpop.eup %5272  ;;  %v2696_v41 = vadd.f32 %v7013_v33, %v6970_v1 }
 0x2a3   : > { %5292 = vtanh.f32 %v2530_v17  ;;  %v7022_v9 = vpop.f32.mrf.mxu1  ;;  %4817 = vmatmul.mubr.msk.f32.vlgmr.msra.gmra.mxu1 %vm1159_vm0, %v7009_v15  ;;  %3266 = vmatprep.mubr.f32.mxu0 %v7630_v21  ;;  %v7040_v0 = vpop.eup %5274  ;;  %v2609_v7 = vadd.f32 %v2608_v62, %v6970_v1 }
 0x2a4   : > { %5294 = vtanh.f32 %v2437_v6  ;;  %v2612_v27 = vpop.f32.mrf.mxu0  ;;  %3355 = vmatprep.mubr.f32.mxu1 %v7630_v21  ;;  %v5277_v38 = vpop.eup %5276  ;;  %v2698_v6 = vadd.f32 %v7022_v9, %v6970_v1 }
 0x2a5   : > { %5296 = vtanh.f32 %v2526_v31  ;;  %v7032_v14 = vpop.f32.mrf.mxu1  ;;  %v5279_v26 = vpop.eup %5278  ;;  %v2613_v55 = vadd.f32 %v2612_v27, %v6973_v43 }
 0x2a6   : > { %5298 = vtanh.f32 %v2524_v10  ;;  %v7036_v32 = vpop.f32.mrf.mxu0  ;;  %4814 = vmatmul.mubr.msk.f32.gmra.mxu0 %vm1159_vm0, %v7027_v24  ;;  %v2702_v17 = vadd.f32 %v7032_v14, %v6973_v43 }
 0x2a7   : > { %5300 = vtanh.f32 %v2520_v63  ;;  %v7042_v56 = vpop.f32.mrf.mxu1  ;;  %4818 = vmatmul.mubr.msk.f32.gmra.mxu1 %vm1159_vm0, %v7027_v24  ;;  %3272 = vmatprep.mubr.f32.mxu0 %v7630_v21  ;;  %v5281_v39 = vpop.eup %5280  ;;  %v2615_v49 = vadd.f32 %v7036_v32, %v6973_v43 }
 0x2a8   : > { %5302 = vtanh.f32 %v2518_v29  ;;  %v2618_v45 = vpop.f32.mrf.mxu0  ;;  %3361 = vmatprep.mubr.f32.mxu1 %v7630_v21  ;;  %v2704_v50 = vadd.f32 %v7042_v56, %v6973_v43 }
 0x2a9   : > { %v2707_v28 = vpop.f32.mrf.mxu1  ;;  %v2619_v37 = vadd.f32 %v2618_v45, %v6966_v47  ;;  %5304 = vtanh.f32 %v2607_v12 }
 0x2aa   : > { %v2620_v19 = vpop.f32.mrf.mxu0  ;;  %4815 = vmatmul.mubr.msk.f32.gmra.mxu0 %vm1159_vm0, %v7047_v2  ;;  %v5283_v52 = vpop.eup %5282  ;;  %5306 = vtanh.f32 %v2609_v7  ;;  %v2708_v5 = vadd.f32 %v2707_v28, %v6966_v47 }
 0x2ab   : > { %v2709_v22 = vpop.f32.mrf.mxu1  ;;  %4819 = vmatmul.mubr.msk.f32.gmra.mxu1 %vm1159_vm0, %v7047_v2  ;;  %3278 = vmatprep.mubr.f32.mxu0 %v7630_v21  ;;  %v2621_v54 = vadd.f32 %v2620_v19, %v6966_v47  ;;  %5308 = vtanh.f32 %v2613_v55 }
 0x2ac   : > { %v5285_v30 = vpop.eup %5284  ;;  %3367 = vmatprep.mubr.f32.mxu1 %v7630_v21  ;;  %5310 = vtanh.f32 %v2619_v37  ;;  %v2710_v44 = vadd.f32 %v2709_v22, %v6966_v47 }
 0x2ad   : > { %v5287_v51 = vpop.eup %5286  ;;  %3398 = vmatprep.subr.mxu0 %v5285_v30  ;;  %5312 = vtanh.f32 %v2621_v54 }
 0x2ae   : > { %v5289_v35 = vpop.eup %5288  ;;  %v2624_v40 = vpop.f32.mrf.mxu0  ;;  %3487 = vmatprep.subr.mxu1 %v5287_v51  ;;  %3399 = vmatpush1.msra.mxu0 %v5283_v52 }
 0x2af   : > { %v5291_v59 = vpop.eup %5290  ;;  %v2625_v4 = vadd.f32 %v2624_v40, %v6968_v11  ;;  %v2713_v13 = vpop.f32.mrf.mxu1  ;;  %3488 = vmatpush1.msra.mxu1 %v5289_v35  ;;  %3400 = vmatprep.subr.mxu0 %v5281_v39 }
 0x2b0   : > { %v5293_v57 = vpop.eup %5292  ;;  %v2626_v3 = vpop.f32.mrf.mxu0  ;;  %3489 = vmatprep.subr.mxu1 %v5291_v59  ;;  %3401 = vmatpush1.msra.mxu0 %v5279_v26  ;;  %v2714_v20 = vadd.f32 %v2713_v13, %v6968_v11 }
 0x2b1   : > { %v5295_v34 = vpop.eup %5294  ;;  %v2627_v25 = vadd.f32 %v2626_v3, %v6968_v11  ;;  %v2715_v36 = vpop.f32.mrf.mxu1  ;;  %3490 = vmatpush1.msra.mxu1 %v5293_v57  ;;  %4816 = vmatmul.mubr.msk.f32.gmra.mxu0 %vm1159_vm0, %v7061_v58  ;;  %5314 = vtanh.f32 %v2625_v4 }
 0x2b2   : > { %v5297_v8 = vpop.eup %5296  ;;  %v2716_v60 = vadd.f32 %v2715_v36, %v6968_v11  ;;  %4820 = vmatmul.mubr.msk.f32.gmra.mxu1 %vm1159_vm0, %v7061_v58  ;;  %3402 = vmatprep.subr.mxu0 %v5295_v34 }
 0x2b3   : > { %v5299_v53 = vpop.eup %5298  ;;  %5316 = vtanh.f32 %v2627_v25  ;;  %3491 = vmatprep.subr.mxu1 %v5297_v8  ;;  %3403 = vmatpush1.msra.mxu0 %v5277_v38 }
 0x2b4   : > { %v5301_v42 = vpop.eup %5300  ;;  %5318 = vtanh.f32 %v2716_v60  ;;  %v2784_v23 = vpop.f32.mrf.mxu0  ;;  %3492 = vmatpush1.msra.mxu1 %v5299_v53  ;;  %3404 = vmatprep.subr.mxu0 %v7040_v0 }
 0x2b5   : > { %v5303_v18 = vpop.eup %5302  ;;  %5320 = vtanh.f32 %v2714_v20  ;;  %v7078_v48 = vpop.f32.mrf.mxu1  ;;  %3493 = vmatprep.subr.mxu1 %v5301_v42  ;;  %3405 = vmatpush1.msra.mxu0 %v7034_v61  ;;  %v2785_v61 = vadd.f32 %v2784_v23, %v6970_v1 }
 0x2b6   : > { %5322 = vtanh.f32 %v2710_v44  ;;  %v2786_v16 = vpop.f32.mrf.mxu0  ;;  %3438 = vmatprep.mubr.f32.mxu0 %v7630_v21  ;;  %3494 = vmatpush1.msra.mxu1 %v5303_v18  ;;  %v7099_v62 = vpop.eup %5304 }
 0x2b7   : > { %5324 = vtanh.f32 %v2708_v5  ;;  %v7086_v46 = vpop.f32.mrf.mxu1  ;;  %3527 = vmatprep.mubr.f32.mxu1 %v7630_v21  ;;  %4821 = vmatmul.mubr.msk.f32.vlgmr.msra.gmra.mxu0 %vm1159_vm0, %v7009_v15  ;;  %v7103_v9 = vpop.eup %5306  ;;  %v2787_v56 = vadd.f32 %v2786_v16, %v6970_v1 }
 0x2b8   : > { %5326 = vtanh.f32 %v2615_v49  ;;  %v2790_v31 = vpop.f32.mrf.mxu0  ;;  %4825 = vmatmul.mubr.msk.f32.vlgmr.msra.gmra.mxu1 %vm1159_vm0, %v7009_v15  ;;  %3444 = vmatprep.mubr.f32.mxu0 %v7630_v21  ;;  %v5309_v29 = vpop.eup %5308  ;;  %v2876_v23 = vadd.f32 %v7086_v46, %v6970_v1 }
 0x2b9   : > { %5328 = vtanh.f32 %v2704_v50  ;;  %v7096_v10 = vpop.f32.mrf.mxu1  ;;  %3533 = vmatprep.mubr.f32.mxu1 %v7630_v21  ;;  %v5311_v14 = vpop.eup %5310  ;;  %v2791_v26 = vadd.f32 %v2790_v31, %v6973_v43  ;;  %v2874_v50 = vadd.f32 %v7078_v48, %v6970_v1 }
 0x2ba   : > { %5330 = vtanh.f32 %v2702_v17  ;;  %v7101_v63 = vpop.f32.mrf.mxu0  ;;  %v5313_v0 = vpop.eup %5312  ;;  %v2880_v42 = vadd.f32 %v7096_v10, %v6973_v43 }
 0x2bb   : > { %5332 = vtanh.f32 %v2698_v6  ;;  %v7105_v33 = vpop.f32.mrf.mxu1  ;;  %4822 = vmatmul.mubr.msk.f32.gmra.mxu0 %vm1159_vm0, %v7027_v24  ;;  %v2793_v8 = vadd.f32 %v7101_v63, %v6973_v43 }
 0x2bc   : > { %5334 = vtanh.f32 %v2696_v41  ;;  %v2796_v27 = vpop.f32.mrf.mxu0  ;;  %4826 = vmatmul.mubr.msk.f32.gmra.mxu1 %vm1159_vm0, %v7027_v24  ;;  %3450 = vmatprep.mubr.f32.mxu0 %v7630_v21  ;;  %v2882_v53 = vadd.f32 %v7105_v33, %v6973_v43 }
 0x2bd   : > { %v2885_v32 = vpop.f32.mrf.mxu1  ;;  %3539 = vmatprep.mubr.f32.mxu1 %v7630_v21  ;;  %5336 = vtanh.f32 %v2785_v61  ;;  %v2797_v3 = vadd.f32 %v2796_v27, %v6966_v47 }
 0x2be   : > { %v2798_v38 = vpop.f32.mrf.mxu0  ;;  %v5315_v45 = vpop.eup %5314  ;;  %5338 = vtanh.f32 %v2787_v56  ;;  %v2886_v20 = vadd.f32 %v2885_v32, %v6966_v47 }
 0x2bf   : > { %v2887_v12 = vpop.f32.mrf.mxu1  ;;  %4823 = vmatmul.mubr.msk.f32.gmra.mxu0 %vm1159_vm0, %v7047_v2  ;;  %v2799_v39 = vadd.f32 %v2798_v38, %v6966_v47  ;;  %5340 = vtanh.f32 %v2791_v26 }
 0x2c0   : > { %v5317_v28 = vpop.eup %5316  ;;  %4827 = vmatmul.mubr.msk.f32.gmra.mxu1 %vm1159_vm0, %v7047_v2  ;;  %3456 = vmatprep.mubr.f32.mxu0 %v7630_v21  ;;  %v2888_v4 = vadd.f32 %v2887_v12, %v6966_v47 }
 0x2c1   : > { %v5319_v7 = vpop.eup %5318  ;;  %v2802_v19 = vpop.f32.mrf.mxu0  ;;  %3576 = vmatprep.subr.mxu0 %v5317_v28  ;;  %3545 = vmatprep.mubr.f32.mxu1 %v7630_v21  ;;  %5342 = vtanh.f32 %v2799_v39 }
 0x2c2   : > { %v5321_v52 = vpop.eup %5320  ;;  %v2803_v55 = vadd.f32 %v2802_v19, %v6968_v11  ;;  %v2891_v22 = vpop.f32.mrf.mxu1  ;;  %3665 = vmatprep.subr.mxu1 %v5319_v7  ;;  %3577 = vmatpush1.msra.mxu0 %v5315_v45 }
 0x2c3   : > { %v5323_v30 = vpop.eup %5322  ;;  %v2804_v37 = vpop.f32.mrf.mxu0  ;;  %3666 = vmatpush1.msra.mxu1 %v5321_v52  ;;  %3578 = vmatprep.subr.mxu0 %v5313_v0  ;;  %v2892_v54 = vadd.f32 %v2891_v22, %v6968_v11 }
 0x2c4   : > { %v5325_v51 = vpop.eup %5324  ;;  %v2805_v35 = vadd.f32 %v2804_v37, %v6968_v11  ;;  %v2893_v40 = vpop.f32.mrf.mxu1  ;;  %3667 = vmatprep.subr.mxu1 %v5323_v30  ;;  %3579 = vmatpush1.msra.mxu0 %v5311_v14  ;;  %5344 = vtanh.f32 %v2803_v55 }
 0x2c5   : > { %v5327_v59 = vpop.eup %5326  ;;  %v2894_v13 = vadd.f32 %v2893_v40, %v6968_v11  ;;  %3668 = vmatpush1.msra.mxu1 %v5325_v51  ;;  %4824 = vmatmul.mubr.msk.f32.gmra.mxu0 %vm1159_vm0, %v7061_v58 }
 0x2c6   : > { %v5329_v57 = vpop.eup %5328  ;;  %5346 = vtanh.f32 %v2805_v35  ;;  %4828 = vmatmul.mubr.msk.f32.gmra.mxu1 %vm1159_vm0, %v7061_v58  ;;  %3580 = vmatprep.subr.mxu0 %v5327_v59 }
 0x2c7   : > { %v5331_v34 = vpop.eup %5330  ;;  %5348 = vtanh.f32 %v2894_v13  ;;  %v2962_v25 = vpop.f32.mrf.mxu0  ;;  %3669 = vmatprep.subr.mxu1 %v5329_v57  ;;  %3581 = vmatpush1.msra.mxu0 %v5309_v29 }
 0x2c8   : > { %v5333_v36 = vpop.eup %5332  ;;  %5350 = vtanh.f32 %v2892_v54  ;;  %v7136_v44 = vpop.f32.mrf.mxu1  ;;  %3670 = vmatpush1.msra.mxu1 %v5331_v34  ;;  %3582 = vmatprep.subr.mxu0 %v7103_v9  ;;  %v2963_v10 = vadd.f32 %v2962_v25, %v6970_v1 }
 0x2c9   : > { %v5335_v60 = vpop.eup %5334  ;;  %5352 = vtanh.f32 %v2888_v4  ;;  %v2964_v5 = vpop.f32.mrf.mxu0  ;;  %3671 = vmatprep.subr.mxu1 %v5333_v36  ;;  %3583 = vmatpush1.msra.mxu0 %v7099_v62 }
 0x2ca   : > { %5354 = vtanh.f32 %v2797_v3  ;;  %v7144_v49 = vpop.f32.mrf.mxu1  ;;  %3616 = vmatprep.mubr.f32.mxu0 %v7630_v21  ;;  %3672 = vmatpush1.msra.mxu1 %v5335_v60  ;;  %v7162_v6 = vpop.eup %5336  ;;  %v2965_v9 = vadd.f32 %v2964_v5, %v6970_v1  ;;  %v3052_v3 = vadd.f32 %v7136_v44, %v6970_v1 }
 0x2cb   : > { %5356 = vtanh.f32 %v2886_v20  ;;  %v2968_v18 = vpop.f32.mrf.mxu0  ;;  %3705 = vmatprep.mubr.f32.mxu1 %v7630_v21  ;;  %4829 = vmatmul.mubr.msk.f32.vlgmr.msra.gmra.mxu0 %vm1159_vm0, %v7009_v15  ;;  %v7166_v41 = vpop.eup %5338  ;;  %v3054_v57 = vadd.f32 %v7144_v49, %v6970_v1 }
 0x2cc   : > { %5358 = vtanh.f32 %v2793_v8  ;;  %v7154_v17 = vpop.f32.mrf.mxu1  ;;  %4833 = vmatmul.mubr.msk.f32.vlgmr.msra.gmra.mxu1 %vm1159_vm0, %v7009_v15  ;;  %3622 = vmatprep.mubr.f32.mxu0 %v7630_v21  ;;  %v5341_v31 = vpop.eup %5340  ;;  %v2969_v27 = vadd.f32 %v2968_v18, %v6973_v43 }
 0x2cd   : > { %5360 = vtanh.f32 %v2882_v53  ;;  %v7159_v16 = vpop.f32.mrf.mxu0  ;;  %3711 = vmatprep.mubr.f32.mxu1 %v7630_v21  ;;  %v3058_v13 = vadd.f32 %v7154_v17, %v6973_v43 }
 0x2ce   : > { %5362 = vtanh.f32 %v2880_v42  ;;  %v7164_v46 = vpop.f32.mrf.mxu1  ;;  %v5343_v63 = vpop.eup %5342  ;;  %v2971_v40 = vadd.f32 %v7159_v16, %v6973_v43 }
 0x2cf   : > { %5364 = vtanh.f32 %v2876_v23  ;;  %v2974_v48 = vpop.f32.mrf.mxu0  ;;  %4830 = vmatmul.mubr.msk.f32.gmra.mxu0 %vm1159_vm0, %v7027_v24  ;;  %v3060_v4 = vadd.f32 %v7164_v46, %v6973_v43 }
 0x2d0   : > { %5366 = vtanh.f32 %v2874_v50  ;;  %v3063_v62 = vpop.f32.mrf.mxu1  ;;  %4834 = vmatmul.mubr.msk.f32.gmra.mxu1 %vm1159_vm0, %v7027_v24  ;;  %3628 = vmatprep.mubr.f32.mxu0 %v7630_v21  ;;  %v2975_v51 = vadd.f32 %v2974_v48, %v6966_v47  ;;  %v7260_v48 = vpop.permute.xlu1 %3171 }
 0x2d1   : > { %v2976_v33 = vpop.f32.mrf.mxu0  ;;  %3717 = vmatprep.mubr.f32.mxu1 %v7630_v21  ;;  %v5345_v29 = vpop.eup %5344  ;;  %5368 = vtanh.f32 %v2963_v10 }
 0x2d2   : > { %v3065_v14 = vpop.f32.mrf.mxu1  ;;  %v2977_v32 = vadd.f32 %v2976_v33, %v6966_v47  ;;  %5370 = vtanh.f32 %v2965_v9 }
 0x2d3   : > { %v5347_v61 = vpop.eup %5346  ;;  %v2980_v0 = vpop.f32.mrf.mxu0  ;;  %4831 = vmatmul.mubr.msk.f32.gmra.mxu0 %vm1159_vm0, %v7047_v2  ;;  %5372 = vtanh.f32 %v2969_v27  ;;  %v3066_v30 = vadd.f32 %v3065_v14, %v6966_v47 }
 0x2d4   : > { %v5349_v56 = vpop.eup %5348  ;;  %v3069_v38 = vpop.f32.mrf.mxu1  ;;  %4835 = vmatmul.mubr.msk.f32.gmra.mxu1 %vm1159_vm0, %v7047_v2  ;;  %3754 = vmatprep.subr.mxu0 %v5347_v61  ;;  %v2981_v28 = vadd.f32 %v2980_v0, %v6968_v11  ;;  %5374 = vtanh.f32 %v2977_v32 }
 0x2d5   : > { %v5351_v45 = vpop.eup %5350  ;;  %v2982_v26 = vpop.f32.mrf.mxu0  ;;  %3843 = vmatprep.subr.mxu1 %v5349_v56  ;;  %3755 = vmatpush1.msra.mxu0 %v5345_v29  ;;  %v3070_v52 = vadd.f32 %v3069_v38, %v6968_v11 }
 0x2d6   : > { %v5353_v12 = vpop.eup %5352  ;;  %v2983_v39 = vadd.f32 %v2982_v26, %v6968_v11  ;;  %v3071_v7 = vpop.f32.mrf.mxu1  ;;  %3844 = vmatpush1.msra.mxu1 %v5351_v45  ;;  %3756 = vmatprep.subr.mxu0 %v5343_v63 }
 0x2d7   : > { %v5355_v19 = vpop.eup %5354  ;;  %v3072_v55 = vadd.f32 %v3071_v7, %v6968_v11  ;;  %3845 = vmatprep.subr.mxu1 %v5353_v12  ;;  %3634 = vmatprep.mubr.f32.mxu0 %v7630_v21  ;;  %v3064_v11 = vadd.f32 %v3063_v62, %v6966_v47  ;;  %v7273_v12 = vpop.permute.xlu1 %3181 }
 0x2d8   : > { %v5357_v22 = vpop.eup %5356  ;;  %5376 = vtanh.f32 %v2983_v39  ;;  %3723 = vmatprep.mubr.f32.mxu1 %v7630_v21  ;;  %3757 = vmatpush1.msra.mxu0 %v5355_v19 }
 0x2d9   : > { %v5359_v37 = vpop.eup %5358  ;;  %5378 = vtanh.f32 %v3072_v55  ;;  %3846 = vmatpush1.msra.mxu1 %v5357_v22  ;;  %4832 = vmatmul.mubr.msk.f32.gmra.mxu0 %vm1159_vm0, %v7061_v58 }
 0x2da   : > { %v5361_v54 = vpop.eup %5360  ;;  %5380 = vtanh.f32 %v2981_v28  ;;  %4836 = vmatmul.mubr.msk.f32.gmra.mxu1 %vm1159_vm0, %v7061_v58  ;;  %3758 = vmatprep.subr.mxu0 %v5359_v37 }
 0x2db   : > { %v5363_v35 = vpop.eup %5362  ;;  %5382 = vtanh.f32 %v3070_v52  ;;  %3847 = vmatprep.subr.mxu1 %v5361_v54  ;;  %3759 = vmatpush1.msra.mxu0 %v5341_v31 }
 0x2dc   : > { %v5365_v59 = vpop.eup %5364  ;;  %5384 = vtanh.f32 %v3066_v30  ;;  %3848 = vmatpush1.msra.mxu1 %v5363_v35  ;;  %3760 = vmatprep.subr.mxu0 %v7166_v41 }
 0x2dd   : > { %v5367_v47 = vpop.eup %5366  ;;  %5386 = vtanh.f32 %v2975_v51  ;;  %3849 = vmatprep.subr.mxu1 %v5365_v59  ;;  %3761 = vmatpush1.msra.mxu0 %v7162_v6 }
 0x2de   : > { %5388 = vtanh.f32 %v3064_v11  ;;  %3794 = vmatprep.mubr.f32.mxu0 %v7630_v21  ;;  %3850 = vmatpush1.msra.mxu1 %v5367_v47  ;;  %v5369_v43 = vpop.eup %5368 }
 0x2df   : > { %5390 = vtanh.f32 %v2971_v40  ;;  %3883 = vmatprep.mubr.f32.mxu1 %v7630_v21  ;;  %4837 = vmatmul.mubr.msk.f32.vlgmr.msra.gmra.mxu0 %vm1159_vm0, %v7009_v15  ;;  %v5371_v34 = vpop.eup %5370 }
 0x2e0   : > { %5392 = vtanh.f32 %v3060_v4  ;;  %4841 = vmatmul.mubr.msk.f32.vlgmr.msra.gmra.mxu1 %vm1159_vm0, %v7009_v15  ;;  %3800 = vmatprep.mubr.f32.mxu0 %v7630_v21  ;;  %v5373_v20 = vpop.eup %5372 }
 0x2e1   : > { %5394 = vtanh.f32 %v3058_v13  ;;  %3889 = vmatprep.mubr.f32.mxu1 %v7630_v21  ;;  %v5375_v1 = vpop.eup %5374 }
 0x2e2   : > { %5396 = vtanh.f32 %v3054_v57 }
 0x2e3   : > { %5398 = vtanh.f32 %v3052_v3  ;;  %4838 = vmatmul.mubr.msk.f32.gmra.mxu0 %vm1159_vm0, %v7027_v24  ;;  %v5658_v3 = vmov 1966171168  }
 0x2e4   : > { %4842 = vmatmul.mubr.msk.f32.gmra.mxu1 %vm1159_vm0, %v7027_v24  ;;  %3806 = vmatprep.mubr.f32.mxu0 %v7630_v21 }
 0x2e5   : > { %v5377_v25 = vpop.eup %5376  ;;  %3895 = vmatprep.mubr.f32.mxu1 %v7630_v21 }
 0x2e6   : > { %v5379_v36 = vpop.eup %5378  ;;  %3932 = vmatprep.subr.mxu0 %v5377_v25 }
 0x2e7   : > { %v5381_v8 = vpop.eup %5380  ;;  %4839 = vmatmul.mubr.msk.f32.gmra.mxu0 %vm1159_vm0, %v7047_v2  ;;  %4021 = vmatprep.subr.mxu1 %v5379_v36 }
 0x2e8   : > { %v5383_v44 = vpop.eup %5382  ;;  %4843 = vmatmul.mubr.msk.f32.gmra.mxu1 %vm1159_vm0, %v7047_v2  ;;  %3933 = vmatpush1.msra.mxu0 %v5381_v8 }
 0x2e9   : > { %v5385_v60 = vpop.eup %5384  ;;  %4022 = vmatpush1.msra.mxu1 %v5383_v44  ;;  %3934 = vmatprep.subr.mxu0 %v5375_v1 }
 0x2ea   : > { %v5387_v53 = vpop.eup %5386  ;;  %4023 = vmatprep.subr.mxu1 %v5385_v60  ;;  %3812 = vmatprep.mubr.f32.mxu0 %v7630_v21 }
 0x2eb   : > { %v5389_v5 = vpop.eup %5388  ;;  %3901 = vmatprep.mubr.f32.mxu1 %v7630_v21  ;;  %3935 = vmatpush1.msra.mxu0 %v5387_v53 }
 0x2ec   : > { %v5391_v42 = vpop.eup %5390  ;;  %4024 = vmatpush1.msra.mxu1 %v5389_v5  ;;  %4840 = vmatmul.mubr.msk.f32.gmra.mxu0 %vm1159_vm0, %v7061_v58 }
 0x2ed   : > { %v5393_v49 = vpop.eup %5392  ;;  %4844 = vmatmul.mubr.msk.f32.gmra.mxu1 %vm1159_vm0, %v7061_v58  ;;  %3936 = vmatprep.subr.mxu0 %v5391_v42 }
 0x2ee   : > { %v5395_v23 = vpop.eup %5394  ;;  %4025 = vmatprep.subr.mxu1 %v5393_v49  ;;  %3937 = vmatpush1.msra.mxu0 %v5373_v20 }
 0x2ef   : > { %v5397_v18 = vpop.eup %5396  ;;  %4026 = vmatpush1.msra.mxu1 %v5395_v23  ;;  %3938 = vmatprep.subr.mxu0 %v5371_v34  ;;  %v7284_v34 = vpop.permute.xlu1 %4177 }
 0x2f0   : > { %v5399_v50 = vpop.eup %5398  ;;  %4027 = vmatprep.subr.mxu1 %v5397_v18  ;;  %3939 = vmatpush1.msra.mxu0 %v5369_v43  ;;  %v7282_v43 = vunpack.c.l.s4 %v5658_v3 }
 0x2f1   : > { %3972 = vmatprep.mubr.f32.mxu0 %v7630_v21  ;;  %4028 = vmatpush1.msra.mxu1 %v5399_v50 }
 0x2f2   : > { %4061 = vmatprep.mubr.f32.mxu1 %v7630_v21  ;;  %4845 = vmatmul.mubr.msk.f32.vlgmr.msra.gmra.mxu0 %vm1159_vm0, %v7009_v15 }
 0x2f3   : > { %4849 = vmatmul.mubr.msk.f32.vlgmr.msra.gmra.mxu1 %vm1159_vm0, %v7009_v15  ;;  %3978 = vmatprep.mubr.f32.mxu0 %v7630_v21  ;;  %v7255_v15 = vpop.permute.xlu0 %3166 }
 0x2f4   : > { %4067 = vmatprep.mubr.f32.mxu1 %v7630_v21 }
 0x2f6   : > { %4846 = vmatmul.mubr.msk.f32.gmra.mxu0 %vm1159_vm0, %v7027_v24 }
 0x2f7   : > { %4850 = vmatmul.mubr.msk.f32.gmra.mxu1 %vm1159_vm0, %v7027_v24  ;;  %3984 = vmatprep.mubr.f32.mxu0 %v7630_v21  ;;  %v7266_v29 = vpop.permute.xlu0 %3176 }
 0x2f8   : > { %4073 = vmatprep.mubr.f32.mxu1 %v7630_v21 }
 0x2fa   : > { %4847 = vmatmul.mubr.msk.f32.gmra.mxu0 %vm1159_vm0, %v7047_v2 }
 0x2fb   : > { %4851 = vmatmul.mubr.msk.f32.gmra.mxu1 %vm1159_vm0, %v7047_v2  ;;  %3990 = vmatprep.mubr.f32.mxu0 %v7630_v21  ;;  %v7279_v40 = vpop.permute.xlu0 %4172 }
 0x2fc   : > { %4079 = vmatprep.mubr.f32.mxu1 %v7630_v21 }
 0x2fe   : > { %4848 = vmatmul.mubr.msk.f32.gmra.mxu0 %vm1159_vm0, %v7061_v58 }
 0x2ff   : > { %4852 = vmatmul.mubr.msk.f32.gmra.mxu1 %vm1159_vm0, %v7061_v58 }
 0x362   : > { %v3262_v24 = vpop.f32.mrf.mxu0 }
 0x363   : > { %v3263_v17 = vadd.f32 %v3262_v24, %v7255_v15  ;;  %v3351_v16 = vpop.f32.mrf.mxu1 }
 0x364   : > { %v3352_v6 = vadd.f32 %v3351_v16, %v7255_v15  ;;  %v3264_v46 = vpop.f32.mrf.mxu0 }
 0x365   : > { %v3265_v2 = vadd.f32 %v3264_v46, %v7255_v15  ;;  %v3353_v41 = vpop.f32.mrf.mxu1  ;;  %5400 = vtanh.f32 %v3263_v17  ;;  %v7296_v46 = vpop.permute.xlu0 %4182 }
 0x366   : > { %v3354_v21 = vadd.f32 %v3353_v41, %v7255_v15  ;;  %v3268_v31 = vpop.f32.mrf.mxu0  ;;  %5402 = vtanh.f32 %v3352_v6 }
 0x367   : > { %v3269_v58 = vadd.f32 %v3268_v31, %v7260_v48  ;;  %v3357_v10 = vpop.f32.mrf.mxu1  ;;  %5404 = vtanh.f32 %v3265_v2 }
 0x368   : > { %v3358_v62 = vadd.f32 %v3357_v10, %v7260_v48  ;;  %v3270_v63 = vpop.f32.mrf.mxu0  ;;  %5406 = vtanh.f32 %v3354_v21 }
 0x369   : > { %v3271_v9 = vadd.f32 %v3270_v63, %v7260_v48  ;;  %v3359_v33 = vpop.f32.mrf.mxu1  ;;  %5408 = vtanh.f32 %v3269_v58 }
 0x36a   : > { %v3360_v27 = vadd.f32 %v3359_v33, %v7260_v48  ;;  %v3274_v14 = vpop.f32.mrf.mxu0  ;;  %5410 = vtanh.f32 %v3358_v62 }
 0x36b   : > { %v3275_v61 = vadd.f32 %v3274_v14, %v7266_v29  ;;  %v3363_v32 = vpop.f32.mrf.mxu1  ;;  %5412 = vtanh.f32 %v3271_v9 }
 0x36c   : > { %v3364_v0 = vadd.f32 %v3363_v32, %v7266_v29  ;;  %v3276_v56 = vpop.f32.mrf.mxu0  ;;  %5414 = vtanh.f32 %v3360_v27 }
 0x36d   : > { %v3277_v38 = vadd.f32 %v3276_v56, %v7266_v29  ;;  %v3365_v45 = vpop.f32.mrf.mxu1  ;;  %5416 = vtanh.f32 %v3275_v61 }
 0x36e   : > { %v3366_v26 = vadd.f32 %v3365_v45, %v7266_v29  ;;  %5418 = vtanh.f32 %v3364_v0 }
 0x36f   : > { %5420 = vtanh.f32 %v3277_v38 }
 0x370   : > { %5422 = vtanh.f32 %v3366_v26  ;;  %v7307_v26 = vpop.permute.xlu1 %4187 }
 0x371   : > { %v3280_v28 = vpop.f32.mrf.mxu0 }
 0x372   : > { %v3281_v39 = vadd.f32 %v3280_v28, %v7273_v12  ;;  %v3369_v7 = vpop.f32.mrf.mxu1  ;;  %v5401_v19 = vpop.eup %5400 }
 0x373   : > { %v3370_v52 = vadd.f32 %v3369_v7, %v7273_v12  ;;  %v3282_v55 = vpop.f32.mrf.mxu0  ;;  %v5403_v22 = vpop.eup %5402  ;;  %v4190_v36 = vmul.f32 %v5401_v19, %v7279_v40 }
 0x374   : > { %5424 = vtanh.f32 %v3281_v39  ;;  %v3283_v30 = vadd.f32 %v3282_v55, %v7273_v12  ;;  %v3371_v37 = vpop.f32.mrf.mxu1  ;;  %v5405_v51 = vpop.eup %5404  ;;  %v4192_v5 = vmul.f32 %v5403_v22, %v7279_v40 }
 0x375   : > { %5426 = vtanh.f32 %v3370_v52  ;;  %v3372_v54 = vadd.f32 %v3371_v37, %v7273_v12  ;;  %v5407_v11 = vpop.eup %5406  ;;  %v4191_v50 = vmul.f32 %v5405_v51, %v7279_v40 }
 0x376   : > { %5428 = vtanh.f32 %v3283_v30  ;;  %v5409_v35 = vpop.eup %5408  ;;  %v4193_v2 = vmul.f32 %v5407_v11, %v7279_v40 }
 0x377   : > { %5430 = vtanh.f32 %v3372_v54  ;;  %v3440_v59 = vpop.f32.mrf.mxu0  ;;  %v5411_v4 = vpop.eup %5410  ;;  %v4210_v8 = vmul.f32 %v5409_v35, %v7284_v34 }
 0x378   : > { %v3441_v47 = vadd.f32 %v3440_v59, %v7255_v15  ;;  %v3529_v13 = vpop.f32.mrf.mxu1  ;;  %v5413_v57 = vpop.eup %5412  ;;  %v4212_v42 = vmul.f32 %v5411_v4, %v7284_v34 }
 0x379   : > { %v3530_v20 = vadd.f32 %v3529_v13, %v7255_v15  ;;  %v3442_v1 = vpop.f32.mrf.mxu0  ;;  %v5415_v25 = vpop.eup %5414  ;;  %v4211_v24 = vmul.f32 %v5413_v57, %v7284_v34  ;;  %v4270_v10 = vadd.f32 %v4210_v8, %v4190_v36 }
 0x37a   : > { %5432 = vtanh.f32 %v3441_v47  ;;  %v3443_v44 = vadd.f32 %v3442_v1, %v7255_v15  ;;  %v3531_v60 = vpop.f32.mrf.mxu1  ;;  %v5417_v53 = vpop.eup %5416  ;;  %v4213_v41 = vmul.f32 %v5415_v25, %v7284_v34  ;;  %v4288_v33 = vadd.f32 %v4212_v42, %v4192_v5 }
 0x37b   : > { %5434 = vtanh.f32 %v3530_v20  ;;  %v3532_v49 = vadd.f32 %v3531_v60, %v7255_v15  ;;  %v3446_v23 = vpop.f32.mrf.mxu0  ;;  %v5419_v18 = vpop.eup %5418  ;;  %v4230_v62 = vmul.f32 %v5417_v53, %v7296_v46  ;;  %v4279_v32 = vadd.f32 %v4211_v24, %v4191_v50 }
 0x37c   : > { %5436 = vtanh.f32 %v3443_v44  ;;  %v3447_v17 = vadd.f32 %v3446_v23, %v7260_v48  ;;  %v3535_v16 = vpop.f32.mrf.mxu1  ;;  %v5421_v6 = vpop.eup %5420  ;;  %v4232_v27 = vmul.f32 %v5419_v18, %v7296_v46  ;;  %v4297_v28 = vadd.f32 %v4213_v41, %v4193_v2 }
 0x37d   : > { %5438 = vtanh.f32 %v3532_v49  ;;  %v3536_v21 = vadd.f32 %v3535_v16, %v7260_v48  ;;  %v3448_v31 = vpop.f32.mrf.mxu0  ;;  %v5423_v58 = vpop.eup %5422  ;;  %v4231_v0 = vmul.f32 %v5421_v6, %v7296_v46  ;;  %v4271_v55 = vadd.f32 %v4270_v10, %v4230_v62 }
 0x37e   : > { %5440 = vtanh.f32 %v3447_v17  ;;  %v3449_v63 = vadd.f32 %v3448_v31, %v7260_v48  ;;  %v3537_v9 = vpop.f32.mrf.mxu1  ;;  %v4233_v39 = vmul.f32 %v5423_v58, %v7296_v46  ;;  %v4289_v54 = vadd.f32 %v4288_v33, %v4232_v27  ;;  %v4454_v53 = vpop.permute.xlu0 %4453  ;;  %v7647_v31 = vld [vmem:[#allocation10_spill] sm:$0xff] }
 0x37f   : > { %5442 = vtanh.f32 %v3536_v21  ;;  %v3538_v14 = vadd.f32 %v3537_v9, %v7260_v48  ;;  %v3452_v61 = vpop.f32.mrf.mxu0  ;;  %v4280_v4 = vadd.f32 %v4279_v32, %v4231_v0  ;;  %v4506_v6 = vunpack.c.0.s8 %v7282_v43 }
 0x380   : > { %5444 = vtanh.f32 %v3449_v63  ;;  %v3453_v56 = vadd.f32 %v3452_v61, %v7266_v29  ;;  %v3541_v38 = vpop.f32.mrf.mxu1  ;;  %v4298_v57 = vadd.f32 %v4297_v28, %v4233_v39  ;;  %v7321_v58 = vrot.slane %v4454_v53, %v7647_v31 }
 0x381   : > { %v5425_v45 = vpop.eup %5424  ;;  %5446 = vtanh.f32 %v3538_v14  ;;  %v3542_v7 = vadd.f32 %v3541_v38, %v7266_v29  ;;  %v3454_v19 = vpop.f32.mrf.mxu0 }
 0x382   : > { %v5427_v52 = vpop.eup %5426  ;;  %v4250_v22 = vmul.f32 %v5425_v45, %v7307_v26  ;;  %5448 = vtanh.f32 %v3453_v56  ;;  %v3455_v30 = vadd.f32 %v3454_v19, %v7266_v29  ;;  %v3543_v37 = vpop.f32.mrf.mxu1 }
 0x383   : > { %v5429_v51 = vpop.eup %5428  ;;  %v4252_v11 = vmul.f32 %v5427_v52, %v7307_v26  ;;  %5450 = vtanh.f32 %v3542_v7  ;;  %v3544_v35 = vadd.f32 %v3543_v37, %v7266_v29 }
 0x384   : > { %v5431_v59 = vpop.eup %5430  ;;  %v4272_v47 = vadd.f32 %v4271_v55, %v4250_v22  ;;  %v4251_v13 = vmul.f32 %v5429_v51, %v7307_v26  ;;  %5452 = vtanh.f32 %v3455_v30 }
 0x385   : > { %v4290_v3 = vadd.f32 %v4289_v54, %v4252_v11  ;;  %v4253_v20 = vmul.f32 %v5431_v59, %v7307_v26  ;;  %5454 = vtanh.f32 %v3544_v35  ;;  %v3458_v1 = vpop.f32.mrf.mxu0 }
 0x386   : > { %v4273_v25 = vrot.slane %v4272_v47, 4  ;;  %v4281_v36 = vadd.f32 %v4280_v4, %v4251_v13  ;;  %v3459_v8 = vadd.f32 %v3458_v1, %v7273_v12  ;;  %v3547_v44 = vpop.f32.mrf.mxu1 }
 0x387   : > { %v5433_v60 = vpop.eup %5432  ;;  %v4291_v5 = vrot.slane %v4290_v3, 4  ;;  %v4299_v42 = vadd.f32 %v4298_v57, %v4253_v20  ;;  %v3548_v49 = vadd.f32 %v3547_v44, %v7273_v12  ;;  %v3460_v23 = vpop.f32.mrf.mxu0 }
 0x388   : > { %v5435_v18 = vpop.eup %5434  ;;  %v4274_v50 = vadd.f32 %v4273_v25, %v4272_v47  ;;  %v4282_v24 = vrot.slane %v4281_v36, 4  ;;  %5456 = vtanh.f32 %v3459_v8  ;;  %v3549_v17 = vpop.f32.mrf.mxu1  ;;  %v3461_v63 = vadd.f32 %v3460_v23, %v7273_v12  ;;  %v7648_v23 = vld [vmem:[#allocation9_spill] sm:$0xff] }
 0x389   : > { %v5437_v16 = vpop.eup %5436  ;;  %v4292_v2 = vadd.f32 %v4291_v5, %v4290_v3  ;;  %v4300_v41 = vrot.slane %v4299_v42, 4  ;;  %5458 = vtanh.f32 %v3548_v49  ;;  %v4194_v14 = vmul.f32 %v5433_v60, %v7279_v40 }
 0x38a   : > { %v5439_v21 = vpop.eup %5438  ;;  %v4275_v10 = vrot.slane %v4274_v50, 2  ;;  %v4283_v62 = vadd.f32 %v4282_v24, %v4281_v36  ;;  %v3550_v61 = vadd.f32 %v3549_v17, %v7273_v12  ;;  %v4196_v38 = vmul.f32 %v5435_v18, %v7279_v40 }
 0x38b   : > { %v5441_v9 = vpop.eup %5440  ;;  %v4293_v33 = vrot.slane %v4292_v2, 2  ;;  %v4301_v27 = vadd.f32 %v4300_v41, %v4299_v42  ;;  %v3618_v32 = vpop.f32.mrf.mxu0  ;;  %5460 = vtanh.f32 %v3461_v63  ;;  %v4195_v4 = vmul.f32 %v5437_v16, %v7279_v40 }
 0x38c   : > { %v5443_v43 = vpop.eup %5442  ;;  %v4276_v0 = vadd.f32 %v4275_v10, %v4274_v50  ;;  %v4284_v56 = vrot.slane %v4283_v62, 2  ;;  %v3707_v45 = vpop.f32.mrf.mxu1  ;;  %v4214_v19 = vmul.f32 %v5441_v9, %v7284_v34  ;;  %5462 = vtanh.f32 %v3550_v61 }
 0x38d   : > { %v5445_v28 = vpop.eup %5444  ;;  %v4294_v39 = vadd.f32 %v4293_v33, %v4292_v2  ;;  %v4302_v7 = vrot.slane %v4301_v27, 2  ;;  %v3620_v52 = vpop.f32.mrf.mxu0  ;;  %v4216_v37 = vmul.f32 %v5443_v43, %v7284_v34  ;;  %v4197_v1 = vmul.f32 %v5439_v21, %v7279_v40 }
 0x38e   : > { %v5447_v55 = vpop.eup %5446  ;;  %v4277_v22 = vrot.slane %v4276_v0, 1  ;;  %v4285_v30 = vadd.f32 %v4284_v56, %v4283_v62  ;;  %v4215_v51 = vmul.f32 %v5445_v28, %v7284_v34  ;;  %v3709_v54 = vpop.f32.mrf.mxu1  ;;  %v4306_v53 = vadd.f32 %v4214_v19, %v4194_v14 }
 0x38f   : > { %v5449_v11 = vpop.eup %5448  ;;  %v4295_v35 = vrot.slane %v4294_v39, 1  ;;  %v4303_v59 = vadd.f32 %v4302_v7, %v4301_v27  ;;  %v4217_v47 = vmul.f32 %v5447_v55, %v7284_v34  ;;  %v3624_v13 = vpop.f32.mrf.mxu0  ;;  %v7336_v18 = vsub.s32 %v4506_v6, %v7648_v23 }
 0x390   : > { %v5451_v57 = vpop.eup %5450  ;;  %v4278_v3 = vadd.f32 %v4277_v22, %v4276_v0  ;;  %v4286_v20 = vrot.slane %v4285_v30, 1  ;;  %v4234_v25 = vmul.f32 %v5449_v11, %v7296_v46  ;;  %v3713_v36 = vpop.f32.mrf.mxu1  ;;  %v4324_v24 = vadd.f32 %v4216_v37, %v4196_v38 }
 0x391   : > { %v5453_v8 = vpop.eup %5452  ;;  %v4296_v44 = vadd.f32 %v4295_v35, %v4294_v39  ;;  %v4304_v60 = vrot.slane %v4303_v59, 1  ;;  %v4236_v5 = vmul.f32 %v5451_v57, %v7296_v46  ;;  %v3626_v42 = vpop.f32.mrf.mxu0  ;;  %v4315_v17 = vadd.f32 %v4215_v51, %v4195_v4 }
 0x392   : > { %v5455_v49 = vpop.eup %5454  ;;  %v4287_v50 = vadd.f32 %v4286_v20, %v4285_v30  ;;  %v3715_v16 = vpop.f32.mrf.mxu1  ;;  %v7339_v2 = vadd.f32 %v7321_v58, %v4278_v3  ;;  %v4333_v41 = vadd.f32 %v4217_v47, %v4197_v1  ;;  %v4307_v21 = vadd.f32 %v4306_v53, %v4234_v25 }
 0x393   : > { %v4235_v31 = vmul.f32 %v5453_v8, %v7296_v46  ;;  %v3630_v10 = vpop.f32.mrf.mxu0  ;;  %v7343_v62 = vadd.f32 %v7321_v58, %v4296_v44  ;;  %v4305_v63 = vadd.f32 %v4304_v60, %v4303_v59  ;;  %v3619_v9 = vadd.f32 %v3618_v32, %v7255_v15 }
 0x394   : > { %v3708_v6 = vadd.f32 %v3707_v45, %v7255_v15  ;;  %v3719_v33 = vpop.f32.mrf.mxu1  ;;  %v4325_v14 = vadd.f32 %v4324_v24, %v4236_v5  ;;  %v4237_v61 = vmul.f32 %v5455_v49, %v7296_v46  ;;  %v3621_v43 = vadd.f32 %v3620_v52, %v7255_v15 }
 0x395   : > { %v5457_v27 = vpop.eup %5456  ;;  %v3710_v0 = vadd.f32 %v3709_v54, %v7255_v15  ;;  %v3632_v56 = vpop.f32.mrf.mxu0  ;;  %v7351_v28 = vadd.f32 %v7321_v58, %v4287_v50  ;;  %5464 = vtanh.f32 %v3619_v9  ;;  %v3625_v32 = vadd.f32 %v3624_v13, %v7260_v48 }
 0x396   : > { %v5459_v38 = vpop.eup %5458  ;;  %v4254_v39 = vmul.f32 %v5457_v27, %v7307_v26  ;;  %v3721_v45 = vpop.f32.mrf.mxu1  ;;  %v4316_v7 = vadd.f32 %v4315_v17, %v4235_v31  ;;  %5466 = vtanh.f32 %v3708_v6  ;;  %v3714_v55 = vadd.f32 %v3713_v36, %v7260_v48 }
 0x397   : > { %v4256_v19 = vmul.f32 %v5459_v38, %v7307_v26  ;;  %v7358_v52 = vadd.f32 %v7321_v58, %v4305_v63  ;;  %5468 = vtanh.f32 %v3621_v43  ;;  %v3627_v30 = vadd.f32 %v3626_v42, %v7260_v48 }
 0x398   : > { %v4308_v22 = vadd.f32 %v4307_v21, %v4254_v39  ;;  %v5461_v37 = vpop.eup %5460  ;;  %v4334_v51 = vadd.f32 %v4333_v41, %v4237_v61  ;;  %5470 = vtanh.f32 %v3710_v0  ;;  %v3716_v11 = vadd.f32 %v3715_v16, %v7260_v48 }
 0x399   : > { %v4326_v54 = vadd.f32 %v4325_v14, %v4256_v19  ;;  %v3636_v35 = vpop.f32.mrf.mxu0  ;;  %v5463_v59 = vpop.eup %5462  ;;  %v4255_v47 = vmul.f32 %v5461_v37, %v7307_v26  ;;  %5472 = vtanh.f32 %v3625_v32  ;;  %v3631_v13 = vadd.f32 %v3630_v10, %v7266_v29 }
 0x39a   : > { %v4309_v4 = vrot.slane %v4308_v22, 4  ;;  %v3725_v57 = vpop.f32.mrf.mxu1  ;;  %v4257_v20 = vmul.f32 %v5463_v59, %v7307_v26  ;;  %5474 = vtanh.f32 %v3714_v55  ;;  %v3720_v1 = vadd.f32 %v3719_v33, %v7266_v29 }
 0x39b   : > { %v4327_v3 = vrot.slane %v4326_v54, 4  ;;  %v3638_v25 = vpop.f32.mrf.mxu0  ;;  %v4317_v8 = vadd.f32 %v4316_v7, %v4255_v47  ;;  %5476 = vtanh.f32 %v3627_v30  ;;  %v3633_v44 = vadd.f32 %v3632_v56, %v7266_v29 }
 0x39c   : > { %v4310_v36 = vadd.f32 %v4309_v4, %v4308_v22  ;;  %v3727_v60 = vpop.f32.mrf.mxu1  ;;  %v4335_v5 = vadd.f32 %v4334_v51, %v4257_v20  ;;  %5478 = vtanh.f32 %v3716_v11  ;;  %v3722_v42 = vadd.f32 %v3721_v45, %v7266_v29 }
 0x39d   : > { %v4328_v53 = vadd.f32 %v4327_v3, %v4326_v54  ;;  %v4318_v23 = vrot.slane %v4317_v8, 4  ;;  %5480 = vtanh.f32 %v3631_v13  ;;  %v3637_v50 = vadd.f32 %v3636_v35, %v7273_v12 }
 0x39e   : > { %v4311_v49 = vrot.slane %v4310_v36, 2  ;;  %v4336_v17 = vrot.slane %v4335_v5, 4  ;;  %5482 = vtanh.f32 %v3720_v1  ;;  %v3726_v16 = vadd.f32 %v3725_v57, %v7273_v12 }
 0x39f   : > { %v4329_v24 = vrot.slane %v4328_v53, 2  ;;  %v3796_v41 = vpop.f32.mrf.mxu0  ;;  %v4319_v31 = vadd.f32 %v4318_v23, %v4317_v8  ;;  %5484 = vtanh.f32 %v3633_v44  ;;  %v3639_v10 = vadd.f32 %v3638_v25, %v7273_v12 }
 0x3a0   : > { %v4312_v21 = vadd.f32 %v4311_v49, %v4310_v36  ;;  %v3885_v63 = vpop.f32.mrf.mxu1  ;;  %v4337_v6 = vadd.f32 %v4336_v17, %v4335_v5  ;;  %5486 = vtanh.f32 %v3722_v42  ;;  %v3728_v33 = vadd.f32 %v3727_v60, %v7273_v12 }
 0x3a1   : > { %v4330_v9 = vadd.f32 %v4329_v24, %v4328_v53  ;;  %v3798_v27 = vpop.f32.mrf.mxu0  ;;  %v4320_v61 = vrot.slane %v4319_v31, 2  ;;  %5488 = vtanh.f32 %v3637_v50  ;;  %v3797_v43 = vadd.f32 %v3796_v41, %v7255_v15 }
 0x3a2   : > { %v4313_v14 = vrot.slane %v4312_v21, 1  ;;  %v3887_v0 = vpop.f32.mrf.mxu1  ;;  %v5465_v56 = vpop.eup %5464  ;;  %v4338_v39 = vrot.slane %v4337_v6, 2  ;;  %5490 = vtanh.f32 %v3726_v16  ;;  %v3886_v32 = vadd.f32 %v3885_v63, %v7255_v15 }
 0x3a3   : > { %v4331_v38 = vrot.slane %v4330_v9, 1  ;;  %v3802_v45 = vpop.f32.mrf.mxu0  ;;  %v5467_v7 = vpop.eup %5466  ;;  %v4321_v19 = vadd.f32 %v4320_v61, %v4319_v31  ;;  %5492 = vtanh.f32 %v3639_v10  ;;  %v3799_v55 = vadd.f32 %v3798_v27, %v7255_v15 }
 0x3a4   : > { %v3891_v22 = vpop.f32.mrf.mxu1  ;;  %v4500_v30 = vcombine.low %v7339_v2, %v7351_v28  ;;  %v5469_v37 = vpop.eup %5468  ;;  %v4339_v51 = vadd.f32 %v4338_v39, %v4337_v6  ;;  %5494 = vtanh.f32 %v3728_v33  ;;  %v3888_v54 = vadd.f32 %v3887_v0, %v7255_v15 }
 0x3a5   : > { %v3804_v11 = vpop.f32.mrf.mxu0  ;;  %v4501_v35 = vcombine.low %v7343_v62, %v7358_v52  ;;  %v5471_v59 = vpop.eup %5470  ;;  %v7380_v4 = vadd.f32 %v4313_v14, %v4312_v21  ;;  %v4322_v47 = vrot.slane %v4321_v19, 1  ;;  %v4198_v13 = vmul.f32 %v5465_v56, %v7279_v40 }
 0x3a6   : > { %5496 = vtanh.f32 %v3797_v43  ;;  %v3893_v57 = vpop.f32.mrf.mxu1  ;;  %v5473_v3 = vpop.eup %5472  ;;  %v7383_v20 = vadd.f32 %v4331_v38, %v4330_v9  ;;  %v4340_v1 = vrot.slane %v4339_v51, 1  ;;  %v4200_v25 = vmul.f32 %v5467_v7, %v7279_v40 }
 0x3a7   : > { %5498 = vtanh.f32 %v3886_v32  ;;  %v3808_v36 = vpop.f32.mrf.mxu0  ;;  %v5475_v8 = vpop.eup %5474  ;;  %v4199_v44 = vmul.f32 %v5469_v37, %v7279_v40  ;;  %v4218_v60 = vmul.f32 %v5473_v3, %v7284_v34  ;;  %v3803_v53 = vadd.f32 %v3802_v45, %v7260_v48 }
 0x3a8   : > { %5500 = vtanh.f32 %v3799_v55  ;;  %v3897_v5 = vpop.f32.mrf.mxu1  ;;  %v5477_v42 = vpop.eup %5476  ;;  %v4201_v49 = vmul.f32 %v5471_v59, %v7279_v40  ;;  %v4220_v23 = vmul.f32 %v5475_v8, %v7284_v34  ;;  %v3892_v50 = vadd.f32 %v3891_v22, %v7260_v48 }
 0x3a9   : > { %5502 = vtanh.f32 %v3888_v54  ;;  %v3810_v24 = vpop.f32.mrf.mxu0  ;;  %v5479_v17 = vpop.eup %5478  ;;  %v7392_v16 = vadd.f32 %v4322_v47, %v4321_v19  ;;  %v7394_v41 = vadd.f32 %v4340_v1, %v4339_v51  ;;  %v4219_v21 = vmul.f32 %v5477_v42, %v7284_v34 }
 0x3aa   : > { %5504 = vtanh.f32 %v3803_v53  ;;  %v3899_v31 = vpop.f32.mrf.mxu1  ;;  %v5481_v10 = vpop.eup %5480  ;;  %v4342_v63 = vadd.f32 %v4218_v60, %v4198_v13  ;;  %v4360_v9 = vadd.f32 %v4220_v23, %v4200_v25  ;;  %v4221_v6 = vmul.f32 %v5479_v17, %v7284_v34 }
 0x3ab   : > { %5506 = vtanh.f32 %v3892_v50  ;;  %v5483_v33 = vpop.eup %5482  ;;  %v4351_v27 = vadd.f32 %v4219_v21, %v4199_v44  ;;  %v4238_v14 = vmul.f32 %v5481_v10, %v7296_v46  ;;  %v3805_v61 = vadd.f32 %v3804_v11, %v7260_v48 }
 0x3ac   : > { %v3894_v43 = vadd.f32 %v3893_v57, %v7260_v48  ;;  %v3814_v0 = vpop.f32.mrf.mxu0  ;;  %v5485_v56 = vpop.eup %5484  ;;  %v4369_v38 = vadd.f32 %v4221_v6, %v4201_v49  ;;  %v4240_v39 = vmul.f32 %v5483_v33, %v7296_v46  ;;  %v3809_v32 = vadd.f32 %v3808_v36, %v7266_v29 }
 0x3ad   : > { %v3898_v45 = vadd.f32 %v3897_v5, %v7266_v29  ;;  %v3903_v7 = vpop.f32.mrf.mxu1  ;;  %v5487_v19 = vpop.eup %5486  ;;  %v4343_v55 = vadd.f32 %v4342_v63, %v4238_v14  ;;  %v4239_v22 = vmul.f32 %v5485_v56, %v7296_v46  ;;  %5508 = vtanh.f32 %v3805_v61 }
 0x3ae   : > { %v3811_v37 = vadd.f32 %v3810_v24, %v7266_v29  ;;  %v3816_v51 = vpop.f32.mrf.mxu0  ;;  %v5489_v54 = vpop.eup %5488  ;;  %v4361_v11 = vadd.f32 %v4360_v9, %v4240_v39  ;;  %v4241_v59 = vmul.f32 %v5487_v19, %v7296_v46  ;;  %5510 = vtanh.f32 %v3894_v43 }
 0x3af   : > { %v3900_v47 = vadd.f32 %v3899_v31, %v7266_v29  ;;  %v3905_v13 = vpop.f32.mrf.mxu1  ;;  %v5491_v57 = vpop.eup %5490  ;;  %v4352_v3 = vadd.f32 %v4351_v27, %v4239_v22  ;;  %v4258_v1 = vmul.f32 %v5489_v54, %v7307_v26  ;;  %5512 = vtanh.f32 %v3809_v32 }
 0x3b0   : > { %v3815_v25 = vadd.f32 %v3814_v0, %v7273_v12  ;;  %v5493_v36 = vpop.eup %5492  ;;  %v4370_v8 = vadd.f32 %v4369_v38, %v4241_v59  ;;  %v4260_v44 = vmul.f32 %v5491_v57, %v7307_v26  ;;  %5514 = vtanh.f32 %v3898_v45 }
 0x3b1   : > { %v3904_v60 = vadd.f32 %v3903_v7, %v7273_v12  ;;  %v5495_v53 = vpop.eup %5494  ;;  %v4344_v5 = vadd.f32 %v4343_v55, %v4258_v1  ;;  %v4259_v42 = vmul.f32 %v5493_v36, %v7307_v26  ;;  %5516 = vtanh.f32 %v3811_v37 }
 0x3b2   : > { %v3817_v49 = vadd.f32 %v3816_v51, %v7273_v12  ;;  %v3974_v23 = vpop.f32.mrf.mxu0  ;;  %v4362_v24 = vadd.f32 %v4361_v11, %v4260_v44  ;;  %v4261_v17 = vmul.f32 %v5495_v53, %v7307_v26  ;;  %5518 = vtanh.f32 %v3900_v47 }
 0x3b3   : > { %v5497_v50 = vpop.eup %5496  ;;  %v3906_v21 = vadd.f32 %v3905_v13, %v7273_v12  ;;  %v4063_v31 = vpop.f32.mrf.mxu1  ;;  %v7418_v63 = vadd.f32 %v7321_v58, %v7380_v4  ;;  %v4345_v9 = vrot.slane %v4344_v5, 4  ;;  %v4353_v6 = vadd.f32 %v4352_v3, %v4259_v42 }
 0x3b4   : > { %v5499_v10 = vpop.eup %5498  ;;  %5520 = vtanh.f32 %v3815_v25  ;;  %v3976_v33 = vpop.f32.mrf.mxu0  ;;  %v7422_v14 = vadd.f32 %v7321_v58, %v7383_v20  ;;  %v4363_v61 = vrot.slane %v4362_v24, 4  ;;  %v4371_v43 = vadd.f32 %v4370_v8, %v4261_v17 }
 0x3b5   : > { %v5501_v27 = vpop.eup %5500  ;;  %5522 = vtanh.f32 %v3904_v60  ;;  %v4065_v0 = vpop.f32.mrf.mxu1  ;;  %v7426_v38 = vadd.f32 %v7321_v58, %v7392_v16  ;;  %v4346_v4 = vadd.f32 %v4345_v9, %v4344_v5  ;;  %v4354_v39 = vrot.slane %v4353_v6, 4 }
 0x3b6   : > { %v5503_v56 = vpop.eup %5502  ;;  %5524 = vtanh.f32 %v3817_v49  ;;  %v7430_v45 = vadd.f32 %v7321_v58, %v7394_v41  ;;  %v4364_v7 = vadd.f32 %v4363_v61, %v4362_v24  ;;  %v4372_v20 = vrot.slane %v4371_v43, 4  ;;  %v7432_v19 = vpop.f32.mrf.mxu0 }
 0x3b7   : > { %v5505_v32 = vpop.eup %5504  ;;  %5526 = vtanh.f32 %v3906_v21  ;;  %v4347_v22 = vrot.slane %v4346_v4, 2  ;;  %v4355_v37 = vadd.f32 %v4354_v39, %v4353_v6  ;;  %v4202_v51 = vmul.f32 %v5497_v50, %v7279_v40  ;;  %v7436_v54 = vpop.f32.mrf.mxu1 }
 0x3b8   : > { %v5507_v55 = vpop.eup %5506  ;;  %v4222_v16 = vmul.f32 %v5505_v32, %v7284_v34  ;;  %v4365_v11 = vrot.slane %v4364_v7, 2  ;;  %v4373_v59 = vadd.f32 %v4372_v20, %v4371_v43  ;;  %v4204_v47 = vmul.f32 %v5499_v10, %v7279_v40  ;;  %v3982_v53 = vpop.f32.mrf.mxu0 }
 0x3b9   : > { %v3975_v41 = vadd.f32 %v3974_v23, %v7255_v15  ;;  %v4348_v13 = vadd.f32 %v4347_v22, %v4346_v4  ;;  %v4356_v57 = vrot.slane %v4355_v37, 2  ;;  %v4203_v3 = vmul.f32 %v5501_v27, %v7279_v40  ;;  %v4071_v24 = vpop.f32.mrf.mxu1 }
 0x3ba   : > { %v4205_v1 = vmul.f32 %v5503_v56, %v7279_v40  ;;  %v5509_v25 = vpop.eup %5508  ;;  %v4366_v36 = vadd.f32 %v4365_v11, %v4364_v7  ;;  %v4374_v8 = vrot.slane %v4373_v59, 2  ;;  %v4224_v44 = vmul.f32 %v5507_v55, %v7284_v34  ;;  %v3986_v7 = vpop.f32.mrf.mxu0 }
 0x3bb   : > { %v4064_v60 = vadd.f32 %v4063_v31, %v7255_v15  ;;  %v5511_v5 = vpop.eup %5510  ;;  %v4349_v42 = vrot.slane %v4348_v13, 1  ;;  %v4357_v49 = vadd.f32 %v4356_v57, %v4355_v37  ;;  %v4378_v50 = vadd.f32 %v4222_v16, %v4202_v51  ;;  %v4075_v16 = vpop.f32.mrf.mxu1 }
 0x3bc   : > { %v4223_v23 = vmul.f32 %v5509_v25, %v7284_v34  ;;  %v5513_v17 = vpop.eup %5512  ;;  %v4367_v21 = vrot.slane %v4366_v36, 1  ;;  %v4375_v10 = vadd.f32 %v4374_v8, %v4373_v59  ;;  %v4225_v9 = vmul.f32 %v5511_v5, %v7284_v34 }
 0x3bd   : > { %5528 = vtanh.f32 %v3975_v41  ;;  %v5515_v6 = vpop.eup %5514  ;;  %v4350_v27 = vadd.f32 %v4349_v42, %v4348_v13  ;;  %v4358_v61 = vrot.slane %v4357_v49, 1  ;;  %v4242_v43 = vmul.f32 %v5513_v17, %v7296_v46 }
 0x3be   : > { %v3977_v31 = vadd.f32 %v3976_v33, %v7255_v15  ;;  %v5517_v56 = vpop.eup %5516  ;;  %v4396_v4 = vadd.f32 %v4224_v44, %v4204_v47  ;;  %v4244_v39 = vmul.f32 %v5515_v6, %v7296_v46  ;;  %5530 = vtanh.f32 %v4064_v60  ;;  %v3988_v44 = vpop.f32.mrf.mxu0 }
 0x3bf   : > { %v4066_v32 = vadd.f32 %v4065_v0, %v7255_v15  ;;  %v5519_v20 = vpop.eup %5518  ;;  %v4368_v55 = vadd.f32 %v4367_v21, %v4366_v36  ;;  %v4376_v22 = vrot.slane %v4375_v10, 1  ;;  %v4387_v37 = vadd.f32 %v4223_v23, %v4203_v3 }
 0x3c0   : > { %v4243_v51 = vmul.f32 %v5517_v56, %v7296_v46  ;;  %v7452_v59 = vadd.f32 %v7321_v58, %v4350_v27  ;;  %v7454_v33 = vadd.f32 %v4358_v61, %v4357_v49  ;;  %v4405_v47 = vadd.f32 %v4225_v9, %v4205_v1  ;;  %v3992_v56 = vpop.f32.mrf.mxu0 }
 0x3c1   : > { %v5521_v11 = vpop.eup %5520  ;;  %v4245_v41 = vmul.f32 %v5519_v20, %v7296_v46  ;;  %v4379_v57 = vadd.f32 %v4378_v50, %v4242_v43  ;;  %v4397_v15 = vadd.f32 %v4396_v4, %v4244_v39  ;;  %5532 = vtanh.f32 %v3977_v31  ;;  %v4077_v50 = vpop.f32.mrf.mxu1 }
 0x3c2   : > { %v5523_v13 = vpop.eup %5522  ;;  %v4262_v0 = vmul.f32 %v5521_v11, %v7307_v26  ;;  %v4388_v3 = vadd.f32 %v4387_v37, %v4243_v51  ;;  %5534 = vtanh.f32 %v4066_v32  ;;  %v3981_v1 = vadd.f32 %v7432_v19, %v7260_v48 }
 0x3c3   : > { %v5525_v25 = vpop.eup %5524  ;;  %v4406_v36 = vadd.f32 %v4405_v47, %v4245_v41  ;;  %v4264_v8 = vmul.f32 %v5523_v13, %v7307_v26  ;;  %v4070_v49 = vadd.f32 %v7436_v54, %v7260_v48  ;;  %v3983_v21 = vadd.f32 %v3982_v53, %v7260_v48  ;;  %v4081_v53 = vpop.f32.mrf.mxu1 }
 0x3c4   : > { %v5527_v60 = vpop.eup %5526  ;;  %v4380_v5 = vadd.f32 %v4379_v57, %v4262_v0  ;;  %v4263_v42 = vmul.f32 %v5525_v25, %v7307_v26  ;;  %v4072_v9 = vadd.f32 %v4071_v24, %v7260_v48  ;;  %5536 = vtanh.f32 %v3981_v1  ;;  %v3994_v47 = vpop.f32.mrf.mxu0 }
 0x3c5   : > { %v4398_v23 = vadd.f32 %v4397_v15, %v4264_v8  ;;  %v4265_v17 = vmul.f32 %v5527_v60, %v7307_v26  ;;  %v3987_v61 = vadd.f32 %v3986_v7, %v7266_v29  ;;  %5538 = vtanh.f32 %v4070_v49 }
 0x3c6   : > { %v4381_v6 = vrot.slane %v4380_v5, 4  ;;  %v4389_v27 = vadd.f32 %v4388_v3, %v4263_v42  ;;  %v4076_v19 = vadd.f32 %v4075_v16, %v7266_v29  ;;  %v7470_v54 = vadd.f32 %v7321_v58, %v4368_v55 }
 0x3c7   : > { %v4399_v43 = vrot.slane %v4398_v23, 4  ;;  %v4407_v31 = vadd.f32 %v4406_v36, %v4265_v17  ;;  %5540 = vtanh.f32 %v3983_v21  ;;  %v4377_v32 = vadd.f32 %v4376_v22, %v4375_v10  ;;  %v4083_v22 = vpop.f32.mrf.mxu1 }
 0x3c8   : > { %v4382_v4 = vadd.f32 %v4381_v6, %v4380_v5  ;;  %v4390_v39 = vrot.slane %v4389_v27, 4  ;;  %5542 = vtanh.f32 %v4072_v9  ;;  %v3989_v51 = vadd.f32 %v3988_v44, %v7266_v29 }
 0x3c9   : > { %v4400_v48 = vadd.f32 %v4399_v43, %v4398_v23  ;;  %v4408_v24 = vrot.slane %v4407_v31, 4  ;;  %5544 = vtanh.f32 %v3987_v61  ;;  %v4078_v55 = vadd.f32 %v4077_v50, %v7266_v29 }
 0x3ca   : > { %v5529_v20 = vpop.eup %5528  ;;  %v4383_v37 = vrot.slane %v4382_v4, 2  ;;  %v4391_v7 = vadd.f32 %v4390_v39, %v4389_v27  ;;  %5546 = vtanh.f32 %v4076_v19  ;;  %v3993_v10 = vadd.f32 %v3992_v56, %v7273_v12 }
 0x3cb   : > { %v4401_v11 = vrot.slane %v4400_v48, 2  ;;  %v4409_v16 = vadd.f32 %v4408_v24, %v4407_v31  ;;  %v5531_v41 = vpop.eup %5530  ;;  %5548 = vtanh.f32 %v3989_v51  ;;  %v4082_v25 = vadd.f32 %v4081_v53, %v7273_v12 }
 0x3cc   : > { %v4384_v13 = vadd.f32 %v4383_v37, %v4382_v4  ;;  %v4392_v57 = vrot.slane %v4391_v7, 2  ;;  %5550 = vtanh.f32 %v4078_v55  ;;  %v3995_v8 = vadd.f32 %v3994_v47, %v7273_v12 }
 0x3cd   : > { %v4402_v15 = vadd.f32 %v4401_v11, %v4400_v48  ;;  %v4410_v0 = vrot.slane %v4409_v16, 2  ;;  %5552 = vtanh.f32 %v3993_v10  ;;  %v4084_v5 = vadd.f32 %v4083_v22, %v7273_v12 }
 0x3ce   : > { %v4385_v3 = vrot.slane %v4384_v13, 1  ;;  %v4393_v36 = vadd.f32 %v4392_v57, %v4391_v7  ;;  %v5533_v44 = vpop.eup %5532  ;;  %5554 = vtanh.f32 %v4082_v25  ;;  %v4469_v1 = vadd.f32 %v7321_v58, %v7454_v33 }
 0x3cf   : > { %v4403_v29 = vrot.slane %v4402_v15, 1  ;;  %v4411_v60 = vadd.f32 %v4410_v0, %v4409_v16  ;;  %v5535_v42 = vpop.eup %5534  ;;  %v4471_v49 = vadd.f32 %v7321_v58, %v4377_v32  ;;  %5556 = vtanh.f32 %v3995_v8 }
 0x3d0   : > { %v4394_v50 = vrot.slane %v4393_v36, 1  ;;  %v4386_v23 = vadd.f32 %v4385_v3, %v4384_v13  ;;  %v4206_v21 = vmul.f32 %v5529_v20, %v7279_v40  ;;  %5558 = vtanh.f32 %v4084_v5 }
 0x3d1   : > { %v4412_v17 = vrot.slane %v4411_v60, 1  ;;  %v4404_v9 = vadd.f32 %v4403_v29, %v4402_v15  ;;  %v4502_v12 = vcombine.low %v7418_v63, %v7426_v38  ;;  %v4503_v27 = vcombine.low %v7422_v14, %v7430_v45  ;;  %v5537_v33 = vpop.eup %5536 }
 0x3d2   : > { %v4395_v6 = vadd.f32 %v4394_v50, %v4393_v36  ;;  %v4208_v43 = vmul.f32 %v5531_v41, %v7279_v40  ;;  %v4510_v31 = vrot.slane %v4500_v30, %v7336_v18  ;;  %v4517_v19 = vrot.slane %v4501_v35, %v7336_v18  ;;  %v5539_v56 = vpop.eup %5538 }
 0x3d3   : > { %v4413_v61 = vadd.f32 %v4412_v17, %v4411_v60  ;;  %v4207_v38 = vmul.f32 %v5533_v44, %v7279_v40  ;;  %v4524_v14 = vrot.slane %v4502_v12, %v7336_v18  ;;  %v4531_v45 = vrot.slane %v4503_v27, %v7336_v18 }
 0x3d4   : > { %v4473_v63 = vadd.f32 %v7321_v58, %v4395_v6  ;;  %v5541_v4 = vpop.eup %5540  ;;  %v4472_v39 = vadd.f32 %v7321_v58, %v4386_v23  ;;  %v4532_v28 = vcombine.low %v4510_v31, %v4517_v19  ;;  %v4549_v62 = vcombine.low %v7452_v59, %v4469_v1 }
 0x3d5   : > { %v4475_v2 = vadd.f32 %v7321_v58, %v4413_v61  ;;  %v5543_v52 = vpop.eup %5542  ;;  %v4474_v30 = vadd.f32 %v7321_v58, %v4404_v9  ;;  %v4226_v35 = vmul.f32 %v5537_v33, %v7284_v34  ;;  %v4533_v53 = vcombine.low %v4524_v14, %v4531_v45 }
 0x3d6   : > { %v4550_v32 = vcombine.low %v7470_v54, %v4471_v49  ;;  %v5545_v48 = vpop.eup %5544  ;;  %v4228_v24 = vmul.f32 %v5539_v56, %v7284_v34  ;;  %v4227_v20 = vmul.f32 %v5541_v4, %v7284_v34  ;;  %v4229_v37 = vmul.f32 %v5543_v52, %v7284_v34 }
 0x3d7   : > { %v4551_v7 = vcombine.low %v4472_v39, %v4473_v63  ;;  %v5547_v51 = vpop.eup %5546  ;;  %v4246_v11 = vmul.f32 %v5545_v48, %v7296_v46  ;;  %v4540_v59 = vrot.slane %v4532_v28, %v7336_v18  ;;  %v4547_v16 = vrot.slane %v4533_v53, %v7336_v18 }
 0x3d8   : > { %v4552_v55 = vcombine.low %v4474_v30, %v4475_v2  ;;  %v5549_v47 = vpop.eup %5548  ;;  %v4209_v41 = vmul.f32 %v5535_v42, %v7279_v40  ;;  %v4248_v54 = vmul.f32 %v5547_v51, %v7296_v46  ;;  %v4559_v13 = vrot.slane %v4549_v62, %v7336_v18 }
 0x3d9   : > { %v4566_v57 = vrot.slane %v4550_v32, %v7336_v18  ;;  %v5551_v34 = vpop.eup %5550  ;;  %v4414_v10 = vadd.f32 %v4226_v35, %v4206_v21  ;;  %v4247_v22 = vmul.f32 %v5549_v47, %v7296_v46  ;;  %v4548_v15 = vcombine.low %v4540_v59, %v4547_v16 }
 0x3da   : > { %v4573_v0 = vrot.slane %v4551_v7, %v7336_v18  ;;  %v5553_v25 = vpop.eup %5552  ;;  %v4432_v3 = vadd.f32 %v4228_v24, %v4208_v43  ;;  %v4249_v36 = vmul.f32 %v5551_v34, %v7296_v46  ;;  %v4580_v40 = vrot.slane %v4552_v55, %v7336_v18 }
 0x3db   : > { %v4581_v8 = vcombine.low %v4559_v13, %v4566_v57  ;;  %v5555_v44 = vpop.eup %5554  ;;  %v4423_v29 = vadd.f32 %v4227_v20, %v4207_v38  ;;  %v4441_v60 = vadd.f32 %v4229_v37, %v4209_v41  ;;  %v4415_v5 = vadd.f32 %v4414_v10, %v4246_v11  ;;  %4625 = vst [vmem:[%s7526_s18] sm:$0xff] %v4548_v15 }
 0x3dc   : > { %v4266_v42 = vmul.f32 %v5553_v25, %v7307_v26  ;;  %v5557_v1 = vpop.eup %5556  ;;  %v4433_v49 = vadd.f32 %v4432_v3, %v4248_v54  ;;  %v4268_v50 = vmul.f32 %v5555_v44, %v7307_v26  ;;  %v4582_v23 = vcombine.low %v4573_v0, %v4580_v40 }
 0x3dd   : > { %v5559_v17 = vpop.eup %5558  ;;  %v4424_v46 = vadd.f32 %v4423_v29, %v4247_v22  ;;  %v4442_v21 = vadd.f32 %v4441_v60, %v4249_v36  ;;  %v4267_v6 = vmul.f32 %v5557_v1, %v7307_v26  ;;  %v4589_v33 = vrot.slane %v4581_v8, %v7336_v18 }
 0x3de   : > { %v4416_v9 = vadd.f32 %v4415_v5, %v4266_v42  ;;  %v4434_v12 = vadd.f32 %v4433_v49, %v4268_v50  ;;  %v4269_v27 = vmul.f32 %v5559_v17, %v7307_v26  ;;  %v4596_v61 = vrot.slane %v4582_v23, %v7336_v18 }
 0x3df   : > { %v4425_v31 = vadd.f32 %v4424_v46, %v4267_v6  ;;  %v7649_v22 = vlaneseq }
 0x3e0   : > { %v4417_v43 = vrot.slane %v4416_v9, 4  ;;  %v4435_v19 = vrot.slane %v4434_v12, 4  ;;  %v4443_v56 = vadd.f32 %v4442_v21, %v4269_v27  ;;  %v4597_v63 = vcombine.low %v4589_v33, %v4596_v61 }
 0x3e1   : > { %v4426_v14 = vrot.slane %v4425_v31, 4  ;;  %vm4629_vm1 = vcmp.lt.s32.totalorder %v7649_v22, 512 }
 0x3e2   : > { %v4418_v38 = vadd.f32 %v4417_v43, %v4416_v9  ;;  %v4436_v45 = vadd.f32 %v4435_v19, %v4434_v12  ;;  %v4444_v4 = vrot.slane %v4443_v56, 4  ;;  %4626 = vst [vmem:[%s7526_s18 + $0x8] sm:$0xff] %v4597_v63 }
 0x3e3   : > { %v4427_v2 = vadd.f32 %v4426_v14, %v4425_v31 }
 0x3e4   : > { %v4419_v39 = vrot.slane %v4418_v38, 2  ;;  %v4437_v28 = vrot.slane %v4436_v45, 2  ;;  %v4445_v62 = vadd.f32 %v4444_v4, %v4443_v56 }
 0x3e5   : > { %v4428_v26 = vrot.slane %v4427_v2, 2 }
 0x3e6   : > { %v4420_v52 = vadd.f32 %v4419_v39, %v4418_v38  ;;  %v4438_v30 = vadd.f32 %v4437_v28, %v4436_v45  ;;  %v4446_v35 = vrot.slane %v4445_v62, 2 }
 0x3e7   : > { %v4429_v32 = vadd.f32 %v4428_v26, %v4427_v2 }
 0x3e8   : > { %v4421_v53 = vrot.slane %v4420_v52, 1  ;;  %v4439_v48 = vrot.slane %v4438_v30, 1  ;;  %v4447_v24 = vadd.f32 %v4446_v35, %v4445_v62 }
 0x3e9   : > { %v4430_v37 = vrot.slane %v4429_v32, 1 }
 0x3ea   : > { %v4422_v20 = vadd.f32 %v4421_v53, %v4420_v52  ;;  %v4440_v7 = vadd.f32 %v4439_v48, %v4438_v30  ;;  %v4448_v51 = vrot.slane %v4447_v24, 1 }
 0x3eb   : > { %v4431_v11 = vadd.f32 %v4430_v37, %v4429_v32 }
 0x3ec   : > { %v4449_v59 = vadd.f32 %v4448_v51, %v4447_v24  ;;  %v4476_v16 = vadd.f32 %v7321_v58, %v4422_v20  ;;  %v4478_v47 = vadd.f32 %v7321_v58, %v4440_v7 }
 0x3ed   : > { %v4477_v55 = vadd.f32 %v7321_v58, %v4431_v11 }
 0x3ee   : > { %v4479_v41 = vadd.f32 %v7321_v58, %v4449_v59 }
 0x3ef   : > { %v4598_v54 = vcombine.low %v4476_v16, %v4477_v55 }
 0x3f0   : > { %v4599_v13 = vcombine.low %v4478_v47, %v4479_v41 }
 0x3f1   : > { %v4606_v57 = vrot.slane %v4598_v54, %v7336_v18 }
 0x3f2   : > { %v4613_v34 = vrot.slane %v4599_v13, %v7336_v18 }
 0x3f4   : > { %v4614_v10 = vcombine.low %v4606_v57, %v4613_v34 }
 0x3f6   : > { %v4621_v15 = vrot.slane %v4614_v10, %v7336_v18 }
 0x3f8   : > { %4631 = vst.msk [vmem:[%s7526_s18 + $0x10] sm:$0xf] %vm4629_vm1, %v4621_v15 }
 0x3f9   : > { %5599 = shalt.err (!%p5596_p0)
}
 0x3fa   : > { %s5600_s10 = scalar_lea.hbm %s4645_s23, 320  ;;  %s5604_s16 = scalar_lea.hbm %s7587_s7, 1280 }
 0x3fb   : > { %p5601_p1 = scmp.ne.s32.totalorder %s4645_s23, %s5600_s10  ;;  %p5605_p4 = scmp.lt.s32.totalorder %s4645_s23, %s7587_s7 }
 0x3fc   : > { %p5606_p7 = scmp.lt.s32.totalorder %s5604_s16, %s5600_s10 }
 0x3fd   : > { %p5602_p2 = pnand %p5601_p1, %p5741_p5 }
 0x3fe   : > { %p5607_p6 = por %p5606_p7, %p5605_p4 }
 0x3ff   : > { %p5603_p3 = pneg %p5602_p2 }
 0x401   : > { %p5608_p8 = pnand %p5607_p6, %p5603_p3 }
 0x403   : > { %5611 = shalt.err (!%p5608_p8)
}
 0x404   : > { %4862 = dma.vmem_to_hbm [thread:$0]  (%p5741_p5), %s4648_s20, 320, %s4645_s23, %s4633_s24  }
 0x405 PF: > { %p4874_p9 = scmp.ge.s32.totalorder %s5650_s29, 2  ;;  %s4659_s19 = sand.u32 1, %s5638_s26  }
 0x406   : > { %p7650_p10 = scmp.ne.s32.totalorder %s7610_s13, 0  ;;  %s4660_s21 = scalar_lea.sflag [#allocation5], %s4659_s19 }
 0x408   : > { %p4869_p11 = pnand %p4874_p9, %p7650_p10 }
 0x40a   : > { %p4870_p12 = pneg %p4869_p11 }
 0x40c   : > { %5633 = dma.done.wait (%p4870_p12), %s4660_s21, 320  }
 0x40d   : > { %5635 = vsyncadd (%p4870_p12), %s4660_s21, 4294966976  ;;  %p20_p13 = scmp.ge.s32.totalorder %s5728_s8, 6   ;;  %s7651_s26 = smov %s5642_s27 }
 0x40e   : > { %s7652_s27 = smov %s5646_s28  ;;  %s7653_s28 = smov %s5739_s11 }
 0x40f   : > { %s7654_s29 = smov %s5728_s8  ;;  %22 = sbr.rel (!%p20_p13) target bundleno = 7 (0x7), region = 92 }
 0x414   :  { %4665 = vsyncpa [#allocation4], 1 }
 0x415   :  { %4667 = vsyncpa [#allocation4 + $0x1], 1 }
 0x416   :  { %4668 = vsyncpa [#allocation5], 1 }
 0x417   :  { %4670 = vsyncpa [#allocation5 + $0x1], 1 }

</bundles_post_ra>
